<compile_context>
chip_gen: v5e
topology: v5e:2x2
jax: 0.10.0
libtpu: 0.0.40
codegen_flags: <defaults>
</compile_context>

<pallas_src>
import jax
import jax.numpy as jnp
from jax.experimental import pallas as pl
from jax.experimental.pallas import tpu as pltpu

EPS = 1e-5


# ----------------------------- fused kernel ---------------------------------
def resnet_block_kernel(x_ref, w1_ref, s1_ref, w2_ref, s2_ref, o_ref, pad_ref):
    """Fused ResnetBlock forward for one image.

    x_ref  : (1, H, W, C) input image (NHWC), f32
    w*_ref : (9*C, C)     conv weights with BN scale folded in (rows = (tap, c_in))
    s*_ref : (1, C)       folded BN shift (f32)
    o_ref  : (1, H, W, C) output, f32
    pad_ref: VMEM scratch (H+2, W+2, C) f32 - reflection-pad buffer reused by
             both conv stages (fully overwritten each use).
    """
    _, h, w, c = x_ref.shape

    def conv3x3_affine(img, w_ref, shift_ref):
        # ---- 1-px reflection pad, done in-kernel into the VMEM scratch ----
        pad_ref[1:h + 1, 1:w + 1, :] = img
        pad_ref[0:1, 1:w + 1, :] = img[1:2]                   # top row    <- row 1
        pad_ref[h + 1:h + 2, 1:w + 1, :] = img[h - 2:h - 1]   # bottom row <- row H-2
        pad_ref[:, 0:1, :] = pad_ref[:, 2:3, :]               # left col + corners
        pad_ref[:, w + 1:w + 2, :] = pad_ref[:, w - 1:w, :]   # right col + corners

        # ---- im2col: 9 shifted taps -> (H*W, 9C), then ONE MXU matmul ----
        taps = [pad_ref[dh:dh + h, dw:dw + w, :]
                for dh in range(3) for dw in range(3)]
        patches = jnp.concatenate(taps, axis=-1).reshape(h * w, 9 * c)
        y = jnp.dot(patches.astype(w_ref.dtype), w_ref[...],
                    preferred_element_type=jnp.float32)       # f32 accumulation
        return y + shift_ref[...]                             # (H*W, C), f32

    x = x_ref[0].astype(jnp.float32)                          # (H, W, C)

    # Stage 1: ReflectionPad -> Conv1 (+BN1 folded) -> ReLU  (Dropout = identity)
    h1 = jnp.maximum(conv3x3_affine(x, w1_ref, s1_ref), 0.0)

    # Stage 2: ReflectionPad -> Conv2 (+BN2 folded) -> residual add (kept in f32)
    y2 = conv3x3_affine(h1.reshape(h, w, c), w2_ref, s2_ref)
    o_ref[0] = (x + y2.reshape(h, w, c)).astype(o_ref.dtype)


# --------------------------- parameter folding ------------------------------
def _fold_params(w, b, gamma, beta, mean, var, c, matmul_dtype):
    """Fold conv bias + inference BN into (im2col weight matrix, shift).

    PyTorch conv weight layout (C_out, C_in, kH, kW) -> rows ordered (tap, c_in)
    to match the im2col concat order (tap = dh*3 + dw).  BN scale is folded into
    the weights so the kernel epilogue is only '+ shift'.
    """
    scale = gamma / jnp.sqrt(var + EPS)                              # (C,)
    wm = jnp.transpose(w, (2, 3, 1, 0)).reshape(9 * c, c)            # (9*Cin, Cout)
    wm = (wm * scale[None, :]).astype(matmul_dtype)
    shift = ((b - mean) * scale + beta).reshape(1, c).astype(jnp.float32)
    return wm, shift


# ------------------------------- wrapper -------------------------------------
def resnet_block_forward(x_nchw, params, *, matmul_dtype=jnp.float32):
    x = jnp.transpose(x_nchw, (0, 2, 3, 1)).astype(jnp.float32)      # -> NHWC
    n, h, w, c = x.shape

    w1m, s1 = _fold_params(params["w1"], params["b1"], params["g1"],
                           params["beta1"], params["rm1"], params["rv1"],
                           c, matmul_dtype)
    w2m, s2 = _fold_params(params["w2"], params["b2"], params["g2"],
                           params["beta2"], params["rm2"], params["rv2"],
                           c, matmul_dtype)

    img_spec = pl.BlockSpec((1, h, w, c), lambda b: (b, 0, 0, 0))
    w_spec = pl.BlockSpec((9 * c, c), lambda b: (0, 0))
    vec_spec = pl.BlockSpec((1, c), lambda b: (0, 0))

    out = pl.pallas_call(
        resnet_block_kernel,
        out_shape=jax.ShapeDtypeStruct((n, h, w, c), jnp.float32),
        grid=(n,),
        in_specs=[img_spec, w_spec, vec_spec, w_spec, vec_spec],
        out_specs=img_spec,
        scratch_shapes=[pltpu.VMEM((h + 2, w + 2, c), jnp.float32)],
        compiler_params=pltpu.CompilerParams(
            dimension_semantics=("parallel",),
            vmem_limit_bytes=32 * 1024 * 1024),
    )(x, w1m, s1, w2m, s2)

    return jnp.transpose(out, (0, 3, 1, 2))                          # NHWC -> NCHW


# ------------------------ pure-JAX reference (for checking) ------------------
def resnet_block_reference(x_nchw, params):
    def conv_bn(x, w, b, g, beta, mean, var):
        xp = jnp.pad(x, ((0, 0), (0, 0), (1, 1), (1, 1)), mode="reflect")
        y = jax.lax.conv_general_dilated(
            xp, w, (1, 1), "VALID", dimension_numbers=("NCHW", "OIHW", "NCHW"))
        y = y + b[None, :, None, None]
        y = (y - mean[None, :, None, None]) * jax.lax.rsqrt(
            var[None, :, None, None] + EPS)
        return y * g[None, :, None, None] + beta[None, :, None, None]

    h = jax.nn.relu(conv_bn(x_nchw, params["w1"], params["b1"], params["g1"],
                            params["beta1"], params["rm1"], params["rv1"]))
    return x_nchw + conv_bn(h, params["w2"], params["b2"], params["g2"],
                            params["beta2"], params["rm2"], params["rv2"])


def make_params(key, dim):
    ks = jax.random.split(key, 12)
    return {
        "w1": 0.1 * jax.random.normal(ks[0], (dim, dim, 3, 3), jnp.float32),
        "b1": 0.1 * jax.random.normal(ks[1], (dim,), jnp.float32),
        "g1": jax.random.uniform(ks[2], (dim,), jnp.float32, 0.5, 1.5),
        "beta1": 0.1 * jax.random.normal(ks[3], (dim,), jnp.float32),
        "rm1": 0.1 * jax.random.normal(ks[4], (dim,), jnp.float32),
        "rv1": jax.random.uniform(ks[5], (dim,), jnp.float32, 0.5, 1.5),
        "w2": 0.1 * jax.random.normal(ks[6], (dim, dim, 3, 3), jnp.float32),
        "b2": 0.1 * jax.random.normal(ks[7], (dim,), jnp.float32),
        "g2": jax.random.uniform(ks[8], (dim,), jnp.float32, 0.5, 1.5),
        "beta2": 0.1 * jax.random.normal(ks[9], (dim,), jnp.float32),
        "rm2": 0.1 * jax.random.normal(ks[10], (dim,), jnp.float32),
        "rv2": jax.random.uniform(ks[11], (dim,), jnp.float32, 0.5, 1.5),
    }


if __name__ == "__main__":
    key = jax.random.PRNGKey(0)
    kx, kp = jax.random.split(key)

    N, C, H, W = 2, 8, 16, 16
    x = jax.random.normal(kx, (N, C, H, W), jnp.float32)     # NCHW like PyTorch
    params = make_params(kp, C)

    ref = jax.block_until_ready(resnet_block_reference(x, params))

    fwd = jax.jit(resnet_block_forward, static_argnames=("matmul_dtype",))

    # f32 matmul path (tight correctness check).
    out_f32 = jax.block_until_ready(fwd(x, params, matmul_dtype=jnp.float32))
    assert out_f32.shape == (N, C, H, W)
    err_f32 = float(jnp.max(jnp.abs(out_f32 - ref)))
    assert err_f32 < 1e-2, f"f32 mismatch vs reference: max_err={err_f32}"

    # bf16 MXU path (recommended on v5e/v6e/v7x): bf16 operands, f32 accumulation,
    # residual and BN shift stay f32.
    out_bf16 = jax.block_until_ready(fwd(x, params, matmul_dtype=jnp.bfloat16))
    err_bf16 = float(jnp.max(jnp.abs(out_bf16 - ref)))
    assert err_bf16 < 1e-1, f"bf16 mismatch vs reference: max_err={err_bf16}"

    print("KERNEL_OK")
</pallas_src>

<mosaic_0001>
module attributes {stable_mosaic.version = 11 : i64} {
  func.func @resnet_block_kernel(%arg0: i32, %arg1: memref<1x16x16x8xf32, #tpu.memory_space<vmem>>, %arg2: memref<72x8xf32, #tpu.memory_space<vmem>>, %arg3: memref<1x8xf32, #tpu.memory_space<vmem>>, %arg4: memref<72x8xf32, #tpu.memory_space<vmem>>, %arg5: memref<1x8xf32, #tpu.memory_space<vmem>>, %arg6: memref<1x16x16x8xf32, #tpu.memory_space<vmem>>, %arg7: memref<18x18x8xf32, #tpu.memory_space<vmem>>) attributes {dimension_semantics = [#tpu.dimension_semantics<parallel>], iteration_bounds = array<i64: 2>, scalar_prefetch = 0 : i64, scratch_operands = 1 : i64, tpu.core_type = #tpu.core_type<tc>, window_params = [{transform_indices = @transform_0, window_bounds = array<i64: 1, 16, 16, 8>}, {pipeline_mode = #tpu.pipeline_mode<synchronous>, transform_indices = @transform_1, window_bounds = array<i64: 72, 8>}, {pipeline_mode = #tpu.pipeline_mode<synchronous>, transform_indices = @transform_2, window_bounds = array<i64: 1, 8>}, {pipeline_mode = #tpu.pipeline_mode<synchronous>, transform_indices = @transform_3, window_bounds = array<i64: 72, 8>}, {pipeline_mode = #tpu.pipeline_mode<synchronous>, transform_indices = @transform_4, window_bounds = array<i64: 1, 8>}, {transform_indices = @transform_5, window_bounds = array<i64: 1, 16, 16, 8>}]} {
    %c0 = arith.constant 0 : index
    %c0_0 = arith.constant 0 : index
    %c0_1 = arith.constant 0 : index
    %c0_2 = arith.constant 0 : index
    %0 = vector.load %arg1[%c0, %c0_0, %c0_1, %c0_2] : memref<1x16x16x8xf32, #tpu.memory_space<vmem>>, vector<1x16x16x8xf32>
    %1 = vector.shape_cast %0 : vector<1x16x16x8xf32> to vector<16x16x8xf32>
    %c1 = arith.constant 1 : index
    %c1_3 = arith.constant 1 : index
    %c0_4 = arith.constant 0 : index
    %2 = vector.load %arg7[%c1, %c1_3, %c0_4] : memref<18x18x8xf32, #tpu.memory_space<vmem>>, vector<16x16x8xf32>
    tpu.vector_store %arg7[%c1, %c1_3, %c0_4], %1 {strides = array<i32>} : memref<18x18x8xf32, #tpu.memory_space<vmem>>, vector<16x16x8xf32>,
    %3 = vector.extract_strided_slice %1 {offsets = [1, 0, 0], sizes = [1, 16, 8], strides = [1, 1, 1]} : vector<16x16x8xf32> to vector<1x16x8xf32>
    %c0_5 = arith.constant 0 : index
    %c1_6 = arith.constant 1 : index
    %c0_7 = arith.constant 0 : index
    %4 = vector.load %arg7[%c0_5, %c1_6, %c0_7] : memref<18x18x8xf32, #tpu.memory_space<vmem>>, vector<1x16x8xf32>
    tpu.vector_store %arg7[%c0_5, %c1_6, %c0_7], %3 {strides = array<i32>} : memref<18x18x8xf32, #tpu.memory_space<vmem>>, vector<1x16x8xf32>,
    %5 = vector.extract_strided_slice %1 {offsets = [14, 0, 0], sizes = [1, 16, 8], strides = [1, 1, 1]} : vector<16x16x8xf32> to vector<1x16x8xf32>
    %c17 = arith.constant 17 : index
    %c1_8 = arith.constant 1 : index
    %c0_9 = arith.constant 0 : index
    %6 = vector.load %arg7[%c17, %c1_8, %c0_9] : memref<18x18x8xf32, #tpu.memory_space<vmem>>, vector<1x16x8xf32>
    tpu.vector_store %arg7[%c17, %c1_8, %c0_9], %5 {strides = array<i32>} : memref<18x18x8xf32, #tpu.memory_space<vmem>>, vector<1x16x8xf32>,
    %c0_10 = arith.constant 0 : index
    %c2 = arith.constant 2 : index
    %c0_11 = arith.constant 0 : index
    %7 = vector.load %arg7[%c0_10, %c2, %c0_11] : memref<18x18x8xf32, #tpu.memory_space<vmem>>, vector<18x1x8xf32>
    %c0_12 = arith.constant 0 : index
    %c0_13 = arith.constant 0 : index
    %c0_14 = arith.constant 0 : index
    %8 = vector.load %arg7[%c0_12, %c0_13, %c0_14] : memref<18x18x8xf32, #tpu.memory_space<vmem>>, vector<18x1x8xf32>
    tpu.vector_store %arg7[%c0_12, %c0_13, %c0_14], %7 {strides = array<i32>} : memref<18x18x8xf32, #tpu.memory_space<vmem>>, vector<18x1x8xf32>,
    %c0_15 = arith.constant 0 : index
    %c15 = arith.constant 15 : index
    %c0_16 = arith.constant 0 : index
    %9 = vector.load %arg7[%c0_15, %c15, %c0_16] : memref<18x18x8xf32, #tpu.memory_space<vmem>>, vector<18x1x8xf32>
    %c0_17 = arith.constant 0 : index
    %c17_18 = arith.constant 17 : index
    %c0_19 = arith.constant 0 : index
    %10 = vector.load %arg7[%c0_17, %c17_18, %c0_19] : memref<18x18x8xf32, #tpu.memory_space<vmem>>, vector<18x1x8xf32>
    tpu.vector_store %arg7[%c0_17, %c17_18, %c0_19], %9 {strides = array<i32>} : memref<18x18x8xf32, #tpu.memory_space<vmem>>, vector<18x1x8xf32>,
    %c0_20 = arith.constant 0 : index
    %c0_21 = arith.constant 0 : index
    %c0_22 = arith.constant 0 : index
    %11 = vector.load %arg7[%c0_20, %c0_21, %c0_22] : memref<18x18x8xf32, #tpu.memory_space<vmem>>, vector<16x16x8xf32>
    %c0_23 = arith.constant 0 : index
    %c1_24 = arith.constant 1 : index
    %c0_25 = arith.constant 0 : index
    %12 = vector.load %arg7[%c0_23, %c1_24, %c0_25] : memref<18x18x8xf32, #tpu.memory_space<vmem>>, vector<16x16x8xf32>
    %c0_26 = arith.constant 0 : index
    %c2_27 = arith.constant 2 : index
    %c0_28 = arith.constant 0 : index
    %13 = vector.load %arg7[%c0_26, %c2_27, %c0_28] : memref<18x18x8xf32, #tpu.memory_space<vmem>>, vector<16x16x8xf32>
    %c1_29 = arith.constant 1 : index
    %c0_30 = arith.constant 0 : index
    %c0_31 = arith.constant 0 : index
    %14 = vector.load %arg7[%c1_29, %c0_30, %c0_31] : memref<18x18x8xf32, #tpu.memory_space<vmem>>, vector<16x16x8xf32>
    %c1_32 = arith.constant 1 : index
    %c1_33 = arith.constant 1 : index
    %c0_34 = arith.constant 0 : index
    %15 = vector.load %arg7[%c1_32, %c1_33, %c0_34] : memref<18x18x8xf32, #tpu.memory_space<vmem>>, vector<16x16x8xf32>
    %c1_35 = arith.constant 1 : index
    %c2_36 = arith.constant 2 : index
    %c0_37 = arith.constant 0 : index
    %16 = vector.load %arg7[%c1_35, %c2_36, %c0_37] : memref<18x18x8xf32, #tpu.memory_space<vmem>>, vector<16x16x8xf32>
    %c2_38 = arith.constant 2 : index
    %c0_39 = arith.constant 0 : index
    %c0_40 = arith.constant 0 : index
    %17 = vector.load %arg7[%c2_38, %c0_39, %c0_40] : memref<18x18x8xf32, #tpu.memory_space<vmem>>, vector<16x16x8xf32>
    %c2_41 = arith.constant 2 : index
    %c1_42 = arith.constant 1 : index
    %c0_43 = arith.constant 0 : index
    %18 = vector.load %arg7[%c2_41, %c1_42, %c0_43] : memref<18x18x8xf32, #tpu.memory_space<vmem>>, vector<16x16x8xf32>
    %c2_44 = arith.constant 2 : index
    %c2_45 = arith.constant 2 : index
    %c0_46 = arith.constant 0 : index
    %19 = vector.load %arg7[%c2_44, %c2_45, %c0_46] : memref<18x18x8xf32, #tpu.memory_space<vmem>>, vector<16x16x8xf32>
    %20 = tpu.concatenate %11, %12, %13, %14, %15, %16, %17, %18, %19 in 2 : vector<16x16x8xf32>, vector<16x16x8xf32>, vector<16x16x8xf32>, vector<16x16x8xf32>, vector<16x16x8xf32>, vector<16x16x8xf32>, vector<16x16x8xf32>, vector<16x16x8xf32>, vector<16x16x8xf32> -> vector<16x16x72xf32>
    %21 = vector.shape_cast %20 : vector<16x16x72xf32> to vector<256x72xf32>
    %c0_47 = arith.constant 0 : index
    %c0_48 = arith.constant 0 : index
    %22 = vector.load %arg2[%c0_47, %c0_48] : memref<72x8xf32, #tpu.memory_space<vmem>>, vector<72x8xf32>
    %cst = arith.constant dense<0.000000e+00> : vector<256x8xf32>
    %23 = tpu.matmul %21, %22, %cst {dimension_numbers = #tpu.dot_dimension_numbers<[1], [0], [0], [1], [0, 0, 1, 1], [], []>} : vector<256x72xf32>, vector<72x8xf32>, vector<256x8xf32> -> vector<256x8xf32>
    %c0_49 = arith.constant 0 : index
    %c0_50 = arith.constant 0 : index
    %24 = vector.load %arg3[%c0_49, %c0_50] : memref<1x8xf32, #tpu.memory_space<vmem>>, vector<1x8xf32>
    %25 = vector.broadcast %24 : vector<1x8xf32> to vector<256x8xf32>
    %26 = arith.addf %23, %25 : vector<256x8xf32>
    %cst_51 = arith.constant 0.000000e+00 : f32
    %27 = vector.broadcast %cst_51 : f32 to vector<256x8xf32>
    %28 = arith.maximumf %26, %27 : vector<256x8xf32>
    %29 = vector.shape_cast %28 : vector<256x8xf32> to vector<16x16x8xf32>
    %c1_52 = arith.constant 1 : index
    %c1_53 = arith.constant 1 : index
    %c0_54 = arith.constant 0 : index
    %30 = vector.load %arg7[%c1_52, %c1_53, %c0_54] : memref<18x18x8xf32, #tpu.memory_space<vmem>>, vector<16x16x8xf32>
    tpu.vector_store %arg7[%c1_52, %c1_53, %c0_54], %29 {strides = array<i32>} : memref<18x18x8xf32, #tpu.memory_space<vmem>>, vector<16x16x8xf32>,
    %31 = vector.extract_strided_slice %29 {offsets = [1, 0, 0], sizes = [1, 16, 8], strides = [1, 1, 1]} : vector<16x16x8xf32> to vector<1x16x8xf32>
    %c0_55 = arith.constant 0 : index
    %c1_56 = arith.constant 1 : index
    %c0_57 = arith.constant 0 : index
    %32 = vector.load %arg7[%c0_55, %c1_56, %c0_57] : memref<18x18x8xf32, #tpu.memory_space<vmem>>, vector<1x16x8xf32>
    tpu.vector_store %arg7[%c0_55, %c1_56, %c0_57], %31 {strides = array<i32>} : memref<18x18x8xf32, #tpu.memory_space<vmem>>, vector<1x16x8xf32>,
    %33 = vector.extract_strided_slice %29 {offsets = [14, 0, 0], sizes = [1, 16, 8], strides = [1, 1, 1]} : vector<16x16x8xf32> to vector<1x16x8xf32>
    %c17_58 = arith.constant 17 : index
    %c1_59 = arith.constant 1 : index
    %c0_60 = arith.constant 0 : index
    %34 = vector.load %arg7[%c17_58, %c1_59, %c0_60] : memref<18x18x8xf32, #tpu.memory_space<vmem>>, vector<1x16x8xf32>
    tpu.vector_store %arg7[%c17_58, %c1_59, %c0_60], %33 {strides = array<i32>} : memref<18x18x8xf32, #tpu.memory_space<vmem>>, vector<1x16x8xf32>,
    %c0_61 = arith.constant 0 : index
    %c2_62 = arith.constant 2 : index
    %c0_63 = arith.constant 0 : index
    %35 = vector.load %arg7[%c0_61, %c2_62, %c0_63] : memref<18x18x8xf32, #tpu.memory_space<vmem>>, vector<18x1x8xf32>
    %c0_64 = arith.constant 0 : index
    %c0_65 = arith.constant 0 : index
    %c0_66 = arith.constant 0 : index
    %36 = vector.load %arg7[%c0_64, %c0_65, %c0_66] : memref<18x18x8xf32, #tpu.memory_space<vmem>>, vector<18x1x8xf32>
    tpu.vector_store %arg7[%c0_64, %c0_65, %c0_66], %35 {strides = array<i32>} : memref<18x18x8xf32, #tpu.memory_space<vmem>>, vector<18x1x8xf32>,
    %c0_67 = arith.constant 0 : index
    %c15_68 = arith.constant 15 : index
    %c0_69 = arith.constant 0 : index
    %37 = vector.load %arg7[%c0_67, %c15_68, %c0_69] : memref<18x18x8xf32, #tpu.memory_space<vmem>>, vector<18x1x8xf32>
    %c0_70 = arith.constant 0 : index
    %c17_71 = arith.constant 17 : index
    %c0_72 = arith.constant 0 : index
    %38 = vector.load %arg7[%c0_70, %c17_71, %c0_72] : memref<18x18x8xf32, #tpu.memory_space<vmem>>, vector<18x1x8xf32>
    tpu.vector_store %arg7[%c0_70, %c17_71, %c0_72], %37 {strides = array<i32>} : memref<18x18x8xf32, #tpu.memory_space<vmem>>, vector<18x1x8xf32>,
    %c0_73 = arith.constant 0 : index
    %c0_74 = arith.constant 0 : index
    %c0_75 = arith.constant 0 : index
    %39 = vector.load %arg7[%c0_73, %c0_74, %c0_75] : memref<18x18x8xf32, #tpu.memory_space<vmem>>, vector<16x16x8xf32>
    %c0_76 = arith.constant 0 : index
    %c1_77 = arith.constant 1 : index
    %c0_78 = arith.constant 0 : index
    %40 = vector.load %arg7[%c0_76, %c1_77, %c0_78] : memref<18x18x8xf32, #tpu.memory_space<vmem>>, vector<16x16x8xf32>
    %c0_79 = arith.constant 0 : index
    %c2_80 = arith.constant 2 : index
    %c0_81 = arith.constant 0 : index
    %41 = vector.load %arg7[%c0_79, %c2_80, %c0_81] : memref<18x18x8xf32, #tpu.memory_space<vmem>>, vector<16x16x8xf32>
    %c1_82 = arith.constant 1 : index
    %c0_83 = arith.constant 0 : index
    %c0_84 = arith.constant 0 : index
    %42 = vector.load %arg7[%c1_82, %c0_83, %c0_84] : memref<18x18x8xf32, #tpu.memory_space<vmem>>, vector<16x16x8xf32>
    %c1_85 = arith.constant 1 : index
    %c1_86 = arith.constant 1 : index
    %c0_87 = arith.constant 0 : index
    %43 = vector.load %arg7[%c1_85, %c1_86, %c0_87] : memref<18x18x8xf32, #tpu.memory_space<vmem>>, vector<16x16x8xf32>
    %c1_88 = arith.constant 1 : index
    %c2_89 = arith.constant 2 : index
    %c0_90 = arith.constant 0 : index
    %44 = vector.load %arg7[%c1_88, %c2_89, %c0_90] : memref<18x18x8xf32, #tpu.memory_space<vmem>>, vector<16x16x8xf32>
    %c2_91 = arith.constant 2 : index
    %c0_92 = arith.constant 0 : index
    %c0_93 = arith.constant 0 : index
    %45 = vector.load %arg7[%c2_91, %c0_92, %c0_93] : memref<18x18x8xf32, #tpu.memory_space<vmem>>, vector<16x16x8xf32>
    %c2_94 = arith.constant 2 : index
    %c1_95 = arith.constant 1 : index
    %c0_96 = arith.constant 0 : index
    %46 = vector.load %arg7[%c2_94, %c1_95, %c0_96] : memref<18x18x8xf32, #tpu.memory_space<vmem>>, vector<16x16x8xf32>
    %c2_97 = arith.constant 2 : index
    %c2_98 = arith.constant 2 : index
    %c0_99 = arith.constant 0 : index
    %47 = vector.load %arg7[%c2_97, %c2_98, %c0_99] : memref<18x18x8xf32, #tpu.memory_space<vmem>>, vector<16x16x8xf32>
    %48 = tpu.concatenate %39, %40, %41, %42, %43, %44, %45, %46, %47 in 2 : vector<16x16x8xf32>, vector<16x16x8xf32>, vector<16x16x8xf32>, vector<16x16x8xf32>, vector<16x16x8xf32>, vector<16x16x8xf32>, vector<16x16x8xf32>, vector<16x16x8xf32>, vector<16x16x8xf32> -> vector<16x16x72xf32>
    %49 = vector.shape_cast %48 : vector<16x16x72xf32> to vector<256x72xf32>
    %c0_100 = arith.constant 0 : index
    %c0_101 = arith.constant 0 : index
    %50 = vector.load %arg4[%c0_100, %c0_101] : memref<72x8xf32, #tpu.memory_space<vmem>>, vector<72x8xf32>
    %cst_102 = arith.constant dense<0.000000e+00> : vector<256x8xf32>
    %51 = tpu.matmul %49, %50, %cst_102 {dimension_numbers = #tpu.dot_dimension_numbers<[1], [0], [0], [1], [0, 0, 1, 1], [], []>} : vector<256x72xf32>, vector<72x8xf32>, vector<256x8xf32> -> vector<256x8xf32>
    %c0_103 = arith.constant 0 : index
    %c0_104 = arith.constant 0 : index
    %52 = vector.load %arg5[%c0_103, %c0_104] : memref<1x8xf32, #tpu.memory_space<vmem>>, vector<1x8xf32>
    %53 = vector.broadcast %52 : vector<1x8xf32> to vector<256x8xf32>
    %54 = arith.addf %51, %53 : vector<256x8xf32>
    %55 = vector.shape_cast %54 : vector<256x8xf32> to vector<16x16x8xf32>
    %56 = arith.addf %1, %55 : vector<16x16x8xf32>
    %c0_105 = arith.constant 0 : index
    %c0_106 = arith.constant 0 : index
    %c0_107 = arith.constant 0 : index
    %c0_108 = arith.constant 0 : index
    %57 = vector.load %arg6[%c0_105, %c0_106, %c0_107, %c0_108] : memref<1x16x16x8xf32, #tpu.memory_space<vmem>>, vector<1x16x16x8xf32>
    %58 = vector.shape_cast %57 : vector<1x16x16x8xf32> to vector<16x16x8xf32>
    %59 = vector.shape_cast %56 : vector<16x16x8xf32> to vector<1x16x16x8xf32>
    tpu.vector_store %arg6[%c0_105, %c0_106, %c0_107, %c0_108], %59 {strides = array<i32>} : memref<1x16x16x8xf32, #tpu.memory_space<vmem>>, vector<1x16x16x8xf32>,
    return
  }
  func.func @transform_0(%arg0: i32) -> (i32, i32, i32, i32) {
    %c0_i32 = arith.constant 0 : i32
    %c0_i32_0 = arith.constant 0 : i32
    %c0_i32_1 = arith.constant 0 : i32
    %c0_i32_2 = arith.constant 0 : i32
    return %arg0, %c0_i32, %c0_i32_0, %c0_i32_1 : i32, i32, i32, i32
  }
  func.func @transform_1(%arg0: i32) -> (i32, i32) {
    %c0_i32 = arith.constant 0 : i32
    %c0_i32_0 = arith.constant 0 : i32
    %c0_i32_1 = arith.constant 0 : i32
    return %c0_i32, %c0_i32_0 : i32, i32
  }
  func.func @transform_2(%arg0: i32) -> (i32, i32) {
    %c0_i32 = arith.constant 0 : i32
    %c0_i32_0 = arith.constant 0 : i32
    %c0_i32_1 = arith.constant 0 : i32
    return %c0_i32, %c0_i32_0 : i32, i32
  }
  func.func @transform_3(%arg0: i32) -> (i32, i32) {
    %c0_i32 = arith.constant 0 : i32
    %c0_i32_0 = arith.constant 0 : i32
    %c0_i32_1 = arith.constant 0 : i32
    return %c0_i32, %c0_i32_0 : i32, i32
  }
  func.func @transform_4(%arg0: i32) -> (i32, i32) {
    %c0_i32 = arith.constant 0 : i32
    %c0_i32_0 = arith.constant 0 : i32
    %c0_i32_1 = arith.constant 0 : i32
    return %c0_i32, %c0_i32_0 : i32, i32
  }
  func.func @transform_5(%arg0: i32) -> (i32, i32, i32, i32) {
    %c0_i32 = arith.constant 0 : i32
    %c0_i32_0 = arith.constant 0 : i32
    %c0_i32_1 = arith.constant 0 : i32
    %c0_i32_2 = arith.constant 0 : i32
    return %arg0, %c0_i32, %c0_i32_0, %c0_i32_1 : i32, i32, i32, i32
  }
}

</mosaic_0001>

<bundles_post_ra>
// kernel: resnet_block_forward.1
= control target key start
LH: loop header
LB: loop body
LE: loop exit
PB: predicated region body
PF: predicated region fallthrough
CT: control target
= control target key end

     0   :  { %s4418_s18 = smov 0   ;;  %s7850_s0 = inlined_call_operand.vmem [shape: f32[2,16,16,8], index: 0, kind: input, shape index: {}]   ;;  %s7851_s1 = inlined_call_operand.vmem [shape: f32[72,8], index: 1, kind: input, shape index: {}]   ;;  %s7852_s2 = inlined_call_operand.vmem [shape: f32[1,8], index: 2, kind: input, shape index: {}]   ;;  %s7853_s3 = inlined_call_operand.vmem [shape: f32[72,8], index: 3, kind: input, shape index: {}]   ;;  %s7854_s4 = inlined_call_operand.vmem [shape: f32[1,8], index: 4, kind: input, shape index: {}]   ;;  %s7855_s5 = inlined_call_operand.vmem [shape: f32[2,16,16,8], index: 5, kind: output, shape index: {}]  }
   0x1 LB: > { %s4217_s19 = sadd.s32 4294967295, %s4378_s18   ;;  %p4221_p0 = scmp.ge.s32.totalorder %s4378_s18, 1  ;;  %s4378_s18 = sphi %s4418_s18, %s15_s18  }
   0x2   : > { %p187_p1 = scmp.lt.s32.totalorder %s4378_s18, 3 }
   0x4   : > { %p188_p2 = pnand %p4221_p0, %p187_p1 }
   0x6   : > { %191 = sbr.rel (%p188_p2) target bundleno = 1873 (0x751), region = 40 }
   0xb   : > { %p215_p3 = scmp.lt.s32.totalorder %s4217_s19, 1  ;;  %vm258_vm0 = vcmask 64512   ;;  %s4380_s24 = smov 8   ;;  %vm314_vm1 = vcmask 57344   ;;  %vm1714_vm2 = vcmask 130048   ;;  %vm1747_vm3 = vcmask 195584  }
   0xc   : > { %s4381_s25 = smov 16   ;;  %s4382_s26 = smov 24   ;;  %vm1813_vm4 = vcmask 326656   ;;  %vm1780_vm5 = vcmask 261120   ;;  %vm1846_vm6 = vcmask 392192   ;;  %vm1912_vm7 = vcmask 523264  }
   0xd   : > { %s8578_s19 = smov (!%p215_p3, %s4217_s19), 1  ;;  %s4383_s27 = smov 32   ;;  %vm1879_vm8 = vcmask 457728   ;;  %vm1958_vm9 = vcmask 588800  }
   0xe   : > { %s4292_s20 = sshll.u32 %s8578_s19, 8  ;;  %s4384_s28 = smov 40  }
   0xf   : > { %s4434_s23 = scalar_lea.vmem %s7850_s0, %s4292_s20  ;;  %s4385_s29 = smov 48  }
  0x10   : > { %v4437_v0 = vld [vmem:[%s4434_s23 + $0x10] sm:$0xff]  ;;  %v4440_v1 = vld [vmem:[%s4434_s23] sm:$0xff]  ;;  %v4445_v2 = vld [vmem:[%s4434_s23 + $0x18] sm:$0xff]  ;;  %s4386_s30 = smov 56   ;;  %s4387_s6 = smov 64  }
  0x11   : > { %7935 = vst [vmem:[#allocation3_spill] sm:$0xff] %v4437_v0  ;;  %v4452_v3 = vld [vmem:[%s4434_s23 + $0x8] sm:$0xff]  ;;  %v4457_v4 = vld [vmem:[%s4434_s23 + $0x20] sm:$0xff]  ;;  %v4462_v5 = vld [vmem:[%s4434_s23 + $0x30] sm:$0xff] }
  0x12   : > { %7936 = vst [vmem:[#allocation4_spill] sm:$0xff] %v4440_v1  ;;  %v4467_v6 = vld [vmem:[%s4434_s23 + $0x28] sm:$0xff]  ;;  %v4472_v7 = vld [vmem:[%s4434_s23 + $0x38] sm:$0xff]  ;;  %v4485_v11 = vld [vmem:[%s4434_s23 + $0x40] sm:$0xff] }
  0x13   : > { %291 = vst.msk [vmem:[#allocation2 + $0x1] sm:$0xff] %vm258_vm0, %v4437_v0  ;;  %v4477_v9 = vld [vmem:[%s4434_s23 + $0x48] sm:$0xff]  ;;  %v4494_v13 = vld [vmem:[%s4434_s23 + $0x50] sm:$0xff]  ;;  %v4501_v14 = vld [vmem:[%s4434_s23 + $0x60] sm:$0xff] }
  0x14   : > { %7937 = vst [vmem:[#allocation5_spill] sm:$0xff] %v4445_v2  ;;  %v4506_v15 = vld [vmem:[%s4434_s23 + $0x58] sm:$0xff]  ;;  %v4511_v16 = vld [vmem:[%s4434_s23 + $0x68] sm:$0xff]  ;;  %v4523_v20 = vld [vmem:[%s4434_s23 + $0x70] sm:$0xff] }
  0x15   : > { %261 = vst.msk [vmem:[#allocation2 + $0x31] sm:$0xff] %vm258_vm0, %v4437_v0  ;;  %v4516_v18 = vld [vmem:[%s4434_s23 + $0x78] sm:$0xff]  ;;  %v4537_v22 = vld [vmem:[%s4434_s23 + $0x80] sm:$0xff]  ;;  %v4540_v23 = vld [vmem:[%s4434_s23 + $0x90] sm:$0xff] }
  0x16   : > { %259 = vst.msk [vmem:[#allocation2 + $0x19] sm:$0xff] %vm258_vm0, %v4440_v1  ;;  %v4547_v24 = vld [vmem:[%s4434_s23 + $0x88] sm:$0xff]  ;;  %v4564_v28 = vld [vmem:[%s4434_s23 + $0x98] sm:$0xff]  ;;  %v4574_v30 = vld [vmem:[%s4434_s23 + $0xa0] sm:$0xff] }
  0x17   : > { %7938 = vst [vmem:[#allocation6_spill] sm:$0xff] %v4452_v3  ;;  %v4567_v29 = vld [vmem:[%s4434_s23 + $0xa8] sm:$0xff]  ;;  %v4591_v34 = vld [vmem:[%s4434_s23 + $0xb0] sm:$0xff]  ;;  %v4594_v35 = vld [vmem:[%s4434_s23 + $0xc0] sm:$0xff] }
  0x18   : > { %292 = vst.msk [vmem:[#allocation2 + $0x9] sm:$0xff] %vm258_vm0, %v4445_v2  ;;  %v4601_v36 = vld [vmem:[%s4434_s23 + $0xb8] sm:$0xff]  ;;  %v4618_v40 = vld [vmem:[%s4434_s23 + $0xc8] sm:$0xff]  ;;  %v4628_v42 = vld [vmem:[%s4434_s23 + $0xd0] sm:$0xff] }
  0x19   : > { %7939 = vst [vmem:[#allocation7_spill] sm:$0xff] %v4457_v4  ;;  %v4621_v41 = vld [vmem:[%s4434_s23 + $0xd8] sm:$0xff]  ;;  %v4645_v46 = vld [vmem:[%s4434_s23 + $0xe0] sm:$0xff]  ;;  %v4648_v47 = vld [vmem:[%s4434_s23 + $0xe8] sm:$0xff] }
  0x1a   : > { %262 = vst.msk [vmem:[#allocation2 + $0x39] sm:$0xff] %vm258_vm0, %v4445_v2  ;;  %v401_v8 = vld [vmem:[#allocation2 + $0x1] sm:$0xff] }
  0x1b   : > { %7940 = vst [vmem:[#allocation8_spill] sm:$0xff] %v4462_v5  ;;  %690 = vrot.lane.b32.xlu0 %v401_v8, %s4380_s24 }
  0x1c   : > { %260 = vst.msk [vmem:[#allocation2 + $0x21] sm:$0xff] %vm258_vm0, %v4452_v3  ;;  %v4480_v10 = vld [vmem:[#allocation2 + $0x31] sm:$0xff] }
  0x1d   : > { %7941 = vst [vmem:[#allocation9_spill] sm:$0xff] %v4467_v6  ;;  %698 = vrot.lane.b32.xlu2 %v4480_v10, %s4380_s24  ;;  %v4489_v12 = vld [vmem:[#allocation2 + $0x19] sm:$0xff]  ;;  %v298_v57 = vld [vmem:[#allocation2 + $0x32] sm:$0x1] }
  0x1e   : > { %263 = vst.msk [vmem:[#allocation2 + $0x49] sm:$0xff] %vm258_vm0, %v4457_v4  ;;  %694 = vrot.lane.b32.xlu1 %v4489_v12, %s4380_s24 }
  0x1f   : > { %7942 = vst [vmem:[#allocation10_spill] sm:$0xff] %v4472_v7  ;;  %v402_v17 = vld [vmem:[#allocation2 + $0x9] sm:$0xff] }
  0x20   : > { %265 = vst.msk [vmem:[#allocation2 + $0x61] sm:$0xff] %vm258_vm0, %v4462_v5  ;;  %v333_v51 = vld [vmem:[#allocation2 + $0xf] sm:$0x1] }
  0x21   : > { %7943 = vst [vmem:[#allocation11_spill] sm:$0xff] %v4477_v9  ;;  %v4518_v19 = vld [vmem:[#allocation2 + $0x39] sm:$0xff] }
  0x22   : > { %264 = vst.msk [vmem:[#allocation2 + $0x51] sm:$0xff] %vm258_vm0, %v4467_v6  ;;  %v335_v56 = vld [vmem:[#allocation2 + $0x3f] sm:$0x1] }
  0x23   : > { %7944 = vst [vmem:[#allocation12_spill] sm:$0xff] %v4485_v11  ;;  %v4525_v21 = vld [vmem:[#allocation2 + $0x21] sm:$0xff]  ;;  %692 = vrot.lane.b32.xlu0 %v402_v17, %s4380_s24 }
  0x24   : > { %266 = vst.msk [vmem:[#allocation2 + $0x69] sm:$0xff] %vm258_vm0, %v4472_v7  ;;  %v334_v52 = vld [vmem:[#allocation2 + $0x27] sm:$0x1] }
  0x25   : > { %7945 = vst [vmem:[#allocation13_spill] sm:$0xff] %v4494_v13  ;;  %700 = vrot.lane.b32.xlu2 %v4518_v19, %s4380_s24  ;;  %v4553_v25 = vld [vmem:[#allocation2 + $0x49] sm:$0xff] }
  0x26   : > { %268 = vst.msk [vmem:[#allocation2 + $0x81] sm:$0xff] %vm258_vm0, %v4477_v9  ;;  %696 = vrot.lane.b32.xlu1 %v4525_v21, %s4380_s24 }
  0x27   : > { %7946 = vst [vmem:[#allocation14_spill] sm:$0xff] %v4501_v14  ;;  %v4555_v26 = vld [vmem:[#allocation2 + $0x61] sm:$0xff] }
  0x28   : > { %267 = vst.msk [vmem:[#allocation2 + $0x79] sm:$0xff] %vm258_vm0, %v4485_v11 }
  0x29   : > { %7947 = vst [vmem:[#allocation15_spill] sm:$0xff] %v4506_v15  ;;  %v4557_v27 = vld [vmem:[#allocation2 + $0x51] sm:$0xff] }
  0x2a   : > { %269 = vst.msk [vmem:[#allocation2 + $0x91] sm:$0xff] %vm258_vm0, %v4494_v13  ;;  %v336_v61 = vld [vmem:[#allocation2 + $0x57] sm:$0x1] }
  0x2b   : > { %7948 = vst [vmem:[#allocation16_spill] sm:$0xff] %v4511_v16  ;;  %702 = vrot.lane.b32.xlu0 %v4553_v25, %s4380_s24  ;;  %v4580_v31 = vld [vmem:[#allocation2 + $0x69] sm:$0xff] }
  0x2c   : > { %271 = vst.msk [vmem:[#allocation2 + $0xa9] sm:$0xff] %vm258_vm0, %v4501_v14  ;;  %v337_v62 = vld [vmem:[#allocation2 + $0x6f] sm:$0x1] }
  0x2d   : > { %7949 = vst [vmem:[#allocation17_spill] sm:$0xff] %v4516_v18  ;;  %706 = vrot.lane.b32.xlu2 %v4555_v26, %s4380_s24  ;;  %v4582_v32 = vld [vmem:[#allocation2 + $0x81] sm:$0xff] }
  0x2e   : > { %270 = vst.msk [vmem:[#allocation2 + $0x99] sm:$0xff] %vm258_vm0, %v4506_v15  ;;  %704 = vrot.lane.b32.xlu1 %v4557_v27, %s4380_s24 }
  0x2f   : > { %7950 = vst [vmem:[#allocation18_spill] sm:$0xff] %v4523_v20  ;;  %v4584_v33 = vld [vmem:[#allocation2 + $0x79] sm:$0xff] }
  0x30   : > { %272 = vst.msk [vmem:[#allocation2 + $0xb1] sm:$0xff] %vm258_vm0, %v4511_v16  ;;  %v4731_v16 = vld [vmem:[#allocation2 + $0x1a] sm:$0xff] }
  0x31   : > { %274 = vst.msk [vmem:[#allocation2 + $0xc9] sm:$0xff] %vm258_vm0, %v4516_v18  ;;  %v4607_v37 = vld [vmem:[#allocation2 + $0x91] sm:$0xff] }
  0x32   : > { %273 = vst.msk [vmem:[#allocation2 + $0xc1] sm:$0xff] %vm258_vm0, %v4523_v20  ;;  %v302_v9 = vld [vmem:[#allocation2 + $0x92] sm:$0x1] }
  0x33   : > { %7951 = vst [vmem:[#allocation19_spill] sm:$0xff] %v4537_v22  ;;  %708 = vrot.lane.b32.xlu0 %v4580_v31, %s4380_s24  ;;  %v4609_v38 = vld [vmem:[#allocation2 + $0xa9] sm:$0xff] }
  0x34   : > { %7952 = vst [vmem:[#allocation20_spill] sm:$0xff] %v4540_v23 }
  0x35   : > { %275 = vst.msk [vmem:[#allocation2 + $0xd9] sm:$0xff] %vm258_vm0, %v4537_v22  ;;  %712 = vrot.lane.b32.xlu2 %v4582_v32, %s4380_s24  ;;  %v4611_v39 = vld [vmem:[#allocation2 + $0x99] sm:$0xff] }
  0x36   : > { %7953 = vst [vmem:[#allocation21_spill] sm:$0xff] %v4547_v24  ;;  %710 = vrot.lane.b32.xlu1 %v4584_v33, %s4380_s24  ;;  %v339_v18 = vld [vmem:[#allocation2 + $0x9f] sm:$0x1]  ;;  %v4778_v11 = vld [vmem:[#allocation2 + $0x92] sm:$0xff] }
  0x37   : > { %277 = vst.msk [vmem:[#allocation2 + $0xf1] sm:$0xff] %vm258_vm0, %v4540_v23  ;;  %v4634_v43 = vld [vmem:[#allocation2 + $0xb1] sm:$0xff] }
  0x38   : > { %276 = vst.msk [vmem:[#allocation2 + $0xe1] sm:$0xff] %vm258_vm0, %v4547_v24  ;;  %v4636_v44 = vld [vmem:[#allocation2 + $0xc9] sm:$0xff]  ;;  %v340_v20 = vld [vmem:[#allocation2 + $0xb7] sm:$0x1] }
  0x39   : > { %7954 = vst [vmem:[#allocation22_spill] sm:$0xff] %v4564_v28  ;;  %v4638_v45 = vld [vmem:[#allocation2 + $0xc1] sm:$0xff] }
  0x3a   : > { %7955 = vst [vmem:[#allocation23_spill] sm:$0xff] %v4567_v29 }
  0x3b   : > { %278 = vst.msk [vmem:[#allocation2 + $0xf9] sm:$0xff] %vm258_vm0, %v4564_v28  ;;  %714 = vrot.lane.b32.xlu0 %v4607_v37, %s4380_s24  ;;  %v4817_v28 = vld [vmem:[#allocation2 + $0xc2] sm:$0xff] }
  0x3c   : > { %7956 = vst [vmem:[#allocation24_spill] sm:$0xff] %v4574_v30  ;;  %v4658_v48 = vld [vmem:[#allocation2 + $0xd9] sm:$0xff] }
  0x3d   : > { %280 = vst.msk [vmem:[#allocation2 + $0x111] sm:$0xff] %vm258_vm0, %v4567_v29  ;;  %718 = vrot.lane.b32.xlu2 %v4609_v38, %s4380_s24  ;;  %v305_v2 = vld [vmem:[#allocation2 + $0xda] sm:$0x1] }
  0x3e   : > { %279 = vst.msk [vmem:[#allocation2 + $0x109] sm:$0xff] %vm258_vm0, %v4574_v30  ;;  %716 = vrot.lane.b32.xlu1 %v4611_v39, %s4380_s24  ;;  %v4662_v49 = vld [vmem:[#allocation2 + $0xf1] sm:$0xff]  ;;  %v304_v30 = vld [vmem:[#allocation2 + $0xc2] sm:$0x1] }
  0x3f   : > { %7957 = vst [vmem:[#allocation25_spill] sm:$0xff] %v4591_v34  ;;  %v4664_v50 = vld [vmem:[#allocation2 + $0xe1] sm:$0xff] }
  0x40   : > { %7958 = vst [vmem:[#allocation26_spill] sm:$0xff] %v4594_v35  ;;  %v4820_v0 = vld [vmem:[#allocation2 + $0xda] sm:$0xff] }
  0x41   : > { %281 = vst.msk [vmem:[#allocation2 + $0x121] sm:$0xff] %vm258_vm0, %v4591_v34  ;;  %v4801_v34 = vld [vmem:[#allocation2 + $0xaa] sm:$0xff] }
  0x42   : > { %7959 = vst [vmem:[#allocation27_spill] sm:$0xff] %v4601_v36  ;;  %v4674_v53 = vld [vmem:[#allocation2 + $0xf9] sm:$0xff] }
  0x43   : > { %283 = vst.msk [vmem:[#allocation2 + $0x139] sm:$0xff] %vm258_vm0, %v4594_v35  ;;  %720 = vrot.lane.b32.xlu0 %v4634_v43, %s4380_s24  ;;  %v4842_v1 = vld [vmem:[#allocation2 + $0xf2] sm:$0xff] }
  0x44   : > { %282 = vst.msk [vmem:[#allocation2 + $0x129] sm:$0xff] %vm258_vm0, %v4601_v36  ;;  %v4676_v54 = vld [vmem:[#allocation2 + $0x111] sm:$0xff] }
  0x45   : > { %7960 = vst [vmem:[#allocation28_spill] sm:$0xff] %v4618_v40  ;;  %724 = vrot.lane.b32.xlu2 %v4636_v44, %s4380_s24  ;;  %v4678_v55 = vld [vmem:[#allocation2 + $0x109] sm:$0xff]  ;;  %v344_v13 = vld [vmem:[#allocation2 + $0x117] sm:$0x1] }
  0x46   : > { %7961 = vst [vmem:[#allocation29_spill] sm:$0xff] %v4621_v41  ;;  %722 = vrot.lane.b32.xlu1 %v4638_v45, %s4380_s24 }
  0x47   : > { %284 = vst.msk [vmem:[#allocation2 + $0x141] sm:$0xff] %vm258_vm0, %v4618_v40  ;;  %v4775_v40 = vld [vmem:[#allocation2 + $0x7a] sm:$0xff] }
  0x48   : > { %7962 = vst [vmem:[#allocation30_spill] sm:$0xff] %v4628_v42  ;;  %v4688_v58 = vld [vmem:[#allocation2 + $0x121] sm:$0xff] }
  0x49   : > { %286 = vst.msk [vmem:[#allocation2 + $0x159] sm:$0xff] %vm258_vm0, %v4621_v41  ;;  %v4763_v41 = vld [vmem:[#allocation2 + $0x62] sm:$0xff] }
  0x4a   : > { %285 = vst.msk [vmem:[#allocation2 + $0x151] sm:$0xff] %vm258_vm0, %v4628_v42  ;;  %v4690_v59 = vld [vmem:[#allocation2 + $0x139] sm:$0xff] }
  0x4b   : > { %7963 = vst [vmem:[#allocation31_spill] sm:$0xff] %v4645_v46  ;;  %726 = vrot.lane.b32.xlu0 %v4658_v48, %s4380_s24  ;;  %v4692_v60 = vld [vmem:[#allocation2 + $0x129] sm:$0xff]  ;;  %v301_v42 = vld [vmem:[#allocation2 + $0x7a] sm:$0x1] }
  0x4c   : > { %7964 = vst [vmem:[#allocation32_spill] sm:$0xff] %v4648_v47  ;;  %v309_v29 = vld [vmem:[#allocation2 + $0x13a] sm:$0x1] }
  0x4d   : > { %287 = vst.msk [vmem:[#allocation2 + $0x169] sm:$0xff] %vm258_vm0, %v4645_v46  ;;  %730 = vrot.lane.b32.xlu2 %v4662_v49, %s4380_s24 }
  0x4e   : > { %294 = vst.msk [vmem:[#allocation2 + $0x199] sm:$0xff] %vm258_vm0, %v4645_v46  ;;  %728 = vrot.lane.b32.xlu1 %v4664_v50, %s4380_s24  ;;  %v4702_v63 = vld [vmem:[#allocation2 + $0x141] sm:$0xff]  ;;  %v343_v46 = vld [vmem:[#allocation2 + $0xff] sm:$0x1] }
  0x4f   : > { %288 = vst.msk [vmem:[#allocation2 + $0x171] sm:$0xff] %vm258_vm0, %v4648_v47 }
  0x50   : > { %295 = vst.msk [vmem:[#allocation2 + $0x1a1] sm:$0xff] %vm258_vm0, %v4648_v47  ;;  %v4704_v8 = vld [vmem:[#allocation2 + $0x159] sm:$0xff] }
  0x51   : > { %351 = vst.msk [vmem:[#allocation2 + $0x11] sm:$0x1] %vm314_vm1, %v333_v51  ;;  %v4706_v17 = vld [vmem:[#allocation2 + $0x151] sm:$0xff]  ;;  %v338_v51 = vld [vmem:[#allocation2 + $0x87] sm:$0x1] }
  0x52   : > { %352 = vst.msk [vmem:[#allocation2 + $0x29] sm:$0x1] %vm314_vm1, %v334_v52  ;;  %v300_v52 = vld [vmem:[#allocation2 + $0x62] sm:$0x1]  ;;  %v4742_v47 = vld [vmem:[#allocation2 + $0x32] sm:$0xff] }
  0x53   : > { %732 = vrot.lane.b32.xlu0 %v4674_v53, %s4380_s24  ;;  %353 = vst.msk [vmem:[#allocation2 + $0x41] sm:$0x1] %vm314_vm1, %v335_v56  ;;  %v296_v56 = vld [vmem:[#allocation2 + $0x2] sm:$0x1]  ;;  %v347_v6 = vld [vmem:[#allocation2 + $0x15f] sm:$0x1] }
  0x54   : > { %317 = vst.msk [vmem:[#allocation2 + $0x30] sm:$0x1] %vm314_vm1, %v298_v57  ;;  %v4716_v57 = vld [vmem:[#allocation2 + $0x169] sm:$0xff] }
  0x55   : > { %736 = vrot.lane.b32.xlu2 %v4676_v54, %s4380_s24  ;;  %354 = vst.msk [vmem:[#allocation2 + $0x59] sm:$0x1] %vm314_vm1, %v336_v61  ;;  %v433_v61 = vld [vmem:[#allocation2 + $0x2] sm:$0xff] }
  0x56   : > { %734 = vrot.lane.b32.xlu1 %v4678_v55, %s4380_s24  ;;  %355 = vst.msk [vmem:[#allocation2 + $0x71] sm:$0x1] %vm314_vm1, %v337_v62  ;;  %v4719_v62 = vld [vmem:[#allocation2 + $0x171] sm:$0xff] }
  0x57   : > { %356 = vst.msk [vmem:[#allocation2 + $0x89] sm:$0x1] %vm314_vm1, %v338_v51  ;;  %v297_v51 = vld [vmem:[#allocation2 + $0x1a] sm:$0x1] }
  0x58   : > { %319 = vst.msk [vmem:[#allocation2 + $0x60] sm:$0x1] %vm314_vm1, %v300_v52  ;;  %v434_v52 = vld [vmem:[#allocation2 + $0xa] sm:$0xff] }
  0x59   : > { %315 = vst.msk [vmem:[#allocation2] sm:$0x1] %vm314_vm1, %v296_v56  ;;  %v4729_v56 = vld [vmem:[#allocation2 + $0x22] sm:$0xff] }
  0x5a   : > { %357 = vst.msk [vmem:[#allocation2 + $0xa1] sm:$0x1] %vm314_vm1, %v339_v18  ;;  %v4747_v14 = vld [vmem:[#allocation2 + $0x3a] sm:$0xff] }
  0x5b   : > { %738 = vrot.lane.b32.xlu0 %v4688_v58, %s4380_s24  ;;  %358 = vst.msk [vmem:[#allocation2 + $0xb9] sm:$0x1] %vm314_vm1, %v340_v20  ;;  %v303_v20 = vld [vmem:[#allocation2 + $0xaa] sm:$0x1] }
  0x5c   : > { %316 = vst.msk [vmem:[#allocation2 + $0x18] sm:$0x1] %vm314_vm1, %v297_v51  ;;  %v299_v51 = vld [vmem:[#allocation2 + $0x4a] sm:$0x1] }
  0x5d   : > { %742 = vrot.lane.b32.xlu2 %v4690_v59, %s4380_s24  ;;  %322 = vst.msk [vmem:[#allocation2 + $0xa8] sm:$0x1] %vm314_vm1, %v303_v20  ;;  %v4761_v15 = vld [vmem:[#allocation2 + $0x6a] sm:$0xff] }
  0x5e   : > { %740 = vrot.lane.b32.xlu1 %v4692_v60, %s4380_s24  ;;  %318 = vst.msk [vmem:[#allocation2 + $0x48] sm:$0x1] %vm314_vm1, %v299_v51  ;;  %v4759_v51 = vld [vmem:[#allocation2 + $0x52] sm:$0xff]  ;;  %v4781_v35 = vld [vmem:[#allocation2 + $0x82] sm:$0xff] }
  0x5f   : > { %361 = vst.msk [vmem:[#allocation2 + $0x101] sm:$0x1] %vm314_vm1, %v343_v46  ;;  %v306_v46 = vld [vmem:[#allocation2 + $0xf2] sm:$0x1] }
  0x60   : > { %362 = vst.msk [vmem:[#allocation2 + $0x119] sm:$0x1] %vm314_vm1, %v344_v13  ;;  %v345_v13 = vld [vmem:[#allocation2 + $0x12f] sm:$0x1] }
  0x61   : > { %325 = vst.msk [vmem:[#allocation2 + $0xf0] sm:$0x1] %vm314_vm1, %v306_v46  ;;  %v346_v46 = vld [vmem:[#allocation2 + $0x147] sm:$0x1]  ;;  %v4797_v36 = vld [vmem:[#allocation2 + $0x9a] sm:$0xff] }
  0x62   : > { %320 = vst.msk [vmem:[#allocation2 + $0x78] sm:$0x1] %vm314_vm1, %v301_v42  ;;  %v4799_v5 = vld [vmem:[#allocation2 + $0xb2] sm:$0xff] }
  0x63   : > { %744 = vrot.lane.b32.xlu0 %v4702_v63, %s4380_s24  ;;  %321 = vst.msk [vmem:[#allocation2 + $0x90] sm:$0x1] %vm314_vm1, %v302_v9 }
  0x64   : > { %363 = vst.msk [vmem:[#allocation2 + $0x131] sm:$0x1] %vm314_vm1, %v345_v13 }
  0x65   : > { %748 = vrot.lane.b32.xlu2 %v4704_v8, %s4380_s24  ;;  %364 = vst.msk [vmem:[#allocation2 + $0x149] sm:$0x1] %vm314_vm1, %v346_v46 }
  0x66   : > { %746 = vrot.lane.b32.xlu1 %v4706_v17, %s4380_s24  ;;  %365 = vst.msk [vmem:[#allocation2 + $0x161] sm:$0x1] %vm314_vm1, %v347_v6  ;;  %v348_v6 = vld [vmem:[#allocation2 + $0x177] sm:$0x1]  ;;  %v4840_v24 = vld [vmem:[#allocation2 + $0xfa] sm:$0xff] }
  0x67   : > { %328 = vst.msk [vmem:[#allocation2 + $0x138] sm:$0x1] %vm314_vm1, %v309_v29 }
  0x68   : > { %323 = vst.msk [vmem:[#allocation2 + $0xc0] sm:$0x1] %vm314_vm1, %v304_v30 }
  0x69   : > { %324 = vst.msk [vmem:[#allocation2 + $0xd8] sm:$0x1] %vm314_vm1, %v305_v2 }
  0x6a   : > { %366 = vst.msk [vmem:[#allocation2 + $0x179] sm:$0x1] %vm314_vm1, %v348_v6 }
  0x6b   : > { %750 = vrot.lane.b32.xlu0 %v4716_v57, %s4380_s24 }
  0x6d   : > { %818 = vrot.lane.b32.xlu2 %v433_v61, %s4381_s25  ;;  %v341_v61 = vld [vmem:[#allocation2 + $0xcf] sm:$0x1] }
  0x6e   : > { %752 = vrot.lane.b32.xlu1 %v4719_v62, %s4380_s24  ;;  %359 = vst.msk [vmem:[#allocation2 + $0xd1] sm:$0x1] %vm314_vm1, %v341_v61  ;;  %v342_v61 = vld [vmem:[#allocation2 + $0xe7] sm:$0x1] }
  0x6f   : > { %360 = vst.msk [vmem:[#allocation2 + $0xe9] sm:$0x1] %vm314_vm1, %v342_v61 }
  0x73   : > { %820 = vrot.lane.b32.xlu0 %v434_v52, %s4381_s25  ;;  %v4745_v52 = vld [vmem:[#allocation2 + $0x4a] sm:$0xff] }
  0x75   : > { %824 = vrot.lane.b32.xlu2 %v4729_v56, %s4381_s25  ;;  %v4823_v23 = vld [vmem:[#allocation2 + $0xca] sm:$0xff] }
  0x76   : > { %822 = vrot.lane.b32.xlu1 %v4731_v16, %s4381_s25  ;;  %v4838_v2 = vld [vmem:[#allocation2 + $0xe2] sm:$0xff] }
  0x77   : > { %v4739_v18 = vpop.permute.xlu2 %698 }
  0x78   : > { %7965 = vst [vmem:[#allocation33_spill] sm:$0xff] %v4739_v18  ;;  %v310_v18 = vld [vmem:[#allocation2 + $0x152] sm:$0x1] }
  0x79   : > { %329 = vst.msk [vmem:[#allocation2 + $0x150] sm:$0x1] %vm314_vm1, %v310_v18 }
  0x7b   : > { %826 = vrot.lane.b32.xlu0 %v4742_v47, %s4381_s25 }
  0x7d   : > { %830 = vrot.lane.b32.xlu2 %v4745_v52, %s4381_s25 }
  0x7e   : > { %828 = vrot.lane.b32.xlu1 %v4747_v14, %s4381_s25 }
  0x7f   : > { %v4756_v20 = vpop.permute.xlu2 %700 }
  0x80   : > { %7966 = vst [vmem:[#allocation34_spill] sm:$0xff] %v4756_v20  ;;  %v4880_v20 = vld [vmem:[#allocation2 + $0x13a] sm:$0xff] }
  0x83   : > { %832 = vrot.lane.b32.xlu0 %v4759_v51, %s4381_s25 }
  0x85   : > { %836 = vrot.lane.b32.xlu2 %v4761_v15, %s4381_s25 }
  0x86   : > { %834 = vrot.lane.b32.xlu1 %v4763_v41, %s4381_s25 }
  0x87   : > { %v4772_v61 = vpop.permute.xlu2 %706 }
  0x88   : > { %7967 = vst [vmem:[#allocation35_spill] sm:$0xff] %v4772_v61  ;;  %v308_v61 = vld [vmem:[#allocation2 + $0x122] sm:$0x1] }
  0x89   : > { %327 = vst.msk [vmem:[#allocation2 + $0x120] sm:$0x1] %vm314_vm1, %v308_v61  ;;  %v4878_v61 = vld [vmem:[#allocation2 + $0x142] sm:$0xff] }
  0x8a   : > { %7984 = vst [vmem:[#allocation52_spill] sm:$0xff] %v4878_v61 }
  0x8b   : > { %838 = vrot.lane.b32.xlu0 %v4775_v40, %s4381_s25 }
  0x8d   : > { %842 = vrot.lane.b32.xlu2 %v4778_v11, %s4381_s25  ;;  %v4789_v7 = vpop.permute.xlu0 %690 }
  0x8e   : > { %840 = vrot.lane.b32.xlu1 %v4781_v35, %s4381_s25  ;;  %7968 = vst [vmem:[#allocation36_spill] sm:$0xff] %v4789_v7  ;;  %v4900_v7 = vld [vmem:[#allocation2 + $0x15a] sm:$0xff] }
  0x8f   : > { %v4792_v42 = vpop.permute.xlu2 %712  ;;  %7990 = vst [vmem:[#allocation58_spill] sm:$0xff] %v4900_v7 }
  0x90   : > { %7969 = vst [vmem:[#allocation37_spill] sm:$0xff] %v4792_v42  ;;  %v4795_v9 = vpop.permute.xlu1 %694  ;;  %v307_v42 = vld [vmem:[#allocation2 + $0x10a] sm:$0x1] }
  0x91   : > { %7970 = vst [vmem:[#allocation38_spill] sm:$0xff] %v4795_v9  ;;  %v4894_v9 = vld [vmem:[#allocation2 + $0x152] sm:$0xff] }
  0x92   : > { %326 = vst.msk [vmem:[#allocation2 + $0x108] sm:$0x1] %vm314_vm1, %v307_v42 }
  0x93   : > { %844 = vrot.lane.b32.xlu0 %v4797_v36, %s4381_s25  ;;  %7988 = vst [vmem:[#allocation56_spill] sm:$0xff] %v4894_v9 }
  0x95   : > { %848 = vrot.lane.b32.xlu2 %v4799_v5, %s4381_s25  ;;  %v4809_v13 = vpop.permute.xlu0 %692 }
  0x96   : > { %846 = vrot.lane.b32.xlu1 %v4801_v34, %s4381_s25  ;;  %7971 = vst [vmem:[#allocation39_spill] sm:$0xff] %v4809_v13  ;;  %v4897_v13 = vld [vmem:[#allocation2 + $0x16a] sm:$0xff] }
  0x97   : > { %v4812_v46 = vpop.permute.xlu2 %718  ;;  %7989 = vst [vmem:[#allocation57_spill] sm:$0xff] %v4897_v13 }
  0x98   : > { %7972 = vst [vmem:[#allocation40_spill] sm:$0xff] %v4812_v46  ;;  %v4814_v4 = vpop.permute.xlu1 %696 }
  0x99   : > { %7973 = vst [vmem:[#allocation41_spill] sm:$0xff] %v4814_v4  ;;  %v311_v4 = vld [vmem:[#allocation2 + $0x16a] sm:$0x1] }
  0x9a   : > { %330 = vst.msk [vmem:[#allocation2 + $0x168] sm:$0x1] %vm314_vm1, %v311_v4  ;;  %v372_v4 = vld [vmem:[#allocation2 + $0x20] sm:$0xff] }
  0x9b   : > { %850 = vrot.lane.b32.xlu0 %v4817_v28, %s4381_s25 }
  0x9d   : > { %854 = vrot.lane.b32.xlu2 %v4820_v0, %s4381_s25  ;;  %v4831_v29 = vpop.permute.xlu0 %702 }
  0x9e   : > { %852 = vrot.lane.b32.xlu1 %v4823_v23, %s4381_s25  ;;  %7974 = vst [vmem:[#allocation42_spill] sm:$0xff] %v4831_v29  ;;  %v4862_v29 = vld [vmem:[#allocation2 + $0x112] sm:$0xff] }
  0x9f   : > { %v4834_v30 = vpop.permute.xlu2 %724 }
  0xa0   : > { %7975 = vst [vmem:[#allocation43_spill] sm:$0xff] %v4834_v30  ;;  %v4836_v3 = vpop.permute.xlu1 %704  ;;  %v4859_v30 = vld [vmem:[#allocation2 + $0x122] sm:$0xff] }
  0xa1   : > { %7976 = vst [vmem:[#allocation44_spill] sm:$0xff] %v4836_v3  ;;  %v4856_v3 = vld [vmem:[#allocation2 + $0x10a] sm:$0xff] }
  0xa3   : > { %856 = vrot.lane.b32.xlu0 %v4838_v2, %s4381_s25 }
  0xa5   : > { %860 = vrot.lane.b32.xlu2 %v4840_v24, %s4381_s25  ;;  %v4850_v6 = vpop.permute.xlu0 %708 }
  0xa6   : > { %858 = vrot.lane.b32.xlu1 %v4842_v1, %s4381_s25  ;;  %7977 = vst [vmem:[#allocation45_spill] sm:$0xff] %v4850_v6  ;;  %v4876_v6 = vld [vmem:[#allocation2 + $0x12a] sm:$0xff] }
  0xa7   : > { %v4852_v22 = vpop.permute.xlu2 %730  ;;  %7983 = vst [vmem:[#allocation51_spill] sm:$0xff] %v4876_v6 }
  0xa8   : > { %7978 = vst [vmem:[#allocation46_spill] sm:$0xff] %v4852_v22  ;;  %v4854_v46 = vpop.permute.xlu1 %710 }
  0xa9   : > { %7979 = vst [vmem:[#allocation47_spill] sm:$0xff] %v4854_v46 }
  0xab   : > { %862 = vrot.lane.b32.xlu0 %v4856_v3, %s4381_s25 }
  0xad   : > { %866 = vrot.lane.b32.xlu2 %v4859_v30, %s4381_s25  ;;  %v4870_v46 = vpop.permute.xlu0 %714 }
  0xae   : > { %864 = vrot.lane.b32.xlu1 %v4862_v29, %s4381_s25  ;;  %7980 = vst [vmem:[#allocation48_spill] sm:$0xff] %v4870_v46 }
  0xaf   : > { %v4872_v22 = vpop.permute.xlu2 %736 }
  0xb0   : > { %7981 = vst [vmem:[#allocation49_spill] sm:$0xff] %v4872_v22  ;;  %v4874_v42 = vpop.permute.xlu1 %716 }
  0xb1   : > { %7982 = vst [vmem:[#allocation50_spill] sm:$0xff] %v4874_v42 }
  0xb3   : > { %868 = vrot.lane.b32.xlu0 %v4876_v6, %s4381_s25  ;;  %v378_v6 = vld [vmem:[#allocation2 + $0x68] sm:$0xff] }
  0xb5   : > { %872 = vrot.lane.b32.xlu2 %v4878_v61, %s4381_s25  ;;  %v4888_v46 = vpop.permute.xlu0 %720  ;;  %v371_v61 = vld [vmem:[#allocation2 + $0x18] sm:$0xff] }
  0xb6   : > { %870 = vrot.lane.b32.xlu1 %v4880_v20, %s4381_s25  ;;  %7985 = vst [vmem:[#allocation53_spill] sm:$0xff] %v4888_v46 }
  0xb7   : > { %v4890_v22 = vpop.permute.xlu2 %742 }
  0xb8   : > { %7986 = vst [vmem:[#allocation54_spill] sm:$0xff] %v4890_v22  ;;  %v4892_v42 = vpop.permute.xlu1 %722 }
  0xb9   : > { %7987 = vst [vmem:[#allocation55_spill] sm:$0xff] %v4892_v42  ;;  %v4914_v42 = vld [vmem:[#allocation2 + $0x172] sm:$0xff] }
  0xba   : > { %7994 = vst [vmem:[#allocation62_spill] sm:$0xff] %v4914_v42 }
  0xbb   : > { %874 = vrot.lane.b32.xlu0 %v4894_v9, %s4381_s25 }
  0xbd   : > { %878 = vrot.lane.b32.xlu2 %v4897_v13, %s4381_s25  ;;  %v4908_v22 = vpop.permute.xlu0 %726 }
  0xbe   : > { %876 = vrot.lane.b32.xlu1 %v4900_v7, %s4381_s25  ;;  %7991 = vst [vmem:[#allocation59_spill] sm:$0xff] %v4908_v22  ;;  %v374_v7 = vld [vmem:[#allocation2 + $0x38] sm:$0xff] }
  0xbf   : > { %v4910_v46 = vpop.permute.xlu2 %748 }
  0xc0   : > { %7992 = vst [vmem:[#allocation60_spill] sm:$0xff] %v4910_v46  ;;  %v4912_v18 = vpop.permute.xlu1 %728  ;;  %v373_v46 = vld [vmem:[#allocation2 + $0x30] sm:$0xff] }
  0xc1   : > { %7993 = vst [vmem:[#allocation61_spill] sm:$0xff] %v4912_v18  ;;  %v375_v18 = vld [vmem:[#allocation2 + $0x48] sm:$0xff] }
  0xc3   : > { %880 = vrot.lane.b32.xlu0 %v4914_v42, %s4381_s25 }
  0xc5   : > { %948 = vrot.lane.b32.xlu2 %v372_v4, %s4382_s26  ;;  %v4920_v13 = vpop.permute.xlu0 %732 }
  0xc6   : > { %946 = vrot.lane.b32.xlu1 %v371_v61, %s4382_s26  ;;  %7995 = vst [vmem:[#allocation63_spill] sm:$0xff] %v4920_v13  ;;  %v376_v13 = vld [vmem:[#allocation2 + $0x50] sm:$0xff] }
  0xc7   : > { %v4922_v9 = vpop.permute.xlu2 %818 }
  0xc8   : > { %7996 = vst [vmem:[#allocation64_spill] sm:$0xff] %v4922_v9  ;;  %v4924_v22 = vpop.permute.xlu1 %734  ;;  %v4968_v9 = vld [vmem:[%s4434_s23 + $0xf0] sm:$0xff] }
  0xc9   : > { %7997 = vst [vmem:[#allocation65_spill] sm:$0xff] %v4924_v22  ;;  %v377_v22 = vld [vmem:[#allocation2 + $0x60] sm:$0xff] }
  0xca   : > { %8010 = vst [vmem:[#allocation78_spill] sm:$0xff] %v4968_v9 }
  0xcb   : > { %950 = vrot.lane.b32.xlu0 %v373_v46, %s4382_s26  ;;  %289 = vst.msk [vmem:[#allocation2 + $0x181] sm:$0xff] %vm258_vm0, %v4968_v9 }
  0xcd   : > { %954 = vrot.lane.b32.xlu2 %v375_v18, %s4382_s26  ;;  %v4929_v42 = vpop.permute.xlu0 %738 }
  0xce   : > { %952 = vrot.lane.b32.xlu1 %v374_v7, %s4382_s26  ;;  %7998 = vst [vmem:[#allocation66_spill] sm:$0xff] %v4929_v42  ;;  %v4944_v42 = vld [vmem:[#allocation2 + $0x78] sm:$0xff] }
  0xcf   : > { %v4931_v4 = vpop.permute.xlu2 %824 }
  0xd0   : > { %7999 = vst [vmem:[#allocation67_spill] sm:$0xff] %v4931_v4  ;;  %v4933_v61 = vpop.permute.xlu1 %740  ;;  %v4946_v4 = vld [vmem:[#allocation2 + $0x90] sm:$0xff] }
  0xd1   : > { %8000 = vst [vmem:[#allocation68_spill] sm:$0xff] %v4933_v61  ;;  %v4961_v61 = vld [vmem:[#allocation2 + $0xb0] sm:$0xff] }
  0xd2   : > { %8004 = vst [vmem:[#allocation72_spill] sm:$0xff] %v4946_v4 }
  0xd3   : > { %956 = vrot.lane.b32.xlu0 %v376_v13, %s4382_s26  ;;  %v380_v13 = vld [vmem:[#allocation2 + $0x80] sm:$0xff]  ;;  %8009 = vst [vmem:[#allocation77_spill] sm:$0xff] %v4961_v61 }
  0xd5   : > { %960 = vrot.lane.b32.xlu2 %v378_v6, %s4382_s26  ;;  %v4938_v46 = vpop.permute.xlu0 %744 }
  0xd6   : > { %958 = vrot.lane.b32.xlu1 %v377_v22, %s4382_s26  ;;  %8001 = vst [vmem:[#allocation69_spill] sm:$0xff] %v4938_v46 }
  0xd7   : > { %v4940_v18 = vpop.permute.xlu2 %830 }
  0xd8   : > { %8002 = vst [vmem:[#allocation70_spill] sm:$0xff] %v4940_v18  ;;  %v4942_v7 = vpop.permute.xlu1 %746  ;;  %v383_v18 = vld [vmem:[#allocation2 + $0xa8] sm:$0xff] }
  0xd9   : > { %8003 = vst [vmem:[#allocation71_spill] sm:$0xff] %v4942_v7  ;;  %v4959_v7 = vld [vmem:[#allocation2 + $0x98] sm:$0xff] }
  0xda   : > { %8008 = vst [vmem:[#allocation76_spill] sm:$0xff] %v4959_v7 }
  0xdb   : > { %962 = vrot.lane.b32.xlu0 %v4944_v42, %s4382_s26 }
  0xdd   : > { %966 = vrot.lane.b32.xlu2 %v4946_v4, %s4382_s26  ;;  %v4953_v22 = vpop.permute.xlu0 %750  ;;  %v5002_v4 = vld [vmem:[#allocation2 + $0xf8] sm:$0xff] }
  0xde   : > { %964 = vrot.lane.b32.xlu1 %v380_v13, %s4382_s26  ;;  %8005 = vst [vmem:[#allocation73_spill] sm:$0xff] %v4953_v22 }
  0xdf   : > { %v4955_v6 = vpop.permute.xlu2 %836  ;;  %8021 = vst [vmem:[#allocation89_spill] sm:$0xff] %v5002_v4 }
  0xe0   : > { %8006 = vst [vmem:[#allocation74_spill] sm:$0xff] %v4955_v6  ;;  %v4957_v46 = vpop.permute.xlu1 %752  ;;  %v4979_v6 = vld [vmem:[#allocation2 + $0xc0] sm:$0xff] }
  0xe1   : > { %8007 = vst [vmem:[#allocation75_spill] sm:$0xff] %v4957_v46 }
  0xe2   : > { %8014 = vst [vmem:[#allocation82_spill] sm:$0xff] %v4979_v6 }
  0xe3   : > { %968 = vrot.lane.b32.xlu0 %v4959_v7, %s4382_s26  ;;  %v4981_v7 = vld [vmem:[#allocation2 + $0xd8] sm:$0xff] }
  0xe4   : > { %8015 = vst [vmem:[#allocation83_spill] sm:$0xff] %v4981_v7 }
  0xe5   : > { %972 = vrot.lane.b32.xlu2 %v4961_v61, %s4382_s26  ;;  %v4971_v13 = vpop.permute.xlu0 %820  ;;  %v386_v61 = vld [vmem:[#allocation2 + $0xc8] sm:$0xff] }
  0xe6   : > { %970 = vrot.lane.b32.xlu1 %v383_v18, %s4382_s26  ;;  %8011 = vst [vmem:[#allocation79_spill] sm:$0xff] %v4971_v13  ;;  %v4988_v18 = vld [vmem:[%s4434_s23 + $0xf8] sm:$0xff]  ;;  %v312_v13 = vld [vmem:[#allocation2 + $0x182] sm:$0x1] }
  0xe7   : > { %v4975_v46 = vpop.permute.xlu2 %842  ;;  %8016 = vst [vmem:[#allocation84_spill] sm:$0xff] %v4988_v18 }
  0xe8   : > { %8012 = vst [vmem:[#allocation80_spill] sm:$0xff] %v4975_v46  ;;  %v4977_v22 = vpop.permute.xlu1 %822 }
  0xe9   : > { %8013 = vst [vmem:[#allocation81_spill] sm:$0xff] %v4977_v22 }
  0xea   : > { %290 = vst.msk [vmem:[#allocation2 + $0x189] sm:$0xff] %vm258_vm0, %v4988_v18 }
  0xeb   : > { %974 = vrot.lane.b32.xlu0 %v4979_v6, %s4382_s26  ;;  %331 = vst.msk [vmem:[#allocation2 + $0x180] sm:$0x1] %vm314_vm1, %v312_v13  ;;  %v5000_v6 = vld [vmem:[#allocation2 + $0xe0] sm:$0xff] }
  0xec   : > { %8020 = vst [vmem:[#allocation88_spill] sm:$0xff] %v5000_v6 }
  0xed   : > { %978 = vrot.lane.b32.xlu2 %v4981_v7, %s4382_s26  ;;  %v4991_v9 = vpop.permute.xlu0 %826  ;;  %v389_v7 = vld [vmem:[#allocation2 + $0xf0] sm:$0xff] }
  0xee   : > { %976 = vrot.lane.b32.xlu1 %v386_v61, %s4382_s26  ;;  %8017 = vst [vmem:[#allocation85_spill] sm:$0xff] %v4991_v9  ;;  %v392_v9 = vld [vmem:[#allocation2 + $0x110] sm:$0xff] }
  0xef   : > { %v4995_v46 = vpop.permute.xlu2 %848 }
  0xf0   : > { %8018 = vst [vmem:[#allocation86_spill] sm:$0xff] %v4995_v46  ;;  %v4998_v22 = vpop.permute.xlu1 %828  ;;  %v5015_v46 = vld [vmem:[#allocation2 + $0x108] sm:$0xff] }
  0xf1   : > { %8019 = vst [vmem:[#allocation87_spill] sm:$0xff] %v4998_v22  ;;  %v5017_v22 = vld [vmem:[#allocation2 + $0x120] sm:$0xff] }
  0xf2   : > { %8025 = vst [vmem:[#allocation93_spill] sm:$0xff] %v5015_v46 }
  0xf3   : > { %980 = vrot.lane.b32.xlu0 %v5000_v6, %s4382_s26  ;;  %8026 = vst [vmem:[#allocation94_spill] sm:$0xff] %v5017_v22  ;;  %v5064_v6 = vld [vmem:[#allocation2 + $0x180] sm:$0xff] }
  0xf5   : > { %984 = vrot.lane.b32.xlu2 %v5002_v4, %s4382_s26  ;;  %v5009_v61 = vpop.permute.xlu0 %832  ;;  %v5032_v4 = vld [vmem:[#allocation2 + $0x140] sm:$0xff] }
  0xf6   : > { %982 = vrot.lane.b32.xlu1 %v389_v7, %s4382_s26  ;;  %8022 = vst [vmem:[#allocation90_spill] sm:$0xff] %v5009_v61 }
  0xf7   : > { %v5011_v18 = vpop.permute.xlu2 %854  ;;  %8031 = vst [vmem:[#allocation99_spill] sm:$0xff] %v5032_v4 }
  0xf8   : > { %8023 = vst [vmem:[#allocation91_spill] sm:$0xff] %v5011_v18  ;;  %v5013_v13 = vpop.permute.xlu1 %834 }
  0xf9   : > { %8024 = vst [vmem:[#allocation92_spill] sm:$0xff] %v5013_v13  ;;  %v5030_v13 = vld [vmem:[#allocation2 + $0x128] sm:$0xff] }
  0xfa   : > { %8030 = vst [vmem:[#allocation98_spill] sm:$0xff] %v5030_v13 }
  0xfb   : > { %986 = vrot.lane.b32.xlu0 %v5015_v46, %s4382_s26  ;;  %v395_v46 = vld [vmem:[#allocation2 + $0x138] sm:$0xff] }
  0xfd   : > { %990 = vrot.lane.b32.xlu2 %v5017_v22, %s4382_s26  ;;  %v5024_v7 = vpop.permute.xlu0 %838  ;;  %v5047_v22 = vld [vmem:[#allocation2 + $0x168] sm:$0xff] }
  0xfe   : > { %988 = vrot.lane.b32.xlu1 %v392_v9, %s4382_s26  ;;  %8027 = vst [vmem:[#allocation95_spill] sm:$0xff] %v5024_v7 }
  0xff   : > { %v5026_v61 = vpop.permute.xlu2 %860 }
 0x100   : > { %8028 = vst [vmem:[#allocation96_spill] sm:$0xff] %v5026_v61  ;;  %v5028_v18 = vpop.permute.xlu1 %840 }
 0x101   : > { %8029 = vst [vmem:[#allocation97_spill] sm:$0xff] %v5028_v18  ;;  %v5045_v18 = vld [vmem:[#allocation2 + $0x150] sm:$0xff] }
 0x103   : > { %992 = vrot.lane.b32.xlu0 %v5030_v13, %s4382_s26  ;;  %v398_v13 = vld [vmem:[#allocation2 + $0x158] sm:$0xff] }
 0x105   : > { %996 = vrot.lane.b32.xlu2 %v5032_v4, %s4382_s26  ;;  %v5039_v9 = vpop.permute.xlu0 %844  ;;  %v5062_v4 = vld [vmem:[#allocation2 + $0x170] sm:$0xff] }
 0x106   : > { %994 = vrot.lane.b32.xlu1 %v395_v46, %s4382_s26  ;;  %8032 = vst [vmem:[#allocation100_spill] sm:$0xff] %v5039_v9 }
 0x107   : > { %v5041_v7 = vpop.permute.xlu2 %866  ;;  %8039 = vst [vmem:[#allocation107_spill] sm:$0xff] %v5062_v4 }
 0x108   : > { %8033 = vst [vmem:[#allocation101_spill] sm:$0xff] %v5041_v7  ;;  %v5043_v61 = vpop.permute.xlu1 %846 }
 0x109   : > { %8034 = vst [vmem:[#allocation102_spill] sm:$0xff] %v5043_v61  ;;  %v5060_v61 = vld [vmem:[#allocation2 + $0x188] sm:$0xff] }
 0x10a   : > { %8038 = vst [vmem:[#allocation106_spill] sm:$0xff] %v5060_v61 }
 0x10b   : > { %998 = vrot.lane.b32.xlu0 %v5045_v18, %s4382_s26 }
 0x10d   : > { %1002 = vrot.lane.b32.xlu2 %v5047_v22, %s4382_s26  ;;  %v5054_v46 = vpop.permute.xlu0 %850 }
 0x10e   : > { %1000 = vrot.lane.b32.xlu1 %v398_v13, %s4382_s26  ;;  %8035 = vst [vmem:[#allocation103_spill] sm:$0xff] %v5054_v46 }
 0x10f   : > { %v5056_v9 = vpop.permute.xlu2 %872 }
 0x110   : > { %8036 = vst [vmem:[#allocation104_spill] sm:$0xff] %v5056_v9  ;;  %v5058_v7 = vpop.permute.xlu1 %852 }
 0x111   : > { %8037 = vst [vmem:[#allocation105_spill] sm:$0xff] %v5058_v7 }
 0x113   : > { %1004 = vrot.lane.b32.xlu0 %v5062_v4, %s4382_s26 }
 0x115   : > { %1008 = vrot.lane.b32.xlu2 %v5060_v61, %s4382_s26  ;;  %v5072_v13 = vpop.permute.xlu0 %856 }
 0x116   : > { %1006 = vrot.lane.b32.xlu1 %v5064_v6, %s4382_s26  ;;  %8040 = vst [vmem:[#allocation108_spill] sm:$0xff] %v5072_v13  ;;  %v643_v13 = vld [vmem:[#allocation2 + $0xfa] sm:$0xff] }
 0x117   : > { %v5074_v9 = vpop.permute.xlu2 %878 }
 0x118   : > { %8041 = vst [vmem:[#allocation109_spill] sm:$0xff] %v5074_v9  ;;  %v5076_v7 = vpop.permute.xlu1 %858  ;;  %v5200_v9 = vld [vmem:[#allocation2 + $0x189] sm:$0xff] }
 0x119   : > { %8042 = vst [vmem:[#allocation110_spill] sm:$0xff] %v5076_v7  ;;  %v617_v7 = vld [vmem:[#allocation2 + $0x141] sm:$0xff] }
 0x11b   : > { %1074 = vrot.lane.b32.xlu0 %v4489_v12, %s4383_s27 }
 0x11d   : > { %1078 = vrot.lane.b32.xlu2 %v4480_v10, %s4383_s27  ;;  %v5084_v46 = vpop.permute.xlu0 %862 }
 0x11e   : > { %1076 = vrot.lane.b32.xlu1 %v4525_v21, %s4383_s27  ;;  %8043 = vst [vmem:[#allocation111_spill] sm:$0xff] %v5084_v46  ;;  %v8115_v46 = vld [vmem:[#allocation99_spill] sm:$0xff] }
 0x11f   : > { %v5086_v61 = vpop.permute.xlu2 %948 }
 0x120   : > { %v5088_v4 = vpop.permute.xlu1 %864 }
 0x121   : > { %8044 = vst [vmem:[#allocation112_spill] sm:$0xff] %v5088_v4 }
 0x123   : > { %1080 = vrot.lane.b32.xlu0 %v4518_v19, %s4383_s27 }
 0x125   : > { %1084 = vrot.lane.b32.xlu2 %v4557_v27, %s4383_s27  ;;  %v5096_v12 = vpop.permute.xlu0 %868 }
 0x126   : > { %1082 = vrot.lane.b32.xlu1 %v4553_v25, %s4383_s27  ;;  %8045 = vst [vmem:[#allocation113_spill] sm:$0xff] %v5096_v12  ;;  %v566_v12 = vld [vmem:[#allocation2 + $0x60] sm:$0xff] }
 0x127   : > { %v5098_v10 = vpop.permute.xlu2 %954 }
 0x128   : > { %v5100_v21 = vpop.permute.xlu1 %870 }
 0x129   : > { %8046 = vst [vmem:[#allocation114_spill] sm:$0xff] %v5100_v21 }
 0x12b   : > { %1086 = vrot.lane.b32.xlu0 %v4555_v26, %s4383_s27 }
 0x12d   : > { %1090 = vrot.lane.b32.xlu2 %v4584_v33, %s4383_s27  ;;  %v5108_v19 = vpop.permute.xlu0 %874 }
 0x12e   : > { %1088 = vrot.lane.b32.xlu1 %v4580_v31, %s4383_s27  ;;  %8047 = vst [vmem:[#allocation115_spill] sm:$0xff] %v5108_v19 }
 0x12f   : > { %v5110_v27 = vpop.permute.xlu2 %960 }
 0x130   : > { %v5112_v25 = vpop.permute.xlu1 %876 }
 0x131   : > { %8048 = vst [vmem:[#allocation116_spill] sm:$0xff] %v5112_v25 }
 0x133   : > { %1092 = vrot.lane.b32.xlu0 %v4582_v32, %s4383_s27 }
 0x135   : > { %1096 = vrot.lane.b32.xlu2 %v4611_v39, %s4383_s27  ;;  %v5120_v26 = vpop.permute.xlu0 %880 }
 0x136   : > { %1094 = vrot.lane.b32.xlu1 %v4607_v37, %s4383_s27  ;;  %8049 = vst [vmem:[#allocation117_spill] sm:$0xff] %v5120_v26  ;;  %v5198_v26 = vld [vmem:[#allocation2 + $0x181] sm:$0xff] }
 0x137   : > { %v5122_v33 = vpop.permute.xlu2 %966 }
 0x138   : > { %8050 = vst [vmem:[#allocation118_spill] sm:$0xff] %v5122_v33  ;;  %v5124_v31 = vpop.permute.xlu1 %946  ;;  %v615_v33 = vld [vmem:[#allocation2 + $0x129] sm:$0xff] }
 0x13b   : > { %1098 = vrot.lane.b32.xlu0 %v4609_v38, %s4383_s27 }
 0x13d   : > { %1102 = vrot.lane.b32.xlu2 %v4638_v45, %s4383_s27  ;;  %v5132_v32 = vpop.permute.xlu0 %950 }
 0x13e   : > { %1100 = vrot.lane.b32.xlu1 %v4634_v43, %s4383_s27 }
 0x13f   : > { %v5134_v39 = vpop.permute.xlu2 %972 }
 0x140   : > { %8051 = vst [vmem:[#allocation119_spill] sm:$0xff] %v5134_v39  ;;  %v5136_v37 = vpop.permute.xlu1 %952  ;;  %v8103_v39 = vld [vmem:[#allocation83_spill] sm:$0xff] }
 0x143   : > { %1104 = vrot.lane.b32.xlu0 %v4636_v44, %s4383_s27 }
 0x145   : > { %1108 = vrot.lane.b32.xlu2 %v4664_v50, %s4383_s27  ;;  %v5144_v38 = vpop.permute.xlu0 %956 }
 0x146   : > { %1106 = vrot.lane.b32.xlu1 %v4658_v48, %s4383_s27 }
 0x147   : > { %v5146_v45 = vpop.permute.xlu2 %978 }
 0x148   : > { %v5148_v43 = vpop.permute.xlu1 %958 }
 0x14b   : > { %1110 = vrot.lane.b32.xlu0 %v4662_v49, %s4383_s27 }
 0x14d   : > { %1114 = vrot.lane.b32.xlu2 %v4678_v55, %s4383_s27  ;;  %v5156_v44 = vpop.permute.xlu0 %962 }
 0x14e   : > { %1112 = vrot.lane.b32.xlu1 %v4674_v53, %s4383_s27 }
 0x14f   : > { %v5158_v50 = vpop.permute.xlu2 %984 }
 0x150   : > { %8052 = vst [vmem:[#allocation120_spill] sm:$0xff] %v5158_v50  ;;  %v5160_v48 = vpop.permute.xlu1 %964  ;;  %v640_v50 = vld [vmem:[#allocation2 + $0xda] sm:$0xff] }
 0x151   : > { %8053 = vst [vmem:[#allocation121_spill] sm:$0xff] %v5160_v48  ;;  %v637_v48 = vld [vmem:[#allocation2 + $0xb2] sm:$0xff] }
 0x153   : > { %1116 = vrot.lane.b32.xlu0 %v4676_v54, %s4383_s27 }
 0x155   : > { %1120 = vrot.lane.b32.xlu2 %v4692_v60, %s4383_s27  ;;  %v5168_v49 = vpop.permute.xlu0 %968 }
 0x156   : > { %1118 = vrot.lane.b32.xlu1 %v4688_v58, %s4383_s27  ;;  %8054 = vst [vmem:[#allocation122_spill] sm:$0xff] %v5168_v49  ;;  %v602_v49 = vld [vmem:[#allocation2 + $0x91] sm:$0xff] }
 0x157   : > { %v5170_v55 = vpop.permute.xlu2 %990 }
 0x158   : > { %8055 = vst [vmem:[#allocation123_spill] sm:$0xff] %v5170_v55  ;;  %v5172_v53 = vpop.permute.xlu1 %970  ;;  %v587_v55 = vld [vmem:[#allocation2 + $0x158] sm:$0xff] }
 0x159   : > { %8056 = vst [vmem:[#allocation124_spill] sm:$0xff] %v5172_v53  ;;  %v8111_v53 = vld [vmem:[#allocation98_spill] sm:$0xff] }
 0x15b   : > { %1122 = vrot.lane.b32.xlu0 %v4690_v59, %s4383_s27 }
 0x15d   : > { %1126 = vrot.lane.b32.xlu2 %v4706_v17, %s4383_s27  ;;  %v5180_v54 = vpop.permute.xlu0 %974 }
 0x15e   : > { %1124 = vrot.lane.b32.xlu1 %v4702_v63, %s4383_s27  ;;  %8057 = vst [vmem:[#allocation125_spill] sm:$0xff] %v5180_v54  ;;  %v567_v54 = vld [vmem:[#allocation2 + $0x68] sm:$0xff] }
 0x15f   : > { %v5182_v60 = vpop.permute.xlu2 %996 }
 0x160   : > { %8058 = vst [vmem:[#allocation126_spill] sm:$0xff] %v5182_v60  ;;  %v5184_v58 = vpop.permute.xlu1 %976 }
 0x161   : > { %8059 = vst [vmem:[#allocation127_spill] sm:$0xff] %v5184_v58  ;;  %v562_v58 = vld [vmem:[#allocation2 + $0x30] sm:$0xff] }
 0x163   : > { %1128 = vrot.lane.b32.xlu0 %v4704_v8, %s4383_s27 }
 0x165   : > { %1132 = vrot.lane.b32.xlu2 %v4719_v62, %s4383_s27  ;;  %v5192_v59 = vpop.permute.xlu0 %980 }
 0x166   : > { %1130 = vrot.lane.b32.xlu1 %v4716_v57, %s4383_s27 }
 0x167   : > { %v5194_v17 = vpop.permute.xlu2 %1002 }
 0x168   : > { %8060 = vst [vmem:[#allocation128_spill] sm:$0xff] %v5194_v17  ;;  %v5196_v63 = vpop.permute.xlu1 %982 }
 0x16b   : > { %1134 = vrot.lane.b32.xlu0 %v5198_v26, %s4383_s27 }
 0x16d   : > { %1202 = vrot.lane.b32.xlu2 %v4731_v16, %s4384_s28  ;;  %v5208_v8 = vpop.permute.xlu0 %986 }
 0x16e   : > { %1136 = vrot.lane.b32.xlu1 %v5200_v9, %s4383_s27  ;;  %8061 = vst [vmem:[#allocation129_spill] sm:$0xff] %v5208_v8  ;;  %v614_v8 = vld [vmem:[#allocation2 + $0x121] sm:$0xff] }
 0x16f   : > { %v5210_v57 = vpop.permute.xlu2 %1008 }
 0x170   : > { %8062 = vst [vmem:[#allocation130_spill] sm:$0xff] %v5210_v57  ;;  %v5212_v62 = vpop.permute.xlu1 %988  ;;  %v349_v57 = vld [vmem:[#allocation2 + $0x18f] sm:$0x1] }
 0x171   : > { %8063 = vst [vmem:[#allocation131_spill] sm:$0xff] %v5212_v62  ;;  %v598_v62 = vld [vmem:[#allocation2 + $0x61] sm:$0xff] }
 0x172   : > { %367 = vst.msk [vmem:[#allocation2 + $0x191] sm:$0x1] %vm314_vm1, %v349_v57 }
 0x173   : > { %1204 = vrot.lane.b32.xlu0 %v4729_v56, %s4384_s28 }
 0x175   : > { %1208 = vrot.lane.b32.xlu2 %v4747_v14, %s4384_s28  ;;  %v5220_v25 = vpop.permute.xlu0 %992 }
 0x176   : > { %1206 = vrot.lane.b32.xlu1 %v4742_v47, %s4384_s28  ;;  %8064 = vst [vmem:[#allocation132_spill] sm:$0xff] %v5220_v25  ;;  %v8100_v25 = vld [vmem:[#allocation77_spill] sm:$0xff] }
 0x177   : > { %v5222_v16 = vpop.permute.xlu2 %1078 }
 0x178   : > { %v5224_v17 = vpop.permute.xlu1 %994 }
 0x179   : > { %8065 = vst [vmem:[#allocation133_spill] sm:$0xff] %v5224_v17 }
 0x17b   : > { %1210 = vrot.lane.b32.xlu0 %v4745_v52, %s4384_s28 }
 0x17d   : > { %1214 = vrot.lane.b32.xlu2 %v4763_v41, %s4384_s28  ;;  %v5232_v56 = vpop.permute.xlu0 %998 }
 0x17e   : > { %1212 = vrot.lane.b32.xlu1 %v4759_v51, %s4384_s28  ;;  %8066 = vst [vmem:[#allocation134_spill] sm:$0xff] %v5232_v56  ;;  %v8084_v56 = vld [vmem:[#allocation57_spill] sm:$0xff] }
 0x17f   : > { %v5234_v14 = vpop.permute.xlu2 %1084 }
 0x180   : > { %v5236_v47 = vpop.permute.xlu1 %1000 }
 0x181   : > { %8067 = vst [vmem:[#allocation135_spill] sm:$0xff] %v5236_v47  ;;  %v5323_v47 = vld [vmem:[#allocation2 + $0x182] sm:$0xff] }
 0x183   : > { %1216 = vrot.lane.b32.xlu0 %v4761_v15, %s4384_s28 }
 0x185   : > { %1220 = vrot.lane.b32.xlu2 %v4781_v35, %s4384_s28  ;;  %v5244_v52 = vpop.permute.xlu0 %1004 }
 0x186   : > { %1218 = vrot.lane.b32.xlu1 %v4775_v40, %s4384_s28  ;;  %8068 = vst [vmem:[#allocation136_spill] sm:$0xff] %v5244_v52  ;;  %v8080_v52 = vld [vmem:[#allocation58_spill] sm:$0xff] }
 0x187   : > { %v5246_v41 = vpop.permute.xlu2 %1090 }
 0x188   : > { %v5248_v51 = vpop.permute.xlu1 %1006 }
 0x189   : > { %8069 = vst [vmem:[#allocation137_spill] sm:$0xff] %v5248_v51  ;;  %v8079_v51 = vld [vmem:[#allocation52_spill] sm:$0xff] }
 0x18b   : > { %1222 = vrot.lane.b32.xlu0 %v4778_v11, %s4384_s28 }
 0x18d   : > { %1226 = vrot.lane.b32.xlu2 %v4801_v34, %s4384_s28  ;;  %v5256_v15 = vpop.permute.xlu0 %1074 }
 0x18e   : > { %1224 = vrot.lane.b32.xlu1 %v4797_v36, %s4384_s28 }
 0x18f   : > { %v5258_v35 = vpop.permute.xlu2 %1096 }
 0x190   : > { %8070 = vst [vmem:[#allocation138_spill] sm:$0xff] %v5258_v35  ;;  %v5260_v40 = vpop.permute.xlu1 %1076  ;;  %v597_v35 = vld [vmem:[#allocation2 + $0x51] sm:$0xff] }
 0x193   : > { %1228 = vrot.lane.b32.xlu0 %v4799_v5, %s4384_s28 }
 0x195   : > { %1232 = vrot.lane.b32.xlu2 %v4823_v23, %s4384_s28  ;;  %v5268_v11 = vpop.permute.xlu0 %1080 }
 0x196   : > { %1230 = vrot.lane.b32.xlu1 %v4817_v28, %s4384_s28 }
 0x197   : > { %v5270_v34 = vpop.permute.xlu2 %1102 }
 0x198   : > { %8071 = vst [vmem:[#allocation139_spill] sm:$0xff] %v5270_v34  ;;  %v5272_v36 = vpop.permute.xlu1 %1082  ;;  %v565_v34 = vld [vmem:[#allocation2 + $0x50] sm:$0xff] }
 0x19b   : > { %1234 = vrot.lane.b32.xlu0 %v4820_v0, %s4384_s28 }
 0x19d   : > { %1238 = vrot.lane.b32.xlu2 %v4842_v1, %s4384_s28  ;;  %v5280_v5 = vpop.permute.xlu0 %1086 }
 0x19e   : > { %1236 = vrot.lane.b32.xlu1 %v4838_v2, %s4384_s28 }
 0x19f   : > { %v5283_v23 = vpop.permute.xlu2 %1108 }
 0x1a0   : > { %v5285_v28 = vpop.permute.xlu1 %1088 }
 0x1a3   : > { %1240 = vrot.lane.b32.xlu0 %v4840_v24, %s4384_s28  ;;  %v8075_v24 = vld [vmem:[#allocation51_spill] sm:$0xff] }
 0x1a5   : > { %1244 = vrot.lane.b32.xlu2 %v4862_v29, %s4384_s28  ;;  %v5293_v0 = vpop.permute.xlu0 %1092 }
 0x1a6   : > { %1242 = vrot.lane.b32.xlu1 %v4856_v3, %s4384_s28  ;;  %8072 = vst [vmem:[#allocation140_spill] sm:$0xff] %v5293_v0  ;;  %v634_v0 = vld [vmem:[#allocation2 + $0x92] sm:$0xff] }
 0x1a7   : > { %v5295_v1 = vpop.permute.xlu2 %1114 }
 0x1a8   : > { %8073 = vst [vmem:[#allocation141_spill] sm:$0xff] %v5295_v1  ;;  %v5297_v2 = vpop.permute.xlu1 %1094  ;;  %v612_v1 = vld [vmem:[#allocation2 + $0x109] sm:$0xff] }
 0x1a9   : > { %8074 = vst [vmem:[#allocation142_spill] sm:$0xff] %v5297_v2  ;;  %v607_v2 = vld [vmem:[#allocation2 + $0xc9] sm:$0xff] }
 0x1ab   : > { %1246 = vrot.lane.b32.xlu0 %v4859_v30, %s4384_s28  ;;  %v8081_v30 = vld [vmem:[#allocation56_spill] sm:$0xff] }
 0x1ad   : > { %1250 = vrot.lane.b32.xlu2 %v4880_v20, %s4384_s28  ;;  %v5305_v57 = vpop.permute.xlu0 %1098 }
 0x1ae   : > { %1248 = vrot.lane.b32.xlu1 %v8075_v24, %s4384_s28  ;;  %8076 = vst [vmem:[#allocation51_spill] sm:$0xff] %v5305_v57 }
 0x1af   : > { %v5307_v29 = vpop.permute.xlu2 %1120 }
 0x1b0   : > { %8077 = vst [vmem:[#allocation143_spill] sm:$0xff] %v5307_v29  ;;  %v5309_v3 = vpop.permute.xlu1 %1100  ;;  %v8095_v29 = vld [vmem:[#allocation72_spill] sm:$0xff] }
 0x1b1   : > { %8078 = vst [vmem:[#allocation144_spill] sm:$0xff] %v5309_v3  ;;  %v569_v3 = vld [vmem:[#allocation2 + $0x80] sm:$0xff] }
 0x1b3   : > { %1252 = vrot.lane.b32.xlu0 %v8079_v51, %s4384_s28  ;;  %v8085_v51 = vld [vmem:[#allocation62_spill] sm:$0xff] }
 0x1b5   : > { %1256 = vrot.lane.b32.xlu2 %v8080_v52, %s4384_s28  ;;  %v5317_v19 = vpop.permute.xlu0 %1104 }
 0x1b6   : > { %1254 = vrot.lane.b32.xlu1 %v8081_v30, %s4384_s28  ;;  %8082 = vst [vmem:[#allocation52_spill] sm:$0xff] %v5317_v19  ;;  %v563_v19 = vld [vmem:[#allocation2 + $0x38] sm:$0xff] }
 0x1b7   : > { %v5319_v20 = vpop.permute.xlu2 %1126 }
 0x1b8   : > { %8083 = vst [vmem:[#allocation58_spill] sm:$0xff] %v5319_v20  ;;  %v5321_v24 = vpop.permute.xlu1 %1106  ;;  %v5337_v20 = vld [vmem:[#allocation2 + $0x18a] sm:$0xff] }
 0x1bb   : > { %1258 = vrot.lane.b32.xlu0 %v8084_v56, %s4384_s28 }
 0x1bd   : > { %1262 = vrot.lane.b32.xlu2 %v5323_v47, %s4384_s28  ;;  %v5331_v52 = vpop.permute.xlu0 %1110 }
 0x1be   : > { %1260 = vrot.lane.b32.xlu1 %v8085_v51, %s4384_s28  ;;  %8086 = vst [vmem:[#allocation56_spill] sm:$0xff] %v5331_v52  ;;  %v648_v52 = vld [vmem:[#allocation2 + $0x13a] sm:$0xff] }
 0x1bf   : > { %v5333_v30 = vpop.permute.xlu2 %1132 }
 0x1c0   : > { %8087 = vst [vmem:[#allocation57_spill] sm:$0xff] %v5333_v30  ;;  %v5335_v21 = vpop.permute.xlu1 %1112  ;;  %v564_v30 = vld [vmem:[#allocation2 + $0x48] sm:$0xff] }
 0x1c1   : > { %8088 = vst [vmem:[#allocation62_spill] sm:$0xff] %v5335_v21  ;;  %v620_v21 = vld [vmem:[#allocation2 + $0x169] sm:$0xff] }
 0x1c3   : > { %1264 = vrot.lane.b32.xlu0 %v5337_v20, %s4384_s28 }
 0x1c5   : > { %1332 = vrot.lane.b32.xlu2 %v563_v19, %s4385_s29  ;;  %v5343_v56 = vpop.permute.xlu0 %1116 }
 0x1c6   : > { %1330 = vrot.lane.b32.xlu1 %v562_v58, %s4385_s29  ;;  %8089 = vst [vmem:[#allocation145_spill] sm:$0xff] %v5343_v56  ;;  %v596_v56 = vld [vmem:[#allocation2 + $0x49] sm:$0xff] }
 0x1c7   : > { %v5345_v51 = vpop.permute.xlu2 %1202 }
 0x1c8   : > { %v5347_v60 = vpop.permute.xlu1 %1118 }
 0x1c9   : > { %8090 = vst [vmem:[#allocation146_spill] sm:$0xff] %v5347_v60  ;;  %v8106_v60 = vld [vmem:[#allocation89_spill] sm:$0xff] }
 0x1cb   : > { %1334 = vrot.lane.b32.xlu0 %v564_v30, %s4385_s29 }
 0x1cd   : > { %1338 = vrot.lane.b32.xlu2 %v566_v12, %s4385_s29  ;;  %v5352_v17 = vpop.permute.xlu0 %1122 }
 0x1ce   : > { %1336 = vrot.lane.b32.xlu1 %v565_v34, %s4385_s29  ;;  %8091 = vst [vmem:[#allocation147_spill] sm:$0xff] %v5352_v17  ;;  %v572_v17 = vld [vmem:[#allocation2 + $0xa8] sm:$0xff] }
 0x1cf   : > { %v5354_v19 = vpop.permute.xlu2 %1208 }
 0x1d0   : > { %v5356_v58 = vpop.permute.xlu1 %1124 }
 0x1d1   : > { %8092 = vst [vmem:[#allocation148_spill] sm:$0xff] %v5356_v58  ;;  %v8096_v58 = vld [vmem:[#allocation76_spill] sm:$0xff] }
 0x1d3   : > { %1340 = vrot.lane.b32.xlu0 %v567_v54, %s4385_s29 }
 0x1d5   : > { %1344 = vrot.lane.b32.xlu2 %v569_v3, %s4385_s29  ;;  %v5362_v30 = vpop.permute.xlu0 %1128 }
 0x1d6   : > { %1342 = vrot.lane.b32.xlu1 %v4944_v42, %s4385_s29  ;;  %8093 = vst [vmem:[#allocation149_spill] sm:$0xff] %v5362_v30  ;;  %v575_v30 = vld [vmem:[#allocation2 + $0xc8] sm:$0xff] }
 0x1d7   : > { %v5364_v12 = vpop.permute.xlu2 %1214 }
 0x1d8   : > { %v5366_v34 = vpop.permute.xlu1 %1130 }
 0x1d9   : > { %8094 = vst [vmem:[#allocation150_spill] sm:$0xff] %v5366_v34  ;;  %v8101_v34 = vld [vmem:[#allocation82_spill] sm:$0xff] }
 0x1db   : > { %1346 = vrot.lane.b32.xlu0 %v8095_v29, %s4385_s29 }
 0x1dd   : > { %1350 = vrot.lane.b32.xlu2 %v572_v17, %s4385_s29  ;;  %v5373_v54 = vpop.permute.xlu0 %1134 }
 0x1de   : > { %1348 = vrot.lane.b32.xlu1 %v8096_v58, %s4385_s29  ;;  %8097 = vst [vmem:[#allocation72_spill] sm:$0xff] %v5373_v54  ;;  %v578_v54 = vld [vmem:[#allocation2 + $0xf0] sm:$0xff] }
 0x1df   : > { %v5375_v3 = vpop.permute.xlu2 %1220 }
 0x1e0   : > { %8098 = vst [vmem:[#allocation76_spill] sm:$0xff] %v5375_v3  ;;  %v5377_v42 = vpop.permute.xlu1 %1136  ;;  %v618_v3 = vld [vmem:[#allocation2 + $0x151] sm:$0xff] }
 0x1e1   : > { %8099 = vst [vmem:[#allocation151_spill] sm:$0xff] %v5377_v42  ;;  %v313_v42 = vld [vmem:[#allocation2 + $0x19a] sm:$0x1] }
 0x1e2   : > { %332 = vst.msk [vmem:[#allocation2 + $0x198] sm:$0x1] %vm314_vm1, %v313_v42  ;;  %v584_v42 = vld [vmem:[#allocation2 + $0x138] sm:$0xff] }
 0x1e3   : > { %1352 = vrot.lane.b32.xlu0 %v8100_v25, %s4385_s29  ;;  %v8104_v25 = vld [vmem:[#allocation88_spill] sm:$0xff] }
 0x1e5   : > { %1356 = vrot.lane.b32.xlu2 %v575_v30, %s4385_s29  ;;  %v5384_v29 = vpop.permute.xlu0 %1204 }
 0x1e6   : > { %1354 = vrot.lane.b32.xlu1 %v8101_v34, %s4385_s29 }
 0x1e7   : > { %v5386_v17 = vpop.permute.xlu2 %1226 }
 0x1e8   : > { %8102 = vst [vmem:[#allocation77_spill] sm:$0xff] %v5386_v17  ;;  %v5388_v58 = vpop.permute.xlu1 %1206  ;;  %v581_v17 = vld [vmem:[#allocation2 + $0x110] sm:$0xff] }
 0x1eb   : > { %1358 = vrot.lane.b32.xlu0 %v8103_v39, %s4385_s29  ;;  %v8107_v39 = vld [vmem:[#allocation93_spill] sm:$0xff] }
 0x1ed   : > { %1362 = vrot.lane.b32.xlu2 %v578_v54, %s4385_s29  ;;  %v5395_v30 = vpop.permute.xlu0 %1210 }
 0x1ee   : > { %1360 = vrot.lane.b32.xlu1 %v8104_v25, %s4385_s29 }
 0x1ef   : > { %v5398_v34 = vpop.permute.xlu2 %1232 }
 0x1f0   : > { %8105 = vst [vmem:[#allocation82_spill] sm:$0xff] %v5398_v34  ;;  %v5400_v4 = vpop.permute.xlu1 %1212  ;;  %v8110_v34 = vld [vmem:[#allocation94_spill] sm:$0xff] }
 0x1f3   : > { %1364 = vrot.lane.b32.xlu0 %v8106_v60, %s4385_s29 }
 0x1f5   : > { %1368 = vrot.lane.b32.xlu2 %v581_v17, %s4385_s29  ;;  %v5407_v54 = vpop.permute.xlu0 %1216 }
 0x1f6   : > { %1366 = vrot.lane.b32.xlu1 %v8107_v39, %s4385_s29 }
 0x1f7   : > { %v5409_v25 = vpop.permute.xlu2 %1238 }
 0x1f8   : > { %8108 = vst [vmem:[#allocation83_spill] sm:$0xff] %v5409_v25  ;;  %v5411_v57 = vpop.permute.xlu1 %1218 }
 0x1f9   : > { %8109 = vst [vmem:[#allocation88_spill] sm:$0xff] %v5411_v57 }
 0x1fb   : > { %1370 = vrot.lane.b32.xlu0 %v8110_v34, %s4385_s29 }
 0x1fd   : > { %1374 = vrot.lane.b32.xlu2 %v584_v42, %s4385_s29  ;;  %v5418_v60 = vpop.permute.xlu0 %1222 }
 0x1fe   : > { %1372 = vrot.lane.b32.xlu1 %v8111_v53, %s4385_s29  ;;  %8112 = vst [vmem:[#allocation89_spill] sm:$0xff] %v5418_v60  ;;  %v604_v60 = vld [vmem:[#allocation2 + $0xa9] sm:$0xff] }
 0x1ff   : > { %v5420_v17 = vpop.permute.xlu2 %1244 }
 0x200   : > { %8113 = vst [vmem:[#allocation93_spill] sm:$0xff] %v5420_v17  ;;  %v5422_v39 = vpop.permute.xlu1 %1224  ;;  %v592_v17 = vld [vmem:[#allocation2 + $0x198] sm:$0xff] }
 0x201   : > { %8114 = vst [vmem:[#allocation94_spill] sm:$0xff] %v5422_v39  ;;  %v8119_v39 = vld [vmem:[#allocation107_spill] sm:$0xff] }
 0x203   : > { %1376 = vrot.lane.b32.xlu0 %v8115_v46, %s4385_s29 }
 0x205   : > { %1380 = vrot.lane.b32.xlu2 %v587_v55, %s4385_s29  ;;  %v5429_v34 = vpop.permute.xlu0 %1228 }
 0x206   : > { %1378 = vrot.lane.b32.xlu1 %v5045_v18, %s4385_s29  ;;  %8116 = vst [vmem:[#allocation98_spill] sm:$0xff] %v5429_v34  ;;  %v593_v34 = vld [vmem:[#allocation2 + $0x1a0] sm:$0xff] }
 0x207   : > { %v5431_v42 = vpop.permute.xlu2 %1250 }
 0x208   : > { %8117 = vst [vmem:[#allocation99_spill] sm:$0xff] %v5431_v42  ;;  %v5433_v53 = vpop.permute.xlu1 %1230  ;;  %v8121_v42 = vld [vmem:[#allocation106_spill] sm:$0xff] }
 0x209   : > { %8118 = vst [vmem:[#allocation152_spill] sm:$0xff] %v5433_v53  ;;  %v594_v53 = vld [vmem:[#allocation2 + $0x31] sm:$0xff] }
 0x20b   : > { %1382 = vrot.lane.b32.xlu0 %v5047_v22, %s4385_s29 }
 0x20d   : > { %1386 = vrot.lane.b32.xlu2 %v5064_v6, %s4385_s29  ;;  %v5441_v46 = vpop.permute.xlu0 %1234 }
 0x20e   : > { %1384 = vrot.lane.b32.xlu1 %v8119_v39, %s4385_s29 }
 0x20f   : > { %v5443_v55 = vpop.permute.xlu2 %1256 }
 0x210   : > { %8120 = vst [vmem:[#allocation107_spill] sm:$0xff] %v5443_v55  ;;  %v5445_v18 = vpop.permute.xlu1 %1236  ;;  %v595_v55 = vld [vmem:[#allocation2 + $0x39] sm:$0xff] }
 0x213   : > { %1388 = vrot.lane.b32.xlu0 %v8121_v42, %s4385_s29 }
 0x215   : > { %1392 = vrot.lane.b32.xlu2 %v593_v34, %s4385_s29  ;;  %v5451_v22 = vpop.permute.xlu0 %1240 }
 0x216   : > { %1390 = vrot.lane.b32.xlu1 %v592_v17, %s4385_s29  ;;  %8122 = vst [vmem:[#allocation106_spill] sm:$0xff] %v5451_v22  ;;  %v616_v22 = vld [vmem:[#allocation2 + $0x139] sm:$0xff] }
 0x217   : > { %v5453_v6 = vpop.permute.xlu2 %1262 }
 0x218   : > { %8123 = vst [vmem:[#allocation153_spill] sm:$0xff] %v5453_v6  ;;  %v5455_v39 = vpop.permute.xlu1 %1242  ;;  %v599_v6 = vld [vmem:[#allocation2 + $0x69] sm:$0xff] }
 0x219   : > { %8124 = vst [vmem:[#allocation154_spill] sm:$0xff] %v5455_v39  ;;  %v601_v39 = vld [vmem:[#allocation2 + $0x81] sm:$0xff] }
 0x21b   : > { %1458 = vrot.lane.b32.xlu0 %v594_v53, %s4386_s30 }
 0x21d   : > { %1462 = vrot.lane.b32.xlu2 %v596_v56, %s4386_s30  ;;  %v5460_v42 = vpop.permute.xlu0 %1246 }
 0x21e   : > { %1460 = vrot.lane.b32.xlu1 %v595_v55, %s4386_s30  ;;  %8125 = vst [vmem:[#allocation155_spill] sm:$0xff] %v5460_v42  ;;  %v600_v42 = vld [vmem:[#allocation2 + $0x79] sm:$0xff] }
 0x21f   : > { %v5462_v34 = vpop.permute.xlu2 %1332 }
 0x220   : > { %v5464_v17 = vpop.permute.xlu1 %1248 }
 0x221   : > { %8126 = vst [vmem:[#allocation156_spill] sm:$0xff] %v5464_v17  ;;  %v605_v17 = vld [vmem:[#allocation2 + $0xb1] sm:$0xff] }
 0x223   : > { %1464 = vrot.lane.b32.xlu0 %v597_v35, %s4386_s30 }
 0x225   : > { %1468 = vrot.lane.b32.xlu2 %v599_v6, %s4386_s30  ;;  %v5469_v53 = vpop.permute.xlu0 %1252 }
 0x226   : > { %1466 = vrot.lane.b32.xlu1 %v598_v62, %s4386_s30  ;;  %8127 = vst [vmem:[#allocation157_spill] sm:$0xff] %v5469_v53  ;;  %v603_v53 = vld [vmem:[#allocation2 + $0x99] sm:$0xff] }
 0x227   : > { %v5471_v56 = vpop.permute.xlu2 %1338 }
 0x228   : > { %v5473_v55 = vpop.permute.xlu1 %1254 }
 0x229   : > { %8128 = vst [vmem:[#allocation158_spill] sm:$0xff] %v5473_v55  ;;  %v608_v55 = vld [vmem:[#allocation2 + $0xd9] sm:$0xff] }
 0x22b   : > { %1470 = vrot.lane.b32.xlu0 %v600_v42, %s4386_s30 }
 0x22d   : > { %1474 = vrot.lane.b32.xlu2 %v602_v49, %s4386_s30  ;;  %v5478_v35 = vpop.permute.xlu0 %1258 }
 0x22e   : > { %1472 = vrot.lane.b32.xlu1 %v601_v39, %s4386_s30  ;;  %8129 = vst [vmem:[#allocation159_spill] sm:$0xff] %v5478_v35  ;;  %v606_v35 = vld [vmem:[#allocation2 + $0xc1] sm:$0xff] }
 0x22f   : > { %v5480_v6 = vpop.permute.xlu2 %1344 }
 0x230   : > { %v5482_v62 = vpop.permute.xlu1 %1260 }
 0x231   : > { %8130 = vst [vmem:[#allocation160_spill] sm:$0xff] %v5482_v62  ;;  %v611_v62 = vld [vmem:[#allocation2 + $0xf9] sm:$0xff] }
 0x233   : > { %1476 = vrot.lane.b32.xlu0 %v603_v53, %s4386_s30 }
 0x235   : > { %1480 = vrot.lane.b32.xlu2 %v605_v17, %s4386_s30  ;;  %v5487_v42 = vpop.permute.xlu0 %1264 }
 0x236   : > { %1478 = vrot.lane.b32.xlu1 %v604_v60, %s4386_s30  ;;  %8131 = vst [vmem:[#allocation161_spill] sm:$0xff] %v5487_v42  ;;  %v609_v42 = vld [vmem:[#allocation2 + $0xe1] sm:$0xff] }
 0x237   : > { %v5489_v49 = vpop.permute.xlu2 %1350 }
 0x238   : > { %8132 = vst [vmem:[#allocation162_spill] sm:$0xff] %v5489_v49  ;;  %v5491_v39 = vpop.permute.xlu1 %1330  ;;  %v610_v49 = vld [vmem:[#allocation2 + $0xf1] sm:$0xff] }
 0x23b   : > { %1482 = vrot.lane.b32.xlu0 %v606_v35, %s4386_s30 }
 0x23d   : > { %1486 = vrot.lane.b32.xlu2 %v608_v55, %s4386_s30  ;;  %v5496_v53 = vpop.permute.xlu0 %1334 }
 0x23e   : > { %1484 = vrot.lane.b32.xlu1 %v607_v2, %s4386_s30 }
 0x23f   : > { %v5498_v17 = vpop.permute.xlu2 %1356 }
 0x240   : > { %8133 = vst [vmem:[#allocation163_spill] sm:$0xff] %v5498_v17  ;;  %v5500_v60 = vpop.permute.xlu1 %1336  ;;  %v613_v17 = vld [vmem:[#allocation2 + $0x111] sm:$0xff] }
 0x243   : > { %1488 = vrot.lane.b32.xlu0 %v609_v42, %s4386_s30 }
 0x245   : > { %1492 = vrot.lane.b32.xlu2 %v611_v62, %s4386_s30  ;;  %v5505_v35 = vpop.permute.xlu0 %1340 }
 0x246   : > { %1490 = vrot.lane.b32.xlu1 %v610_v49, %s4386_s30 }
 0x247   : > { %v5507_v55 = vpop.permute.xlu2 %1362 }
 0x248   : > { %v5509_v2 = vpop.permute.xlu1 %1342 }
 0x24b   : > { %1494 = vrot.lane.b32.xlu0 %v612_v1, %s4386_s30 }
 0x24d   : > { %1498 = vrot.lane.b32.xlu2 %v614_v8, %s4386_s30  ;;  %v5514_v42 = vpop.permute.xlu0 %1346 }
 0x24e   : > { %1496 = vrot.lane.b32.xlu1 %v613_v17, %s4386_s30  ;;  %8134 = vst [vmem:[#allocation164_spill] sm:$0xff] %v5514_v42  ;;  %v647_v42 = vld [vmem:[#allocation2 + $0x12a] sm:$0xff] }
 0x24f   : > { %v5516_v62 = vpop.permute.xlu2 %1368 }
 0x250   : > { %8135 = vst [vmem:[#allocation165_spill] sm:$0xff] %v5516_v62  ;;  %v5518_v49 = vpop.permute.xlu1 %1348  ;;  %v619_v62 = vld [vmem:[#allocation2 + $0x159] sm:$0xff] }
 0x251   : > { %8136 = vst [vmem:[#allocation166_spill] sm:$0xff] %v5518_v49  ;;  %v632_v49 = vld [vmem:[#allocation2 + $0x7a] sm:$0xff] }
 0x253   : > { %1500 = vrot.lane.b32.xlu0 %v615_v33, %s4386_s30 }
 0x255   : > { %1504 = vrot.lane.b32.xlu2 %v617_v7, %s4386_s30  ;;  %v5523_v1 = vpop.permute.xlu0 %1352 }
 0x256   : > { %1502 = vrot.lane.b32.xlu1 %v616_v22, %s4386_s30  ;;  %8137 = vst [vmem:[#allocation167_spill] sm:$0xff] %v5523_v1  ;;  %v621_v1 = vld [vmem:[#allocation2 + $0x171] sm:$0xff] }
 0x257   : > { %v5525_v8 = vpop.permute.xlu2 %1374 }
 0x258   : > { %8138 = vst [vmem:[#allocation168_spill] sm:$0xff] %v5525_v8  ;;  %v5527_v17 = vpop.permute.xlu1 %1354  ;;  %v628_v8 = vld [vmem:[#allocation2 + $0x4a] sm:$0xff] }
 0x259   : > { %8139 = vst [vmem:[#allocation169_spill] sm:$0xff] %v5527_v17  ;;  %v626_v17 = vld [vmem:[#allocation2 + $0x32] sm:$0xff] }
 0x25b   : > { %1506 = vrot.lane.b32.xlu0 %v618_v3, %s4386_s30 }
 0x25d   : > { %1510 = vrot.lane.b32.xlu2 %v620_v21, %s4386_s30  ;;  %v5532_v33 = vpop.permute.xlu0 %1358 }
 0x25e   : > { %1508 = vrot.lane.b32.xlu1 %v619_v62, %s4386_s30  ;;  %8140 = vst [vmem:[#allocation170_spill] sm:$0xff] %v5532_v33  ;;  %v624_v33 = vld [vmem:[#allocation2 + $0x199] sm:$0xff] }
 0x25f   : > { %v5534_v7 = vpop.permute.xlu2 %1380 }
 0x260   : > { %8141 = vst [vmem:[#allocation171_spill] sm:$0xff] %v5534_v7  ;;  %v5536_v22 = vpop.permute.xlu1 %1360  ;;  %v625_v7 = vld [vmem:[#allocation2 + $0x1a1] sm:$0xff] }
 0x261   : > { %8142 = vst [vmem:[#allocation172_spill] sm:$0xff] %v5536_v22  ;;  %v627_v22 = vld [vmem:[#allocation2 + $0x3a] sm:$0xff] }
 0x263   : > { %1512 = vrot.lane.b32.xlu0 %v621_v1, %s4386_s30 }
 0x265   : > { %1516 = vrot.lane.b32.xlu2 %v5200_v9, %s4386_s30  ;;  %v5543_v3 = vpop.permute.xlu0 %1364 }
 0x266   : > { %1514 = vrot.lane.b32.xlu1 %v5198_v26, %s4386_s30 }
 0x267   : > { %v5545_v21 = vpop.permute.xlu2 %1386 }
 0x268   : > { %8143 = vst [vmem:[#allocation173_spill] sm:$0xff] %v5545_v21  ;;  %v5547_v62 = vpop.permute.xlu1 %1366  ;;  %v629_v21 = vld [vmem:[#allocation2 + $0x52] sm:$0xff] }
 0x269   : > { %8144 = vst [vmem:[#allocation174_spill] sm:$0xff] %v5547_v62 }
 0x26b   : > { %1518 = vrot.lane.b32.xlu0 %v624_v33, %s4386_s30 }
 0x26d   : > { %1586 = vrot.lane.b32.xlu2 %v626_v17, %s4387_s6  ;;  %v5552_v9 = vpop.permute.xlu0 %1370 }
 0x26e   : > { %1520 = vrot.lane.b32.xlu1 %v625_v7, %s4386_s30  ;;  %8145 = vst [vmem:[#allocation175_spill] sm:$0xff] %v5552_v9  ;;  %v630_v9 = vld [vmem:[#allocation2 + $0x62] sm:$0xff] }
 0x26f   : > { %v5554_v1 = vpop.permute.xlu2 %1392 }
 0x270   : > { %8146 = vst [vmem:[#allocation176_spill] sm:$0xff] %v5554_v1  ;;  %v5556_v26 = vpop.permute.xlu1 %1372  ;;  %v631_v1 = vld [vmem:[#allocation2 + $0x6a] sm:$0xff] }
 0x271   : > { %8147 = vst [vmem:[#allocation177_spill] sm:$0xff] %v5556_v26  ;;  %v635_v26 = vld [vmem:[#allocation2 + $0x9a] sm:$0xff] }
 0x273   : > { %1588 = vrot.lane.b32.xlu0 %v627_v22, %s4387_s6 }
 0x275   : > { %1592 = vrot.lane.b32.xlu2 %v629_v21, %s4387_s6  ;;  %v5561_v33 = vpop.permute.xlu0 %1376 }
 0x276   : > { %1590 = vrot.lane.b32.xlu1 %v628_v8, %s4387_s6  ;;  %8148 = vst [vmem:[#allocation178_spill] sm:$0xff] %v5561_v33  ;;  %v633_v33 = vld [vmem:[#allocation2 + $0x82] sm:$0xff] }
 0x277   : > { %v5563_v17 = vpop.permute.xlu2 %1462 }
 0x278   : > { %v5565_v7 = vpop.permute.xlu1 %1378 }
 0x279   : > { %8149 = vst [vmem:[#allocation179_spill] sm:$0xff] %v5565_v7  ;;  %v638_v7 = vld [vmem:[#allocation2 + $0xc2] sm:$0xff] }
 0x27b   : > { %1594 = vrot.lane.b32.xlu0 %v630_v9, %s4387_s6 }
 0x27d   : > { %1598 = vrot.lane.b32.xlu2 %v632_v49, %s4387_s6  ;;  %v5570_v22 = vpop.permute.xlu0 %1382 }
 0x27e   : > { %1596 = vrot.lane.b32.xlu1 %v631_v1, %s4387_s6  ;;  %8150 = vst [vmem:[#allocation180_spill] sm:$0xff] %v5570_v22  ;;  %v636_v22 = vld [vmem:[#allocation2 + $0xaa] sm:$0xff] }
 0x27f   : > { %v5572_v21 = vpop.permute.xlu2 %1468 }
 0x280   : > { %v5574_v8 = vpop.permute.xlu1 %1384 }
 0x281   : > { %8151 = vst [vmem:[#allocation181_spill] sm:$0xff] %v5574_v8  ;;  %v641_v8 = vld [vmem:[#allocation2 + $0xe2] sm:$0xff] }
 0x283   : > { %1600 = vrot.lane.b32.xlu0 %v633_v33, %s4387_s6 }
 0x285   : > { %1604 = vrot.lane.b32.xlu2 %v635_v26, %s4387_s6  ;;  %v5579_v9 = vpop.permute.xlu0 %1388 }
 0x286   : > { %1602 = vrot.lane.b32.xlu1 %v634_v0, %s4387_s6  ;;  %8152 = vst [vmem:[#allocation182_spill] sm:$0xff] %v5579_v9  ;;  %v639_v9 = vld [vmem:[#allocation2 + $0xca] sm:$0xff] }
 0x287   : > { %v5581_v49 = vpop.permute.xlu2 %1474 }
 0x288   : > { %8153 = vst [vmem:[#allocation183_spill] sm:$0xff] %v5581_v49  ;;  %v5583_v1 = vpop.permute.xlu1 %1390 }
 0x289   : > { %8154 = vst [vmem:[#allocation184_spill] sm:$0xff] %v5583_v1  ;;  %v1953_v1 = vld [vmem:[%s7851_s1 + $0x40] sm:$0xff] }
 0x28a   : > { %2062 = vmatpush.msra.mxu0 %v1953_v1  ;;  %4294 = vmatpush.msra.mxu2 %v1953_v1  ;;  %v1950_v1 = vld [vmem:[%s7851_s1 + $0x28] sm:$0xff] }
 0x28b   : > { %1606 = vrot.lane.b32.xlu0 %v636_v22, %s4387_s6 }
 0x28d   : > { %1610 = vrot.lane.b32.xlu2 %v638_v7, %s4387_s6  ;;  %v5588_v33 = vpop.permute.xlu0 %1458 }
 0x28e   : > { %1608 = vrot.lane.b32.xlu1 %v637_v48, %s4387_s6 }
 0x28f   : > { %v5590_v26 = vpop.permute.xlu2 %1480 }
 0x290   : > { %8155 = vst [vmem:[#allocation185_spill] sm:$0xff] %v5590_v26  ;;  %v5592_v0 = vpop.permute.xlu1 %1460  ;;  %v642_v26 = vld [vmem:[#allocation2 + $0xf2] sm:$0xff] }
 0x293   : > { %1612 = vrot.lane.b32.xlu0 %v639_v9, %s4387_s6  ;;  %v1952_v9 = vld [vmem:[%s7851_s1 + $0x38] sm:$0xff] }
 0x294   : > { %2063 = vmatpush.msra.mxu0 %v1952_v9  ;;  %4295 = vmatpush.msra.mxu2 %v1952_v9 }
 0x295   : > { %1616 = vrot.lane.b32.xlu2 %v641_v8, %s4387_s6  ;;  %v5597_v22 = vpop.permute.xlu0 %1464  ;;  %v644_v8 = vld [vmem:[#allocation2 + $0x10a] sm:$0xff] }
 0x296   : > { %1614 = vrot.lane.b32.xlu1 %v640_v50, %s4387_s6  ;;  %v1951_v50 = vld [vmem:[%s7851_s1 + $0x30] sm:$0xff] }
 0x297   : > { %v5599_v7 = vpop.permute.xlu2 %1486  ;;  %2064 = vmatpush.msra.mxu0 %v1951_v50  ;;  %4296 = vmatpush.msra.mxu2 %v1951_v50  ;;  %v646_v50 = vld [vmem:[#allocation2 + $0x122] sm:$0xff] }
 0x298   : > { %8156 = vst [vmem:[#allocation186_spill] sm:$0xff] %v5599_v7  ;;  %v5601_v48 = vpop.permute.xlu1 %1466  ;;  %v350_v7 = vld [vmem:[#allocation2 + $0x1a7] sm:$0x1] }
 0x299   : > { %368 = vst.msk [vmem:[#allocation2 + $0x1a9] sm:$0x1] %vm314_vm1, %v350_v7  ;;  %2065 = vmatpush.msra.mxu0 %v1950_v1  ;;  %4297 = vmatpush.msra.mxu2 %v1950_v1  ;;  %v1947_v7 = vld [vmem:[%s7851_s1 + $0x10] sm:$0xff]  ;;  %v1946_v1 = vld [vmem:[%s7851_s1 + $0x8] sm:$0xff] }
 0x29b   : > { %1618 = vrot.lane.b32.xlu0 %v642_v26, %s4387_s6  ;;  %v1949_v26 = vld [vmem:[%s7851_s1 + $0x20] sm:$0xff] }
 0x29c   : > { %2066 = vmatpush.msra.mxu0 %v1949_v26  ;;  %4298 = vmatpush.msra.mxu2 %v1949_v26 }
 0x29d   : > { %1622 = vrot.lane.b32.xlu2 %v644_v8, %s4387_s6  ;;  %v5615_v49 = vpop.permute.xlu0 %1470  ;;  %v1948_v8 = vld [vmem:[%s7851_s1 + $0x18] sm:$0xff] }
 0x29e   : > { %1620 = vrot.lane.b32.xlu1 %v643_v13, %s4387_s6  ;;  %v645_v13 = vld [vmem:[#allocation2 + $0x112] sm:$0xff]  ;;  %2067 = vmatpush.msra.mxu0 %v1948_v8 }
 0x29f   : > { %v5621_v62 = vpop.permute.xlu2 %1492  ;;  %4299 = vmatpush.msra.mxu2 %v1948_v8  ;;  %v650_v8 = vld [vmem:[#allocation2 + $0x152] sm:$0xff] }
 0x2a0   : > { %v5623_v9 = vpop.permute.xlu1 %1472  ;;  %2068 = vmatpush.msra.mxu0 %v1947_v7 }
 0x2a1   : > { %4300 = vmatpush.msra.mxu2 %v1947_v7 }
 0x2a2   : > { %2069 = vmatpush.msra.mxu0 %v1946_v1 }
 0x2a3   : > { %1624 = vrot.lane.b32.xlu0 %v645_v13, %s4387_s6  ;;  %v1945_v13 = vld [vmem:[%s7851_s1] sm:$0xff]  ;;  %4301 = vmatpush.msra.mxu2 %v1946_v1  ;;  %v652_v1 = vld [vmem:[#allocation2 + $0x16a] sm:$0xff] }
 0x2a4   : > { %2070 = vmatpush.msra.mxu0 %v1945_v13 }
 0x2a5   : > { %1628 = vrot.lane.b32.xlu2 %v647_v42, %s4387_s6  ;;  %v5640_v57 = vpop.permute.xlu0 %1476  ;;  %4302 = vmatpush.msra.mxu2 %v1945_v13  ;;  %v649_v42 = vld [vmem:[#allocation2 + $0x142] sm:$0xff] }
 0x2a6   : > { %1626 = vrot.lane.b32.xlu1 %v646_v50, %s4387_s6  ;;  %8157 = vst [vmem:[#allocation187_spill] sm:$0xff] %v5640_v57  ;;  %v653_v57 = vld [vmem:[#allocation2 + $0x172] sm:$0xff] }
 0x2a7   : > { %v5642_v25 = vpop.permute.xlu2 %1498 }
 0x2a8   : > { %8158 = vst [vmem:[#allocation188_spill] sm:$0xff] %v5642_v25  ;;  %v5644_v26 = vpop.permute.xlu1 %1478  ;;  %v651_v25 = vld [vmem:[#allocation2 + $0x15a] sm:$0xff] }
 0x2a9   : > { %8159 = vst [vmem:[#allocation189_spill] sm:$0xff] %v5644_v26 }
 0x2ab   : > { %1630 = vrot.lane.b32.xlu0 %v648_v52, %s4387_s6 }
 0x2ad   : > { %1634 = vrot.lane.b32.xlu2 %v650_v8, %s4387_s6  ;;  %v5652_v7 = vpop.permute.xlu0 %1482 }
 0x2ae   : > { %1632 = vrot.lane.b32.xlu1 %v649_v42, %s4387_s6  ;;  %8160 = vst [vmem:[#allocation190_spill] sm:$0xff] %v5652_v7  ;;  %v656_v42 = vld [vmem:[#allocation2 + $0x19a] sm:$0xff] }
 0x2af   : > { %v5654_v50 = vpop.permute.xlu2 %1504  ;;  %v8167_v7 = vld [vmem:[#allocation64_spill] sm:$0xff] }
 0x2b0   : > { %8161 = vst [vmem:[#allocation191_spill] sm:$0xff] %v5654_v50  ;;  %v5656_v26 = vpop.permute.xlu1 %1484  ;;  %v657_v50 = vld [vmem:[#allocation2 + $0x1a2] sm:$0xff] }
 0x2b1   : > { %8162 = vst [vmem:[#allocation192_spill] sm:$0xff] %v5656_v26  ;;  %v369_v26 = vld [vmem:[#allocation2] sm:$0xff] }
 0x2b3   : > { %1636 = vrot.lane.b32.xlu0 %v651_v25, %s4387_s6 }
 0x2b5   : > { %1640 = vrot.lane.b32.xlu2 %v653_v57, %s4387_s6  ;;  %v5661_v52 = vpop.permute.xlu0 %1488 }
 0x2b6   : > { %1638 = vrot.lane.b32.xlu1 %v652_v1, %s4387_s6  ;;  %8163 = vst [vmem:[#allocation193_spill] sm:$0xff] %v5661_v52 }
 0x2b7   : > { %v5663_v13 = vpop.permute.xlu2 %1510 }
 0x2b8   : > { %8164 = vst [vmem:[#allocation194_spill] sm:$0xff] %v5663_v13  ;;  %v5665_v8 = vpop.permute.xlu1 %1490  ;;  %v8166_v13 = vld [vmem:[#allocation36_spill] sm:$0xff] }
 0x2b9   : > { %v1682_v52 = vsel %vm258_vm0, %v369_v26, %v8166_v13 }
 0x2bb   : > { %1642 = vrot.lane.b32.xlu0 %v5323_v47, %s4387_s6  ;;  %v1715_v47 = vsel %vm1714_vm2, %v1682_v52, %v8167_v7 }
 0x2bd   : > { %1646 = vrot.lane.b32.xlu2 %v656_v42, %s4387_s6  ;;  %v5672_v25 = vpop.permute.xlu0 %1494  ;;  %v1748_v42 = vsel %vm1747_vm3, %v1715_v47, %v5124_v31 }
 0x2be   : > { %1644 = vrot.lane.b32.xlu1 %v5337_v20, %s4387_s6  ;;  %v1781_v20 = vsel %vm1780_vm5, %v1748_v42, %v5256_v15 }
 0x2bf   : > { %v5674_v57 = vpop.permute.xlu2 %1516 }
 0x2c0   : > { %8165 = vst [vmem:[#allocation195_spill] sm:$0xff] %v5674_v57  ;;  %v5676_v1 = vpop.permute.xlu1 %1496  ;;  %v1814_v57 = vsel %vm1813_vm4, %v1781_v20, %v5345_v51  ;;  %v8172_v20 = vld [vmem:[#allocation39_spill] sm:$0xff] }
 0x2c1   : > { %v1847_v26 = vsel %vm1846_vm6, %v1814_v57, %v5491_v39  ;;  %v370_v57 = vld [vmem:[#allocation2 + $0x8] sm:$0xff] }
 0x2c2   : > { %v1880_v31 = vsel %vm1879_vm8, %v1847_v26, %v5588_v33  ;;  %v1683_v33 = vsel %vm258_vm0, %v370_v57, %v8172_v20 }
 0x2c3   : > { %1648 = vrot.lane.b32.xlu0 %v657_v50, %s4387_s6 }
 0x2c5   : > { %v5691_v7 = vpop.permute.xlu0 %1500 }
 0x2c7   : > { %v1587_v52 = vpop.permute.xlu2 %1586 }
 0x2c8   : > { %v5695_v13 = vpop.permute.xlu1 %1502  ;;  %v1913_v15 = vsel %vm1912_vm7, %v1880_v31, %v1587_v52 }
 0x2c9   : > { %8168 = vst [vmem:[#allocation36_spill] sm:$0xff] %v5695_v13  ;;  %4226 = vmatmul.msk.f32.vlgmr.msra.gmra.mxu0 %vm1958_vm9, %v1913_v15  ;;  %v8174_v13 = vld [vmem:[#allocation79_spill] sm:$0xff] }
 0x2ca   : > { %v1716_v31 = vsel %vm1714_vm2, %v1683_v33, %v8174_v13  ;;  %v8175_v13 = vld [vmem:[#allocation38_spill] sm:$0xff] }
 0x2cb   : > { %v1749_v52 = vsel %vm1747_vm3, %v1716_v31, %v5086_v61 }
 0x2cc   : > { %v1782_v15 = vsel %vm1780_vm5, %v1749_v52, %v5260_v40  ;;  %v8176_v40 = vld [vmem:[#allocation81_spill] sm:$0xff] }
 0x2cd   : > { %v5699_v51 = vpop.permute.xlu0 %1506 }
 0x2d0   : > { %v5701_v50 = vpop.permute.xlu1 %1508 }
 0x2d5   : > { %v5703_v47 = vpop.permute.xlu0 %1512 }
 0x2d6   : > { %8169 = vst [vmem:[#allocation64_spill] sm:$0xff] %v5703_v47  ;;  %v4330_v47 = vld [vmem:[#allocation2 + $0x18] sm:$0xff] }
 0x2d7   : > { %v1684_v33 = vsel %vm258_vm0, %v4330_v47, %v8175_v13 }
 0x2d8   : > { %v5705_v39 = vpop.permute.xlu1 %1514  ;;  %v1717_v31 = vsel %vm1714_vm2, %v1684_v33, %v8176_v40 }
 0x2d9   : > { %8170 = vst [vmem:[#allocation196_spill] sm:$0xff] %v5705_v39  ;;  %v1815_v39 = vsel %vm1813_vm4, %v1782_v15, %v5384_v29  ;;  %v1750_v29 = vsel %vm1747_vm3, %v1717_v31, %v5132_v32  ;;  %v4331_v15 = vld [vmem:[#allocation2 + $0x20] sm:$0xff] }
 0x2dd   : > { %v5707_v42 = vpop.permute.xlu0 %1518 }
 0x2de   : > { %8171 = vst [vmem:[#allocation197_spill] sm:$0xff] %v5707_v42  ;;  %v1848_v42 = vsel %vm1846_vm6, %v1815_v39, %v5462_v34  ;;  %v1593_v34 = vpop.permute.xlu2 %1592 }
 0x2df   : > { %v1881_v57 = vsel %vm1879_vm8, %v1848_v42, %v5592_v0  ;;  %v1783_v0 = vsel %vm1780_vm5, %v1750_v29, %v5222_v16  ;;  %v8178_v16 = vld [vmem:[#allocation67_spill] sm:$0xff] }
 0x2e0   : > { %v5711_v26 = vpop.permute.xlu1 %1520  ;;  %v1816_v39 = vsel %vm1813_vm4, %v1783_v0, %v5388_v58  ;;  %v4332_v0 = vld [vmem:[#allocation2 + $0x30] sm:$0xff] }
 0x2e1   : > { %8173 = vst [vmem:[#allocation39_spill] sm:$0xff] %v5711_v26  ;;  %v1849_v42 = vsel %vm1846_vm6, %v1816_v39, %v5496_v53  ;;  %v8179_v39 = vld [vmem:[#allocation33_spill] sm:$0xff] }
 0x2e2   : > { %v1882_v47 = vsel %vm1879_vm8, %v1849_v42, %v5563_v17 }
 0x2e5   : > { %v1589_v20 = vpop.permute.xlu0 %1588 }
 0x2e6   : > { %v1914_v26 = vsel %vm1912_vm7, %v1881_v57, %v1589_v20  ;;  %v8177_v57 = vld [vmem:[#allocation41_spill] sm:$0xff]  ;;  %v1599_v33 = vpop.permute.xlu2 %1598 }
 0x2e7   : > { %4227 = vmatmul.msk.f32.gmra.mxu0 %vm1958_vm9, %v1914_v26  ;;  %v1685_v32 = vsel %vm258_vm0, %v4331_v15, %v8177_v57 }
 0x2e8   : > { %v1591_v61 = vpop.permute.xlu1 %1590  ;;  %v1718_v13 = vsel %vm1714_vm2, %v1685_v32, %v8178_v16  ;;  %v4333_v16 = vld [vmem:[#allocation2 + $0x38] sm:$0xff] }
 0x2e9   : > { %v1915_v52 = vsel %vm1912_vm7, %v1882_v47, %v1591_v61  ;;  %v1751_v58 = vsel %vm1747_vm3, %v1718_v13, %v5136_v37  ;;  %v1686_v37 = vsel %vm258_vm0, %v4332_v0, %v8179_v39  ;;  %v8183_v0 = vld [vmem:[#allocation42_spill] sm:$0xff]  ;;  %v4335_v39 = vld [vmem:[#allocation2 + $0xc0] sm:$0xff] }
 0x2ea   : > { %v1784_v53 = vsel %vm1780_vm5, %v1751_v58, %v5268_v11  ;;  %v8180_v11 = vld [vmem:[#allocation85_spill] sm:$0xff] }
 0x2eb   : > { %v1817_v17 = vsel %vm1813_vm4, %v1784_v53, %v5354_v19  ;;  %v1719_v19 = vsel %vm1714_vm2, %v1686_v37, %v8180_v11  ;;  %v8184_v37 = vld [vmem:[#allocation55_spill] sm:$0xff] }
 0x2ec   : > { %v1850_v61 = vsel %vm1846_vm6, %v1817_v17, %v5500_v60  ;;  %v1752_v60 = vsel %vm1747_vm3, %v1719_v19, %v5098_v10  ;;  %v8181_v10 = vld [vmem:[#allocation34_spill] sm:$0xff] }
 0x2ed   : > { %v1595_v26 = vpop.permute.xlu0 %1594  ;;  %v1883_v40 = vsel %vm1879_vm8, %v1850_v61, %v5597_v22  ;;  %v1785_v22 = vsel %vm1780_vm5, %v1752_v60, %v5272_v36  ;;  %v1687_v13 = vsel %vm258_vm0, %v4333_v16, %v8181_v10 }
 0x2ee   : > { %v1916_v29 = vsel %vm1912_vm7, %v1883_v40, %v1593_v34  ;;  %v1818_v34 = vsel %vm1813_vm4, %v1785_v22, %v5395_v30  ;;  %v5777_v15 = vpop.permute.xlu2 %1604  ;;  %v8182_v30 = vld [vmem:[#allocation87_spill] sm:$0xff] }
 0x2ef   : > { %4228 = vmatmul.msk.f32.gmra.mxu0 %vm1958_vm9, %v1915_v52  ;;  %v1851_v47 = vsel %vm1846_vm6, %v1818_v34, %v5471_v56  ;;  %v1720_v56 = vsel %vm1714_vm2, %v1687_v13, %v8182_v30  ;;  %v4336_v13 = vld [vmem:[#allocation2 + $0xc8] sm:$0xff]  ;;  %v8187_v30 = vld [vmem:[#allocation43_spill] sm:$0xff] }
 0x2f0   : > { %v1597_v20 = vpop.permute.xlu1 %1596  ;;  %v1884_v52 = vsel %vm1879_vm8, %v1851_v47, %v5601_v48  ;;  %v1753_v48 = vsel %vm1747_vm3, %v1720_v56, %v5144_v38  ;;  %v4337_v56 = vld [vmem:[#allocation2 + $0x50] sm:$0xff] }
 0x2f1   : > { %v1917_v32 = vsel %vm1912_vm7, %v1884_v52, %v1595_v26  ;;  %v1786_v58 = vsel %vm1780_vm5, %v1753_v48, %v5234_v14  ;;  %v1698_v14 = vsel %vm258_vm0, %v4335_v39, %v8184_v37  ;;  %v4338_v37 = vld [vmem:[#allocation2 + $0x60] sm:$0xff] }
 0x2f2   : > { %v1819_v26 = vsel %vm1813_vm4, %v1786_v58, %v5400_v4  ;;  %v8185_v4 = vld [vmem:[#allocation70_spill] sm:$0xff] }
 0x2f3   : > { %v1852_v53 = vsel %vm1846_vm6, %v1819_v26, %v5505_v35 }
 0x2f4   : > { %v1885_v17 = vsel %vm1879_vm8, %v1852_v53, %v5572_v21  ;;  %v8186_v21 = vld [vmem:[#allocation103_spill] sm:$0xff] }
 0x2f5   : > { %v5757_v31 = vpop.permute.xlu0 %1600  ;;  %v1918_v40 = vsel %vm1912_vm7, %v1885_v17, %v1597_v20  ;;  %v1731_v19 = vsel %vm1714_vm2, %v1698_v14, %v8186_v21 }
 0x2f6   : > { %v5806_v11 = vpop.permute.xlu2 %1610  ;;  %v1764_v20 = vsel %vm1747_vm3, %v1731_v19, %v5146_v45 }
 0x2f7   : > { %4229 = vmatmul.msk.f32.gmra.mxu0 %vm1958_vm9, %v1916_v29  ;;  %v4334_v29 = vld [vmem:[#allocation2 + $0x48] sm:$0xff]  ;;  %v1797_v47 = vsel %vm1780_vm5, %v1764_v20, %v5321_v24 }
 0x2f8   : > { %v5762_v42 = vpop.permute.xlu1 %1602  ;;  %v1688_v38 = vsel %vm258_vm0, %v4334_v29, %v8183_v0 }
 0x2f9   : > { %v1721_v35 = vsel %vm1714_vm2, %v1688_v38, %v8185_v4  ;;  %v4339_v4 = vld [vmem:[#allocation2 + $0xd8] sm:$0xff] }
 0x2fa   : > { %v1754_v60 = vsel %vm1747_vm3, %v1721_v35, %v5148_v43 }
 0x2fb   : > { %v1787_v34 = vsel %vm1780_vm5, %v1754_v60, %v5280_v5  ;;  %v8195_v60 = vld [vmem:[#allocation56_spill] sm:$0xff] }
 0x2fc   : > { %v1820_v52 = vsel %vm1813_vm4, %v1787_v34, %v5364_v12 }
 0x2fd   : > { %v5779_v57 = vpop.permute.xlu0 %1606  ;;  %v1853_v43 = vsel %vm1846_vm6, %v1820_v52, %v5509_v2  ;;  %v8189_v2 = vld [vmem:[#allocation90_spill] sm:$0xff] }
 0x2fe   : > { %v1886_v16 = vsel %vm1879_vm8, %v1853_v43, %v5615_v49  ;;  %v5851_v53 = vpop.permute.xlu2 %1616 }
 0x2ff   : > { %4230 = vmatmul.msk.f32.gmra.mxu0 %vm1958_vm9, %v1917_v32  ;;  %v1830_v32 = vsel %vm1813_vm4, %v1797_v47, %v5441_v46  ;;  %v1919_v24 = vsel %vm1912_vm7, %v1886_v16, %v1599_v33  ;;  %v1699_v46 = vsel %vm258_vm0, %v4336_v13, %v8187_v30  ;;  %v8196_v47 = vld [vmem:[#allocation83_spill] sm:$0xff]  ;;  %v8198_v16 = vld [vmem:[#allocation164_spill] sm:$0xff]  ;;  %v4340_v30 = vld [vmem:[#allocation2 + $0x68] sm:$0xff] }
 0x300   : > { %v5784_v36 = vpop.permute.xlu1 %1608  ;;  %v1863_v45 = vsel %vm1846_vm6, %v1830_v32, %v5507_v55  ;;  %v8188_v55 = vld [vmem:[#allocation44_spill] sm:$0xff] }
 0x301   : > { %v1896_v5 = vsel %vm1879_vm8, %v1863_v45, %v5665_v8  ;;  %v1689_v48 = vsel %vm258_vm0, %v4337_v56, %v8188_v55  ;;  %v8190_v8 = vld [vmem:[#allocation105_spill] sm:$0xff]  ;;  %v8197_v32 = vld [vmem:[#allocation88_spill] sm:$0xff] }
 0x302   : > { %v1722_v49 = vsel %vm1714_vm2, %v1689_v48, %v8189_v2  ;;  %v1732_v33 = vsel %vm1714_vm2, %v1699_v46, %v8190_v8  ;;  %v8201_v46 = vld [vmem:[#allocation45_spill] sm:$0xff]  ;;  %v8204_v8 = vld [vmem:[#allocation108_spill] sm:$0xff] }
 0x303   : > { %v1755_v58 = vsel %vm1747_vm3, %v1722_v49, %v5110_v27  ;;  %v1765_v26 = vsel %vm1747_vm3, %v1732_v33, %v5192_v59  ;;  %v1691_v56 = vsel %vm258_vm0, %v4340_v30, %v8201_v46  ;;  %v4341_v55 = vld [vmem:[#allocation2 + $0xe0] sm:$0xff]  ;;  %v8203_v49 = vld [vmem:[#allocation74_spill] sm:$0xff]  ;;  %v8205_v33 = vld [vmem:[#allocation120_spill] sm:$0xff] }
 0x304   : > { %v1798_v17 = vsel %vm1780_vm5, %v1765_v26, %v5283_v23  ;;  %v8202_v48 = vld [vmem:[#allocation61_spill] sm:$0xff]  ;;  %v8224_v30 = vld [vmem:[#allocation162_spill] sm:$0xff] }
 0x305   : > { %v5799_v61 = vpop.permute.xlu0 %1612  ;;  %v1831_v0 = vsel %vm1813_vm4, %v1798_v17, %v5445_v18  ;;  %v8191_v18 = vld [vmem:[#allocation35_spill] sm:$0xff]  ;;  %v1701_v2 = vsel %vm258_vm0, %v4341_v55, %v8202_v48  ;;  %v8206_v26 = vld [vmem:[#allocation121_spill] sm:$0xff]  ;;  %v8226_v48 = vld [vmem:[#allocation188_spill] sm:$0xff] }
 0x306   : > { %v1864_v59 = vsel %vm1846_vm6, %v1831_v0, %v5543_v3  ;;  %v1690_v14 = vsel %vm258_vm0, %v4338_v37, %v8191_v18  ;;  %v8193_v3 = vld [vmem:[#allocation91_spill] sm:$0xff]  ;;  %v1623_v43 = vpop.permute.xlu2 %1622  ;;  %v8208_v0 = vld [vmem:[#allocation62_spill] sm:$0xff] }
 0x307   : > { %4231 = vmatmul.msk.f32.gmra.mxu0 %vm1958_vm9, %v1918_v40  ;;  %v1788_v40 = vsel %vm1780_vm5, %v1755_v58, %v5285_v28  ;;  %v1897_v39 = vsel %vm1879_vm8, %v1864_v59, %v5621_v62  ;;  %v8212_v18 = vld [vmem:[#allocation166_spill] sm:$0xff] }
 0x308   : > { %v5817_v22 = vpop.permute.xlu1 %1614  ;;  %v1821_v29 = vsel %vm1813_vm4, %v1788_v40, %v5407_v54  ;;  %v8207_v40 = vld [vmem:[#allocation140_spill] sm:$0xff] }
 0x309   : > { %v1854_v27 = vsel %vm1846_vm6, %v1821_v29, %v5480_v6  ;;  %v8192_v6 = vld [vmem:[#allocation59_spill] sm:$0xff] }
 0x30a   : > { %v1887_v23 = vsel %vm1879_vm8, %v1854_v27, %v5623_v9  ;;  %v1700_v35 = vsel %vm258_vm0, %v4339_v4, %v8192_v6  ;;  %v8194_v9 = vld [vmem:[#allocation92_spill] sm:$0xff]  ;;  %v8213_v4 = vld [vmem:[#allocation187_spill] sm:$0xff] }
 0x30b   : > { %v1920_v28 = vsel %vm1912_vm7, %v1887_v23, %v5757_v31  ;;  %v1733_v62 = vsel %vm1714_vm2, %v1700_v35, %v8193_v3  ;;  %v1723_v31 = vsel %vm1714_vm2, %v1690_v14, %v8194_v9  ;;  %v8209_v27 = vld [vmem:[#allocation76_spill] sm:$0xff]  ;;  %v4342_v9 = vld [vmem:[#allocation2 + $0xf0] sm:$0xff] }
 0x30c   : > { %v1756_v21 = vsel %vm1747_vm3, %v1723_v31, %v5156_v44  ;;  %v1766_v19 = vsel %vm1747_vm3, %v1733_v62, %v5196_v63  ;;  %v8199_v44 = vld [vmem:[#allocation174_spill] sm:$0xff]  ;;  %v8200_v63 = vld [vmem:[#allocation183_spill] sm:$0xff] }
 0x30d   : > { %v1619_v10 = vpop.permute.xlu0 %1618  ;;  %v1789_v20 = vsel %vm1780_vm5, %v1756_v21, %v5246_v41  ;;  %v1799_v34 = vsel %vm1780_vm5, %v1766_v19, %v8195_v60  ;;  %v8214_v31 = vld [vmem:[#allocation46_spill] sm:$0xff]  ;;  %v4343_v19 = vld [vmem:[#allocation2 + $0x78] sm:$0xff] }
 0x30e   : > { %v1929_v12 = vsel %vm1912_vm7, %v1896_v5, %v1619_v10  ;;  %v1832_v52 = vsel %vm1813_vm4, %v1799_v34, %v8196_v47  ;;  %v1822_v45 = vsel %vm1813_vm4, %v1789_v20, %v8197_v32  ;;  %v1702_v21 = vsel %vm258_vm0, %v4342_v9, %v8214_v31  ;;  %v8215_v20 = vld [vmem:[#allocation47_spill] sm:$0xff]  ;;  %v8217_v47 = vld [vmem:[#allocation110_spill] sm:$0xff] }
 0x30f   : > { %4232 = vmatmul.msk.f32.gmra.mxu0 %vm1958_vm9, %v1919_v24  ;;  %4242 = vmatmul.msk.f32.vlgmr.msra.gmra.mxu2 %vm1958_vm9, %v1929_v12  ;;  %v1855_v5 = vsel %vm1846_vm6, %v1822_v45, %v8198_v16  ;;  %v1865_v10 = vsel %vm1846_vm6, %v1832_v52, %v8199_v44  ;;  %v1692_v60 = vsel %vm258_vm0, %v4343_v19, %v8215_v20  ;;  %v8216_v34 = vld [vmem:[#allocation95_spill] sm:$0xff]  ;;  %v8218_v52 = vld [vmem:[#allocation118_spill] sm:$0xff]  ;;  %v8219_v45 = vld [vmem:[#allocation129_spill] sm:$0xff] }
 0x310   : > { %v1621_v38 = vpop.permute.xlu1 %1620  ;;  %v1888_v24 = vsel %vm1879_vm8, %v1855_v5, %v8200_v63  ;;  %v1898_v41 = vsel %vm1879_vm8, %v1865_v10, %v5672_v25  ;;  %v1724_v25 = vsel %vm1714_vm2, %v1691_v56, %v8203_v49  ;;  %v8220_v16 = vld [vmem:[#allocation141_spill] sm:$0xff]  ;;  %v8221_v44 = vld [vmem:[#allocation142_spill] sm:$0xff]  ;;  %v8225_v56 = vld [vmem:[#allocation175_spill] sm:$0xff] }
 0x311   : > { %v1930_v54 = vsel %vm1912_vm7, %v1897_v39, %v1621_v38  ;;  %v1921_v12 = vsel %vm1912_vm7, %v1888_v24, %v5762_v42  ;;  %v1931_v13 = vsel %vm1912_vm7, %v1898_v41, %v1623_v43  ;;  %v1734_v42 = vsel %vm1714_vm2, %v1701_v2, %v8204_v8  ;;  %v8210_v39 = vld [vmem:[#allocation106_spill] sm:$0xff]  ;;  %v8222_v63 = vld [vmem:[#allocation89_spill] sm:$0xff]  ;;  %v8238_v9 = vld [vmem:[#allocation167_spill] sm:$0xff] }
 0x312   : > { %v1767_v58 = vsel %vm1747_vm3, %v1734_v42, %v8205_v33  ;;  %v1757_v17 = vsel %vm1747_vm3, %v1724_v25, %v8206_v26  ;;  %v8223_v41 = vld [vmem:[#allocation154_spill] sm:$0xff]  ;;  %v8227_v49 = vld [vmem:[#allocation189_spill] sm:$0xff] }
 0x313   : > { %v1790_v29 = vsel %vm1780_vm5, %v1757_v17, %v8207_v40  ;;  %v1800_v38 = vsel %vm1780_vm5, %v1767_v58, %v8208_v0  ;;  %v4344_v33 = vld [vmem:[#allocation2 + $0x80] sm:$0xff]  ;;  %v4345_v17 = vld [vmem:[#allocation2 + $0xf8] sm:$0xff]  ;;  %v8229_v40 = vld [vmem:[#allocation63_spill] sm:$0xff] }
 0x314   : > { %v1823_v59 = vsel %vm1813_vm4, %v1790_v29, %v8209_v27  ;;  %v1833_v23 = vsel %vm1813_vm4, %v1800_v38, %v8210_v39  ;;  %v8228_v58 = vld [vmem:[#allocation37_spill] sm:$0xff]  ;;  %v1703_v29 = vsel %vm258_vm0, %v4345_v17, %v8229_v40  ;;  %v8230_v0 = vld [vmem:[#allocation96_spill] sm:$0xff] }
 0x315   : > { %v1856_v14 = vsel %vm1846_vm6, %v1823_v59, %v8212_v18  ;;  %v1693_v26 = vsel %vm258_vm0, %v4344_v33, %v8228_v58  ;;  %v1736_v38 = vsel %vm1714_vm2, %v1703_v29, %v8230_v0  ;;  %v8231_v27 = vld [vmem:[#allocation97_spill] sm:$0xff]  ;;  %v8232_v59 = vld [vmem:[#allocation122_spill] sm:$0xff]  ;;  %v8254_v17 = vld [vmem:[#allocation36_spill] sm:$0xff] }
 0x316   : > { %v1889_v6 = vsel %vm1879_vm8, %v1856_v14, %v8213_v4  ;;  %v8235_v18 = vld [vmem:[#allocation145_spill] sm:$0xff]  ;;  %v8253_v58 = vld [vmem:[#allocation190_spill] sm:$0xff] }
 0x317   : > { %4233 = vmatmul.msk.f32.gmra.mxu0 %vm1958_vm9, %v1920_v28  ;;  %4243 = vmatmul.msk.f32.gmra.mxu2 %vm1958_vm9, %v1930_v54  ;;  %v1625_v28 = vpop.permute.xlu0 %1624  ;;  %v8211_v54 = vld [vmem:[#allocation165_spill] sm:$0xff]  ;;  %v1922_v3 = vsel %vm1912_vm7, %v1889_v6, %v5777_v15  ;;  %v1735_v15 = vsel %vm1714_vm2, %v1702_v21, %v8217_v47 }
 0x318   : > { %v1866_v37 = vsel %vm1846_vm6, %v1833_v23, %v8211_v54  ;;  %v1768_v43 = vsel %vm1747_vm3, %v1735_v15, %v8219_v45  ;;  %v8233_v23 = vld [vmem:[#allocation131_spill] sm:$0xff]  ;;  %v8234_v54 = vld [vmem:[#allocation138_spill] sm:$0xff]  ;;  %v8236_v4 = vld [vmem:[#allocation93_spill] sm:$0xff] }
 0x319   : > { %v1899_v35 = vsel %vm1879_vm8, %v1866_v37, %v5676_v1  ;;  %v1725_v1 = vsel %vm1714_vm2, %v1692_v60, %v8216_v34  ;;  %v1801_v5 = vsel %vm1780_vm5, %v1768_v43, %v8220_v16  ;;  %v8239_v21 = vld [vmem:[#allocation177_spill] sm:$0xff]  ;;  %v4346_v15 = vld [vmem:[#allocation2 + $0x90] sm:$0xff]  ;;  %v4347_v45 = vld [vmem:[#allocation2 + $0x108] sm:$0xff] }
 0x31a   : > { %v1932_v62 = vsel %vm1912_vm7, %v1899_v35, %v1625_v28  ;;  %v1758_v32 = vsel %vm1747_vm3, %v1725_v1, %v8218_v52  ;;  %v1769_v28 = vsel %vm1747_vm3, %v1736_v38, %v8233_v23  ;;  %v8237_v35 = vld [vmem:[#allocation94_spill] sm:$0xff]  ;;  %v8240_v20 = vld [vmem:[#allocation185_spill] sm:$0xff]  ;;  %v8241_v52 = vld [vmem:[#allocation48_spill] sm:$0xff] }
 0x31b   : > { %v1791_v10 = vsel %vm1780_vm5, %v1758_v32, %v8221_v44  ;;  %v1802_v14 = vsel %vm1780_vm5, %v1769_v28, %v8235_v18  ;;  %v1694_v32 = vsel %vm258_vm0, %v4346_v15, %v8241_v52  ;;  %v8242_v43 = vld [vmem:[#allocation65_spill] sm:$0xff]  ;;  %v8244_v44 = vld [vmem:[#allocation111_spill] sm:$0xff]  ;;  %v8257_v28 = vld [vmem:[#allocation100_spill] sm:$0xff] }
 0x31c   : > { %v1824_v24 = vsel %vm1813_vm4, %v1791_v10, %v8222_v63  ;;  %v1835_v6 = vsel %vm1813_vm4, %v1802_v14, %v8236_v4  ;;  %v1704_v16 = vsel %vm258_vm0, %v4347_v45, %v8242_v43  ;;  %v8245_v10 = vld [vmem:[#allocation123_spill] sm:$0xff]  ;;  %v8260_v4 = vld [vmem:[#allocation132_spill] sm:$0xff]  ;;  %v8266_v15 = vld [vmem:[#allocation178_spill] sm:$0xff] }
 0x31d   : > { %v1857_v46 = vsel %vm1846_vm6, %v1824_v24, %v8224_v30  ;;  %v1868_v19 = vsel %vm1846_vm6, %v1835_v6, %v8239_v21  ;;  %v8246_v24 = vld [vmem:[#allocation124_spill] sm:$0xff]  ;;  %v8248_v30 = vld [vmem:[#allocation146_spill] sm:$0xff]  ;;  %v4348_v38 = vld [vmem:[#allocation2 + $0x110] sm:$0xff] }
 0x31e   : > { %v1890_v25 = vsel %vm1879_vm8, %v1857_v46, %v8227_v49  ;;  %v1901_v34 = vsel %vm1879_vm8, %v1868_v19, %v5691_v7  ;;  %v8259_v18 = vld [vmem:[#allocation119_spill] sm:$0xff]  ;;  %v8263_v21 = vld [vmem:[#allocation98_spill] sm:$0xff]  ;;  %v8268_v43 = vld [vmem:[#allocation192_spill] sm:$0xff] }
 0x31f   : > { %4234 = vmatmul.msk.f32.gmra.mxu0 %vm1958_vm9, %v1921_v12  ;;  %4244 = vmatmul.msk.f32.gmra.mxu2 %vm1958_vm9, %v1931_v13  ;;  %v1834_v12 = vsel %vm1813_vm4, %v1801_v5, %v8223_v41  ;;  %v1627_v13 = vpop.permute.xlu1 %1626  ;;  %v1923_v8 = vsel %vm1912_vm7, %v1890_v25, %v5779_v57  ;;  %v1726_v57 = vsel %vm1714_vm2, %v1693_v26, %v8231_v27  ;;  %v8243_v5 = vld [vmem:[#allocation80_spill] sm:$0xff]  ;;  %v1631_v49 = vpop.permute.xlu0 %1630  ;;  %v8255_v27 = vld [vmem:[#allocation49_spill] sm:$0xff] }
 0x320   : > { %v1867_v55 = vsel %vm1846_vm6, %v1834_v12, %v8225_v56  ;;  %v1759_v39 = vsel %vm1747_vm3, %v1726_v57, %v8232_v59  ;;  %v1727_v7 = vsel %vm1714_vm2, %v1694_v32, %v8243_v5  ;;  %v8247_v12 = vld [vmem:[#allocation51_spill] sm:$0xff]  ;;  %v8249_v56 = vld [vmem:[#allocation77_spill] sm:$0xff]  ;;  %v8251_v25 = vld [vmem:[#allocation168_spill] sm:$0xff]  ;;  %v1705_v57 = vsel %vm258_vm0, %v4348_v38, %v8255_v27 }
 0x321   : > { %v1900_v2 = vsel %vm1879_vm8, %v1867_v55, %v8226_v48  ;;  %v1792_v37 = vsel %vm1780_vm5, %v1759_v39, %v8234_v54  ;;  %v1760_v41 = vsel %vm1747_vm3, %v1727_v7, %v8246_v24  ;;  %v8250_v48 = vld [vmem:[#allocation155_spill] sm:$0xff]  ;;  %v4349_v59 = vld [vmem:[#allocation2 + $0x98] sm:$0xff]  ;;  %v8256_v39 = vld [vmem:[#allocation50_spill] sm:$0xff] }
 0x322   : > { %v1933_v42 = vsel %vm1912_vm7, %v1900_v2, %v1627_v13  ;;  %v1793_v13 = vsel %vm1780_vm5, %v1760_v41, %v8247_v12  ;;  %v1695_v23 = vsel %vm258_vm0, %v4349_v59, %v8256_v39  ;;  %v8267_v32 = vld [vmem:[#allocation191_spill] sm:$0xff]  ;;  %v4351_v41 = vld [vmem:[#allocation2 + $0x120] sm:$0xff]  ;;  %v8270_v12 = vld [vmem:[#allocation66_spill] sm:$0xff] }
 0x323   : > { %v1826_v55 = vsel %vm1813_vm4, %v1793_v13, %v8249_v56  ;;  %v1728_v54 = vsel %vm1714_vm2, %v1695_v23, %v8257_v28  ;;  %v1706_v13 = vsel %vm258_vm0, %v4351_v41, %v8270_v12  ;;  %v8272_v56 = vld [vmem:[#allocation102_spill] sm:$0xff] }
 0x324   : > { %v1761_v14 = vsel %vm1747_vm3, %v1728_v54, %v8259_v18  ;;  %v8279_v38 = vld [vmem:[#allocation170_spill] sm:$0xff]  ;;  %v8282_v18 = vld [vmem:[#allocation53_spill] sm:$0xff] }
 0x325   : > { %v8281_v39 = vld [vmem:[#allocation186_spill] sm:$0xff] }
 0x327   : > { %4235 = vmatmul.msk.f32.gmra.mxu0 %vm1958_vm9, %v1922_v3  ;;  %4245 = vmatmul.msk.f32.gmra.mxu2 %vm1958_vm9, %v1932_v62  ;;  %v1825_v3 = vsel %vm1813_vm4, %v1792_v37, %v8237_v35  ;;  %v1629_v62 = vpop.permute.xlu2 %1628  ;;  %v8258_v37 = vld [vmem:[#allocation112_spill] sm:$0xff]  ;;  %v8261_v35 = vld [vmem:[#allocation143_spill] sm:$0xff] }
 0x328   : > { %v1858_v31 = vsel %vm1846_vm6, %v1825_v3, %v8238_v9  ;;  %v1934_v47 = vsel %vm1912_vm7, %v1901_v34, %v1629_v62  ;;  %v8262_v62 = vld [vmem:[#allocation144_spill] sm:$0xff]  ;;  %v1633_v34 = vpop.permute.xlu1 %1632 }
 0x329   : > { %v1891_v60 = vsel %vm1879_vm8, %v1858_v31, %v8240_v20  ;;  %v1794_v9 = vsel %vm1780_vm5, %v1761_v14, %v8262_v62  ;;  %v6058_v31 = vld [vmem:[%s7852_s2] ss:$0 sm:$0xff]  ;;  %v8264_v20 = vld [vmem:[#allocation156_spill] sm:$0xff] }
 0x32a   : > { %v1924_v1 = vsel %vm1912_vm7, %v1891_v60, %v5784_v36  ;;  %v1737_v36 = vsel %vm1714_vm2, %v1704_v16, %v8244_v44  ;;  %v1827_v19 = vsel %vm1813_vm4, %v1794_v9, %v8263_v21  ;;  %v8285_v62 = vld [vmem:[#allocation113_spill] sm:$0xff]  ;;  %v8286_v9 = vld [vmem:[#allocation126_spill] sm:$0xff] }
 0x32b   : > { %v1770_v63 = vsel %vm1747_vm3, %v1737_v36, %v8245_v10  ;;  %v4350_v10 = vld [vmem:[#allocation2 + $0xa8] sm:$0xff] }
 0x32c   : > { %v1803_v46 = vsel %vm1780_vm5, %v1770_v63, %v8248_v30  ;;  %v8269_v63 = vld [vmem:[#allocation40_spill] sm:$0xff]  ;;  %v8271_v30 = vld [vmem:[#allocation101_spill] sm:$0xff] }
 0x32d   : > { %v1836_v2 = vsel %vm1813_vm4, %v1803_v46, %v8250_v48  ;;  %v1696_v24 = vsel %vm258_vm0, %v4350_v10, %v8269_v63  ;;  %v1739_v46 = vsel %vm1714_vm2, %v1706_v13, %v8271_v30  ;;  %v8273_v48 = vld [vmem:[#allocation125_spill] sm:$0xff]  ;;  %v4354_v30 = vld [vmem:[#allocation2 + $0x138] sm:$0xff] }
 0x32e   : > { %v8294_v63 = vld [vmem:[#allocation193_spill] sm:$0xff] }
 0x32f   : > { %4236 = vmatmul.msk.f32.gmra.mxu0 %vm1958_vm9, %v1923_v8  ;;  %4246 = vmatmul.msk.f32.gmra.mxu2 %vm1958_vm9, %v1933_v42  ;;  %v1869_v8 = vsel %vm1846_vm6, %v1836_v2, %v8251_v25  ;;  %v8252_v42 = vld [vmem:[#allocation169_spill] sm:$0xff] }
 0x330   : > { %v1859_v33 = vsel %vm1846_vm6, %v1826_v55, %v8252_v42  ;;  %v1902_v40 = vsel %vm1879_vm8, %v1869_v8, %v8254_v17  ;;  %v8275_v8 = vld [vmem:[#allocation139_spill] sm:$0xff] }
 0x331   : > { %v1892_v26 = vsel %vm1879_vm8, %v1859_v33, %v8253_v58  ;;  %v1935_v0 = vsel %vm1912_vm7, %v1902_v40, %v1631_v49  ;;  %v8274_v49 = vld [vmem:[#allocation133_spill] sm:$0xff]  ;;  %v8276_v33 = vld [vmem:[#allocation147_spill] sm:$0xff]  ;;  %v8278_v40 = vld [vmem:[#allocation152_spill] sm:$0xff] }
 0x332   : > { %v1925_v29 = vsel %vm1912_vm7, %v1892_v26, %v5806_v11  ;;  %v1738_v11 = vsel %vm1714_vm2, %v1705_v57, %v8258_v37  ;;  %v1772_v25 = vsel %vm1747_vm3, %v1739_v46, %v8274_v49  ;;  %v8277_v26 = vld [vmem:[#allocation99_spill] sm:$0xff]  ;;  %v8295_v46 = vld [vmem:[#allocation54_spill] sm:$0xff] }
 0x333   : > { %v1771_v6 = vsel %vm1747_vm3, %v1738_v11, %v8260_v4  ;;  %v1805_v58 = vsel %vm1780_vm5, %v1772_v25, %v8276_v33  ;;  %v8280_v57 = vld [vmem:[#allocation179_spill] sm:$0xff]  ;;  %v4353_v4 = vld [vmem:[#allocation2 + $0x128] sm:$0xff] }
 0x334   : > { %v1804_v3 = vsel %vm1780_vm5, %v1771_v6, %v8261_v35  ;;  %v1838_v17 = vsel %vm1813_vm4, %v1805_v58, %v8277_v26  ;;  %v4352_v11 = vld [vmem:[#allocation2 + $0xb0] sm:$0xff]  ;;  %v8283_v6 = vld [vmem:[#allocation68_spill] sm:$0xff]  ;;  %v8301_v58 = vld [vmem:[#allocation194_spill] sm:$0xff] }
 0x335   : > { %v1837_v60 = vsel %vm1813_vm4, %v1804_v3, %v8264_v20  ;;  %v1871_v59 = vsel %vm1846_vm6, %v1838_v17, %v8280_v57  ;;  %v1697_v14 = vsel %vm258_vm0, %v4352_v11, %v8282_v18  ;;  %v1707_v35 = vsel %vm258_vm0, %v4353_v4, %v8283_v6  ;;  %v8284_v3 = vld [vmem:[#allocation86_spill] sm:$0xff]  ;;  %v8304_v57 = vld [vmem:[#allocation135_spill] sm:$0xff]  ;;  %v8307_v11 = vld [vmem:[#allocation181_spill] sm:$0xff] }
 0x336   : > { %v1870_v52 = vsel %vm1846_vm6, %v1837_v60, %v8266_v15  ;;  %v1904_v28 = vsel %vm1879_vm8, %v1871_v59, %v5699_v51  ;;  %v1730_v51 = vsel %vm1714_vm2, %v1697_v14, %v8284_v3  ;;  %v8289_v15 = vld [vmem:[#allocation148_spill] sm:$0xff] }
 0x337   : > { %4237 = vmatmul.msk.f32.gmra.mxu0 %vm1958_vm9, %v1924_v1  ;;  %4247 = vmatmul.msk.f32.gmra.mxu2 %vm1958_vm9, %v1934_v47  ;;  %v8265_v1 = vld [vmem:[#allocation163_spill] sm:$0xff]  ;;  %v1903_v45 = vsel %vm1879_vm8, %v1870_v52, %v8267_v32  ;;  %v8290_v32 = vld [vmem:[#allocation82_spill] sm:$0xff]  ;;  %v8308_v4 = vld [vmem:[#allocation64_spill] sm:$0xff] }
 0x338   : > { %v1860_v47 = vsel %vm1846_vm6, %v1827_v19, %v8265_v1  ;;  %v1936_v36 = vsel %vm1912_vm7, %v1903_v45, %v1633_v34  ;;  %v8287_v19 = vld [vmem:[#allocation127_spill] sm:$0xff]  ;;  %v8288_v1 = vld [vmem:[#allocation52_spill] sm:$0xff] }
 0x339   : > { %v1893_v16 = vsel %vm1879_vm8, %v1860_v47, %v8268_v43  ;;  %v1763_v20 = vsel %vm1747_vm3, %v1730_v51, %v8287_v19  ;;  %v8291_v43 = vld [vmem:[#allocation157_spill] sm:$0xff]  ;;  %v4356_v51 = vld [vmem:[#allocation2 + $0x150] sm:$0xff] }
 0x33a   : > { %v1926_v44 = vsel %vm1912_vm7, %v1893_v16, %v5799_v61  ;;  %v1729_v61 = vsel %vm1714_vm2, %v1696_v24, %v8272_v56  ;;  %v1796_v47 = vsel %vm1780_vm5, %v1763_v20, %v8288_v1  ;;  %v1708_v56 = vsel %vm258_vm0, %v4354_v30, %v8295_v46  ;;  %v8311_v20 = vld [vmem:[#allocation128_spill] sm:$0xff] }
 0x33b   : > { %v1762_v2 = vsel %vm1747_vm3, %v1729_v61, %v8273_v48  ;;  %v1829_v45 = vsel %vm1813_vm4, %v1796_v47, %v8290_v32  ;;  %v8296_v61 = vld [vmem:[#allocation114_spill] sm:$0xff]  ;;  %v8313_v47 = vld [vmem:[#allocation159_spill] sm:$0xff]  ;;  %v8314_v32 = vld [vmem:[#allocation173_spill] sm:$0xff] }
 0x33c   : > { %v1795_v42 = vsel %vm1780_vm5, %v1762_v2, %v8275_v8  ;;  %v8297_v48 = vld [vmem:[#allocation134_spill] sm:$0xff]  ;;  %v1639_v8 = vpop.permute.xlu1 %1638 }
 0x33f   : > { %4238 = vmatmul.msk.f32.gmra.mxu0 %vm1958_vm9, %v1925_v29  ;;  %4248 = vmatmul.msk.f32.gmra.mxu2 %vm1958_vm9, %v1935_v0  ;;  %v1828_v29 = vsel %vm1813_vm4, %v1795_v42, %v8278_v40  ;;  %v1635_v0 = vpop.permute.xlu2 %1634  ;;  %v8300_v42 = vld [vmem:[#allocation180_spill] sm:$0xff]  ;;  %v4355_v40 = vld [vmem:[#allocation2 + $0x140] sm:$0xff] }
 0x340   : > { %v1861_v27 = vsel %vm1846_vm6, %v1828_v29, %v8279_v38  ;;  %v1937_v37 = vsel %vm1912_vm7, %v1904_v28, %v1635_v0  ;;  %v8302_v29 = vld [vmem:[#allocation69_spill] sm:$0xff]  ;;  %v8303_v38 = vld [vmem:[#allocation104_spill] sm:$0xff]  ;;  %v8306_v28 = vld [vmem:[#allocation107_spill] sm:$0xff] }
 0x341   : > { %v1894_v23 = vsel %vm1879_vm8, %v1861_v27, %v8281_v39  ;;  %v1709_v0 = vsel %vm258_vm0, %v4355_v40, %v8302_v29  ;;  %v8305_v39 = vld [vmem:[#allocation149_spill] sm:$0xff] }
 0x342   : > { %v1927_v54 = vsel %vm1912_vm7, %v1894_v23, %v5817_v22  ;;  %v1740_v22 = vsel %vm1714_vm2, %v1707_v35, %v8285_v62  ;;  %v1742_v27 = vsel %vm1714_vm2, %v1709_v0, %v8303_v38  ;;  %v8309_v62 = vld [vmem:[#allocation71_spill] sm:$0xff]  ;;  %v8324_v29 = vld [vmem:[#allocation109_spill] sm:$0xff] }
 0x343   : > { %v1773_v21 = vsel %vm1747_vm3, %v1740_v22, %v8286_v9  ;;  %v1775_v59 = vsel %vm1747_vm3, %v1742_v27, %v8304_v57  ;;  %v1710_v22 = vsel %vm258_vm0, %v4356_v51, %v8309_v62  ;;  %v8325_v27 = vld [vmem:[#allocation137_spill] sm:$0xff]  ;;  %v4359_v62 = vld [vmem:[#allocation2 + $0x170] sm:$0xff] }
 0x344   : > { %v1806_v52 = vsel %vm1780_vm5, %v1773_v21, %v8289_v15  ;;  %v1808_v23 = vsel %vm1780_vm5, %v1775_v59, %v8305_v39  ;;  %v8310_v21 = vld [vmem:[#allocation115_spill] sm:$0xff] }
 0x345   : > { %v1839_v16 = vsel %vm1813_vm4, %v1806_v52, %v8291_v43  ;;  %v1743_v19 = vsel %vm1714_vm2, %v1710_v22, %v8310_v21  ;;  %v8330_v22 = vld [vmem:[#allocation75_spill] sm:$0xff] }
 0x346   : > { %v2072_v5 = vpop.f32.mrf.mxu0 }
 0x347   : > { %v2073_v7 = vadd.f32 %v6058_v31, %v2072_v5  ;;  %4239 = vmatmul.msk.f32.gmra.mxu0 %vm1958_vm9, %v1926_v44  ;;  %4249 = vmatmul.msk.f32.gmra.mxu2 %vm1958_vm9, %v1936_v36  ;;  %v1637_v5 = vpop.permute.xlu0 %1636  ;;  %v8293_v36 = vld [vmem:[#allocation172_spill] sm:$0xff] }
 0x348   : > { %v1862_v10 = vsel %vm1846_vm6, %v1829_v45, %v8293_v36  ;;  %v4357_v36 = vld [vmem:[#allocation2 + $0x158] sm:$0xff] }
 0x349   : > { %v2168_v55 = vmax.f32 %v2073_v7, 0.0  ;;  %v8292_v7 = vld [vmem:[#allocation171_spill] sm:$0xff]  ;;  %v1895_v24 = vsel %vm1879_vm8, %v1862_v10, %v8294_v63  ;;  %v8316_v10 = vld [vmem:[#allocation60_spill] sm:$0xff] }
 0x34a   : > { %v1872_v44 = vsel %vm1846_vm6, %v1839_v16, %v8292_v7  ;;  %v1928_v12 = vsel %vm1912_vm7, %v1895_v24, %v5851_v53  ;;  %v8299_v53 = vld [vmem:[#allocation158_spill] sm:$0xff]  ;;  %v8315_v16 = vld [vmem:[#allocation196_spill] sm:$0xff]  ;;  %v1711_v63 = vsel %vm258_vm0, %v4357_v36, %v8316_v10 }
 0x34b   : > { %2200 = vst.msk [vmem:[#allocation2 + $0x19] sm:$0xff] %vm258_vm0, %v2168_v55  ;;  %v1905_v41 = vsel %vm1879_vm8, %v1872_v44, %v5701_v50  ;;  %v1741_v55 = vsel %vm1714_vm2, %v1708_v56, %v8296_v61  ;;  %v8298_v50 = vld [vmem:[#allocation58_spill] sm:$0xff]  ;;  %v8319_v56 = vld [vmem:[#allocation57_spill] sm:$0xff] }
 0x34c   : > { %v1938_v13 = vsel %vm1912_vm7, %v1905_v41, %v1637_v5  ;;  %v1774_v2 = vsel %vm1747_vm3, %v1741_v55, %v8297_v48  ;;  %v8317_v41 = vld [vmem:[#allocation116_spill] sm:$0xff] }
 0x34d   : > { %v1807_v49 = vsel %vm1780_vm5, %v1774_v2, %v8298_v50  ;;  %v8320_v55 = vld [vmem:[#allocation160_spill] sm:$0xff]  ;;  %v1645_v2 = vpop.permute.xlu1 %1644  ;;  %v8321_v50 = vld [vmem:[#allocation182_spill] sm:$0xff] }
 0x34e   : > { %v1840_v25 = vsel %vm1813_vm4, %v1807_v49, %v8299_v53 }
 0x34f   : > { %4240 = vmatmul.msk.f32.gmra.mxu0 %vm1958_vm9, %v1927_v54  ;;  %4250 = vmatmul.msk.f32.gmra.mxu2 %vm1958_vm9, %v1937_v37  ;;  %v1873_v33 = vsel %vm1846_vm6, %v1840_v25, %v8300_v42  ;;  %v1841_v54 = vsel %vm1813_vm4, %v1808_v23, %v8306_v28  ;;  %v1641_v37 = vpop.permute.xlu2 %1640  ;;  %v1643_v52 = vpop.permute.xlu0 %1642  ;;  %v8322_v25 = vld [vmem:[#allocation195_spill] sm:$0xff]  ;;  %v8326_v23 = vld [vmem:[#allocation72_spill] sm:$0xff] }
 0x350   : > { %v1906_v26 = vsel %vm1879_vm8, %v1873_v33, %v8301_v58  ;;  %v1874_v18 = vsel %vm1846_vm6, %v1841_v54, %v8307_v11  ;;  %v4358_v58 = vld [vmem:[#allocation2 + $0x168] sm:$0xff]  ;;  %v8327_v54 = vld [vmem:[#allocation153_spill] sm:$0xff] }
 0x351   : > { %v1939_v17 = vsel %vm1912_vm7, %v1906_v26, %v1639_v8  ;;  %v1907_v6 = vsel %vm1879_vm8, %v1874_v18, %v8308_v4  ;;  %v8323_v26 = vld [vmem:[#allocation73_spill] sm:$0xff]  ;;  %v8328_v18 = vld [vmem:[#allocation184_spill] sm:$0xff] }
 0x352   : > { %v2342_v60 = vld [vmem:[#allocation2 + $0x19] sm:$0xff]  ;;  %v1940_v3 = vsel %vm1912_vm7, %v1907_v6, %v1641_v37 }
 0x353   : > { %v2237_v34 = vld [vmem:[#allocation2 + $0x1a] sm:$0x1]  ;;  %2632 = vrot.lane.b32.xlu0 %v2342_v60, %s4380_s24  ;;  %v1776_v60 = vsel %vm1747_vm3, %v1743_v19, %v8311_v20  ;;  %v8329_v6 = vld [vmem:[#allocation197_spill] sm:$0xff] }
 0x354   : > { %2255 = vst.msk [vmem:[#allocation2 + $0x18] sm:$0x1] %vm314_vm1, %v2237_v34  ;;  %v8312_v34 = vld [vmem:[#allocation150_spill] sm:$0xff]  ;;  %v8331_v19 = vld [vmem:[#allocation117_spill] sm:$0xff] }
 0x355   : > { %v1809_v1 = vsel %vm1780_vm5, %v1776_v60, %v8312_v34 }
 0x356   : > { %v1842_v15 = vsel %vm1813_vm4, %v1809_v1, %v8313_v47  ;;  %v8332_v47 = vld [vmem:[#allocation130_spill] sm:$0xff] }
 0x357   : > { %4241 = vmatmul.msk.f32.gmra.mxu0 %vm1958_vm9, %v1928_v12  ;;  %4251 = vmatmul.msk.f32.gmra.mxu2 %vm1958_vm9, %v1938_v13  ;;  %v1875_v45 = vsel %vm1846_vm6, %v1842_v15, %v8314_v32  ;;  %v1744_v12 = vsel %vm1714_vm2, %v1711_v63, %v8317_v41  ;;  %v8318_v13 = vld [vmem:[#allocation136_spill] sm:$0xff]  ;;  %v1647_v11 = vpop.permute.xlu2 %1646  ;;  %v8333_v32 = vld [vmem:[#allocation151_spill] sm:$0xff] }
 0x358   : > { %v1908_v5 = vsel %vm1879_vm8, %v1875_v45, %v8315_v16  ;;  %v1777_v30 = vsel %vm1747_vm3, %v1744_v12, %v8318_v13  ;;  %v8334_v16 = vld [vmem:[#allocation161_spill] sm:$0xff]  ;;  %v8336_v63 = vld [vmem:[#allocation39_spill] sm:$0xff] }
 0x359   : > { %v1941_v44 = vsel %vm1912_vm7, %v1908_v5, %v1643_v52  ;;  %v1810_v61 = vsel %vm1780_vm5, %v1777_v30, %v8319_v56 }
 0x35a   : > { %v1843_v48 = vsel %vm1813_vm4, %v1810_v61, %v8320_v55 }
 0x35b   : > { %v1876_v49 = vsel %vm1846_vm6, %v1843_v48, %v8321_v50 }
 0x35c   : > { %v1909_v8 = vsel %vm1879_vm8, %v1876_v49, %v8322_v25 }
 0x35d   : > { %v1942_v33 = vsel %vm1912_vm7, %v1909_v8, %v1645_v2 }
 0x35f   : > { %4252 = vmatmul.msk.f32.gmra.mxu2 %vm1958_vm9, %v1939_v17  ;;  %v1712_v17 = vsel %vm258_vm0, %v4358_v58, %v8323_v26 }
 0x360   : > { %v1745_v0 = vsel %vm1714_vm2, %v1712_v17, %v8324_v29 }
 0x361   : > { %v1778_v57 = vsel %vm1747_vm3, %v1745_v0, %v8325_v27 }
 0x362   : > { %v1811_v28 = vsel %vm1780_vm5, %v1778_v57, %v8326_v23 }
 0x363   : > { %v1844_v37 = vsel %vm1813_vm4, %v1811_v28, %v8327_v54 }
 0x364   : > { %v2075_v14 = vpop.f32.mrf.mxu0 }
 0x365   : > { %v2076_v35 = vadd.f32 %v6058_v31, %v2075_v14  ;;  %v1877_v14 = vsel %vm1846_vm6, %v1844_v37, %v8328_v18 }
 0x367   : > { %v2169_v9 = vmax.f32 %v2076_v35, 0.0  ;;  %4253 = vmatmul.msk.f32.gmra.mxu2 %vm1958_vm9, %v1940_v3  ;;  %v1910_v35 = vsel %vm1879_vm8, %v1877_v14, %v8329_v6 }
 0x368   : > { %v1943_v51 = vsel %vm1912_vm7, %v1910_v35, %v1647_v11 }
 0x369   : > { %2201 = vst.msk [vmem:[#allocation2 + $0x21] sm:$0xff] %vm258_vm0, %v2169_v9  ;;  %v1713_v9 = vsel %vm258_vm0, %v4359_v62, %v8330_v22 }
 0x36a   : > { %v1746_v20 = vsel %vm1714_vm2, %v1713_v9, %v8331_v19 }
 0x36b   : > { %v1779_v15 = vsel %vm1747_vm3, %v1746_v20, %v8332_v47 }
 0x36c   : > { %v2078_v43 = vpop.f32.mrf.mxu0  ;;  %v1812_v45 = vsel %vm1780_vm5, %v1779_v15, %v8333_v32 }
 0x36d   : > { %v2079_v7 = vadd.f32 %v6058_v31, %v2078_v43  ;;  %v1845_v5 = vsel %vm1813_vm4, %v1812_v45, %v8334_v16 }
 0x36f   : > { %v2170_v24 = vmax.f32 %v2079_v7, 0.0  ;;  %4254 = vmatmul.msk.f32.gmra.mxu2 %vm1958_vm9, %v1941_v44  ;;  %v1649_v7 = vpop.permute.xlu0 %1648  ;;  %v8335_v44 = vld [vmem:[#allocation176_spill] sm:$0xff] }
 0x370   : > { %v2273_v46 = vld [vmem:[#allocation2 + $0x27] sm:$0x1]  ;;  %v1878_v36 = vsel %vm1846_vm6, %v1845_v5, %v8335_v44 }
 0x371   : > { %2232 = vst.msk [vmem:[#allocation2 + $0x1] sm:$0xff] %vm258_vm0, %v2170_v24  ;;  %v6244_v34 = vld [vmem:[#allocation2 + $0x21] sm:$0xff] }
 0x372   : > { %2202 = vst.msk [vmem:[#allocation2 + $0x31] sm:$0xff] %vm258_vm0, %v2170_v24  ;;  %v1911_v24 = vsel %vm1879_vm8, %v1878_v36, %v8336_v63 }
 0x373   : > { %2291 = vst.msk [vmem:[#allocation2 + $0x29] sm:$0x1] %vm314_vm1, %v2273_v46  ;;  %v1944_v12 = vsel %vm1912_vm7, %v1911_v24, %v1649_v7 }
 0x374   : > { %v2081_v53 = vpop.f32.mrf.mxu0 }
 0x375   : > { %v2082_v42 = vadd.f32 %v6058_v31, %v2081_v53 }
 0x377   : > { %v2171_v40 = vmax.f32 %v2082_v42, 0.0  ;;  %4255 = vmatmul.msk.f32.gmra.mxu2 %vm1958_vm9, %v1942_v33 }
 0x378   : > { %v2340_v38 = vld [vmem:[#allocation2 + $0x1] sm:$0xff] }
 0x379   : > { %2233 = vst.msk [vmem:[#allocation2 + $0x9] sm:$0xff] %vm258_vm0, %v2171_v40  ;;  %2628 = vrot.lane.b32.xlu1 %v2340_v38, %s4380_s24  ;;  %v2238_v59 = vld [vmem:[#allocation2 + $0x32] sm:$0x1]  ;;  %v2236_v39 = vld [vmem:[#allocation2 + $0x2] sm:$0x1] }
 0x37a   : > { %2203 = vst.msk [vmem:[#allocation2 + $0x39] sm:$0xff] %vm258_vm0, %v2171_v40  ;;  %v6266_v46 = vld [vmem:[#allocation2 + $0x31] sm:$0xff] }
 0x37b   : > { %2256 = vst.msk [vmem:[#allocation2 + $0x30] sm:$0x1] %vm314_vm1, %v2238_v59 }
 0x37c   : > { %v2084_v4 = vpop.f32.mrf.mxu0  ;;  %2254 = vst.msk [vmem:[#allocation2] sm:$0x1] %vm314_vm1, %v2236_v39 }
 0x37d   : > { %v2085_v3 = vadd.f32 %v6058_v31, %v2084_v4 }
 0x37f   : > { %v2172_v21 = vmax.f32 %v2085_v3, 0.0  ;;  %4256 = vmatmul.msk.f32.gmra.mxu2 %vm1958_vm9, %v1943_v51 }
 0x380   : > { %v2341_v60 = vld [vmem:[#allocation2 + $0x9] sm:$0xff] }
 0x381   : > { %v2272_v1 = vld [vmem:[#allocation2 + $0xf] sm:$0x1]  ;;  %2204 = vst.msk [vmem:[#allocation2 + $0x49] sm:$0xff] %vm258_vm0, %v2172_v21  ;;  %2630 = vrot.lane.b32.xlu2 %v2341_v60, %s4380_s24  ;;  %v2345_v52 = vld [vmem:[#allocation2 + $0x39] sm:$0xff]  ;;  %2634 = vrot.lane.b32.xlu1 %v6244_v34, %s4380_s24 }
 0x382   : > { %2638 = vrot.lane.b32.xlu0 %v2345_v52, %s4380_s24  ;;  %2290 = vst.msk [vmem:[#allocation2 + $0x11] sm:$0x1] %vm314_vm1, %v2272_v1  ;;  %v2274_v43 = vld [vmem:[#allocation2 + $0x3f] sm:$0x1] }
 0x383   : > { %2292 = vst.msk [vmem:[#allocation2 + $0x41] sm:$0x1] %vm314_vm1, %v2274_v43 }
 0x384   : > { %v2087_v10 = vpop.f32.mrf.mxu0 }
 0x385   : > { %v2088_v41 = vadd.f32 %v6058_v31, %v2087_v10 }
 0x387   : > { %v2173_v13 = vmax.f32 %v2088_v41, 0.0  ;;  %4257 = vmatmul.msk.f32.gmra.mxu2 %vm1958_vm9, %v1944_v12 }
 0x388   : > { %v2346_v30 = vld [vmem:[#allocation2 + $0x49] sm:$0xff] }
 0x389   : > { %v2239_v56 = vld [vmem:[#allocation2 + $0x4a] sm:$0x1]  ;;  %2205 = vst.msk [vmem:[#allocation2 + $0x51] sm:$0xff] %vm258_vm0, %v2173_v13  ;;  %2640 = vrot.lane.b32.xlu1 %v2346_v30, %s4380_s24  ;;  %2636 = vrot.lane.b32.xlu2 %v6266_v46, %s4380_s24 }
 0x38a   : > { %2257 = vst.msk [vmem:[#allocation2 + $0x48] sm:$0x1] %vm314_vm1, %v2239_v56 }
 0x38c   : > { %v2090_v61 = vpop.f32.mrf.mxu0 }
 0x38d   : > { %v2091_v55 = vadd.f32 %v6058_v31, %v2090_v61 }
 0x38f   : > { %v2174_v48 = vmax.f32 %v2091_v55, 0.0 }
 0x390   : > { %v6274_v2 = vld [vmem:[#allocation2 + $0x51] sm:$0xff] }
 0x391   : > { %v2275_v50 = vld [vmem:[#allocation2 + $0x57] sm:$0x1]  ;;  %2206 = vst.msk [vmem:[#allocation2 + $0x61] sm:$0xff] %vm258_vm0, %v2174_v48  ;;  %2642 = vrot.lane.b32.xlu2 %v6274_v2, %s4380_s24 }
 0x392   : > { %v2120_v49 = vpop.f32.mrf.mxu2  ;;  %2293 = vst.msk [vmem:[#allocation2 + $0x59] sm:$0x1] %vm314_vm1, %v2275_v50 }
 0x393   : > { %v2121_v53 = vadd.f32 %v6058_v31, %v2120_v49 }
 0x394   : > { %v2093_v25 = vpop.f32.mrf.mxu0 }
 0x395   : > { %v2184_v8 = vmax.f32 %v2121_v53, 0.0  ;;  %v2094_v42 = vadd.f32 %v6058_v31, %v2093_v25 }
 0x397   : > { %2216 = vst.msk [vmem:[#allocation2 + $0xd9] sm:$0xff] %vm258_vm0, %v2184_v8  ;;  %v2175_v33 = vmax.f32 %v2094_v42, 0.0 }
 0x398   : > { %v6283_v58 = vld [vmem:[#allocation2 + $0x61] sm:$0xff] }
 0x399   : > { %v2240_v26 = vld [vmem:[#allocation2 + $0x62] sm:$0x1]  ;;  %2207 = vst.msk [vmem:[#allocation2 + $0x69] sm:$0xff] %vm258_vm0, %v2175_v33  ;;  %2644 = vrot.lane.b32.xlu0 %v6283_v58, %s4380_s24 }
 0x39a   : > { %v2123_v17 = vpop.f32.mrf.mxu2  ;;  %2258 = vst.msk [vmem:[#allocation2 + $0x60] sm:$0x1] %vm314_vm1, %v2240_v26 }
 0x39b   : > { %v2124_v40 = vadd.f32 %v6058_v31, %v2123_v17 }
 0x39c   : > { %v2096_v29 = vpop.f32.mrf.mxu0 }
 0x39d   : > { %v2185_v0 = vmax.f32 %v2124_v40, 0.0  ;;  %v2097_v38 = vadd.f32 %v6058_v31, %v2096_v29 }
 0x39e   : > { %v2245_v27 = vld [vmem:[#allocation2 + $0xda] sm:$0x1] }
 0x39f   : > { %2217 = vst.msk [vmem:[#allocation2 + $0xe1] sm:$0xff] %vm258_vm0, %v2185_v0  ;;  %v2176_v57 = vmax.f32 %v2097_v38, 0.0 }
 0x3a0   : > { %v6292_v59 = vld [vmem:[#allocation2 + $0x69] sm:$0xff]  ;;  %2263 = vst.msk [vmem:[#allocation2 + $0xd8] sm:$0x1] %vm314_vm1, %v2245_v27 }
 0x3a1   : > { %2208 = vst.msk [vmem:[#allocation2 + $0x79] sm:$0xff] %vm258_vm0, %v2176_v57  ;;  %2646 = vrot.lane.b32.xlu1 %v6292_v59, %s4380_s24  ;;  %v2276_v39 = vld [vmem:[#allocation2 + $0x6f] sm:$0x1] }
 0x3a2   : > { %v2126_v23 = vpop.f32.mrf.mxu2  ;;  %2294 = vst.msk [vmem:[#allocation2 + $0x71] sm:$0x1] %vm314_vm1, %v2276_v39 }
 0x3a3   : > { %v2127_v28 = vadd.f32 %v6058_v31, %v2126_v23 }
 0x3a4   : > { %v2099_v54 = vpop.f32.mrf.mxu0 }
 0x3a5   : > { %v2186_v37 = vmax.f32 %v2127_v28, 0.0  ;;  %v2100_v11 = vadd.f32 %v6058_v31, %v2099_v54 }
 0x3a6   : > { %v2281_v18 = vld [vmem:[#allocation2 + $0xe7] sm:$0x1] }
 0x3a7   : > { %2218 = vst.msk [vmem:[#allocation2 + $0xf1] sm:$0xff] %vm258_vm0, %v2186_v37  ;;  %v2177_v14 = vmax.f32 %v2100_v11, 0.0  ;;  %v6362_v37 = vld [vmem:[#allocation2 + $0xd9] sm:$0xff] }
 0x3a8   : > { %v6302_v4 = vld [vmem:[#allocation2 + $0x79] sm:$0xff]  ;;  %2299 = vst.msk [vmem:[#allocation2 + $0xe9] sm:$0x1] %vm314_vm1, %v2281_v18 }
 0x3a9   : > { %v2241_v6 = vld [vmem:[#allocation2 + $0x7a] sm:$0x1]  ;;  %2209 = vst.msk [vmem:[#allocation2 + $0x81] sm:$0xff] %vm258_vm0, %v2177_v14  ;;  %2648 = vrot.lane.b32.xlu2 %v6302_v4, %s4380_s24 }
 0x3aa   : > { %v2129_v35 = vpop.f32.mrf.mxu2  ;;  %2259 = vst.msk [vmem:[#allocation2 + $0x78] sm:$0x1] %vm314_vm1, %v2241_v6 }
 0x3ab   : > { %v2130_v3 = vadd.f32 %v6058_v31, %v2129_v35 }
 0x3ac   : > { %v2102_v51 = vpop.f32.mrf.mxu0 }
 0x3ad   : > { %v2187_v62 = vmax.f32 %v2130_v3, 0.0  ;;  %v2103_v22 = vadd.f32 %v6058_v31, %v2102_v51 }
 0x3ae   : > { %v2246_v9 = vld [vmem:[#allocation2 + $0xf2] sm:$0x1] }
 0x3af   : > { %2219 = vst.msk [vmem:[#allocation2 + $0xf9] sm:$0xff] %vm258_vm0, %v2187_v62  ;;  %v2178_v21 = vmax.f32 %v2103_v22, 0.0 }
 0x3b0   : > { %v6312_v19 = vld [vmem:[#allocation2 + $0x81] sm:$0xff]  ;;  %2264 = vst.msk [vmem:[#allocation2 + $0xf0] sm:$0x1] %vm314_vm1, %v2246_v9 }
 0x3b1   : > { %2210 = vst.msk [vmem:[#allocation2 + $0x91] sm:$0xff] %vm258_vm0, %v2178_v21  ;;  %2650 = vrot.lane.b32.xlu0 %v6312_v19, %s4380_s24  ;;  %v2277_v20 = vld [vmem:[#allocation2 + $0x87] sm:$0x1] }
 0x3b2   : > { %v2132_v60 = vpop.f32.mrf.mxu2  ;;  %2295 = vst.msk [vmem:[#allocation2 + $0x89] sm:$0x1] %vm314_vm1, %v2277_v20  ;;  %v6384_v9 = vld [vmem:[#allocation2 + $0xe1] sm:$0xff] }
 0x3b3   : > { %v2133_v1 = vadd.f32 %v6058_v31, %v2132_v60 }
 0x3b4   : > { %v2105_v47 = vpop.f32.mrf.mxu0 }
 0x3b5   : > { %v2188_v15 = vmax.f32 %v2133_v1, 0.0  ;;  %v2106_v52 = vadd.f32 %v6058_v31, %v2105_v47  ;;  %v6391_v47 = vld [vmem:[#allocation2 + $0xf1] sm:$0xff] }
 0x3b6   : > { %v2282_v32 = vld [vmem:[#allocation2 + $0xff] sm:$0x1] }
 0x3b7   : > { %2220 = vst.msk [vmem:[#allocation2 + $0x109] sm:$0xff] %vm258_vm0, %v2188_v15  ;;  %v2179_v45 = vmax.f32 %v2106_v52, 0.0  ;;  %v6377_v62 = vld [vmem:[#allocation2 + $0xf9] sm:$0xff] }
 0x3b8   : > { %v6322_v43 = vld [vmem:[#allocation2 + $0x91] sm:$0xff]  ;;  %2300 = vst.msk [vmem:[#allocation2 + $0x101] sm:$0x1] %vm314_vm1, %v2282_v32 }
 0x3b9   : > { %v2242_v16 = vld [vmem:[#allocation2 + $0x92] sm:$0x1]  ;;  %2211 = vst.msk [vmem:[#allocation2 + $0x99] sm:$0xff] %vm258_vm0, %v2179_v45  ;;  %2652 = vrot.lane.b32.xlu1 %v6322_v43, %s4380_s24 }
 0x3ba   : > { %v2135_v5 = vpop.f32.mrf.mxu2  ;;  %2260 = vst.msk [vmem:[#allocation2 + $0x90] sm:$0x1] %vm314_vm1, %v2242_v16 }
 0x3bb   : > { %v2136_v7 = vadd.f32 %v6058_v31, %v2135_v5 }
 0x3bc   : > { %v2108_v44 = vpop.f32.mrf.mxu0 }
 0x3bd   : > { %v2189_v36 = vmax.f32 %v2136_v7, 0.0  ;;  %v2109_v10 = vadd.f32 %v6058_v31, %v2108_v44 }
 0x3be   : > { %v2247_v63 = vld [vmem:[#allocation2 + $0x10a] sm:$0x1] }
 0x3bf   : > { %2221 = vst.msk [vmem:[#allocation2 + $0x111] sm:$0xff] %vm258_vm0, %v2189_v36  ;;  %v2180_v24 = vmax.f32 %v2109_v10, 0.0  ;;  %v6400_v52 = vld [vmem:[#allocation2 + $0x109] sm:$0xff] }
 0x3c0   : > { %v6332_v41 = vld [vmem:[#allocation2 + $0x99] sm:$0xff]  ;;  %2265 = vst.msk [vmem:[#allocation2 + $0x108] sm:$0x1] %vm314_vm1, %v2247_v63 }
 0x3c1   : > { %v2278_v12 = vld [vmem:[#allocation2 + $0x9f] sm:$0x1]  ;;  %2212 = vst.msk [vmem:[#allocation2 + $0xa9] sm:$0xff] %vm258_vm0, %v2180_v24  ;;  %2654 = vrot.lane.b32.xlu2 %v6332_v41, %s4380_s24 }
 0x3c2   : > { %v2138_v13 = vpop.f32.mrf.mxu2  ;;  %2296 = vst.msk [vmem:[#allocation2 + $0xa1] sm:$0x1] %vm314_vm1, %v2278_v12 }
 0x3c3   : > { %v2139_v30 = vadd.f32 %v6058_v31, %v2138_v13 }
 0x3c4   : > { %v2111_v56 = vpop.f32.mrf.mxu0 }
 0x3c5   : > { %v2190_v61 = vmax.f32 %v2139_v30, 0.0  ;;  %v2112_v55 = vadd.f32 %v6058_v31, %v2111_v56 }
 0x3c6   : > { %v2283_v48 = vld [vmem:[#allocation2 + $0x117] sm:$0x1] }
 0x3c7   : > { %2222 = vst.msk [vmem:[#allocation2 + $0x121] sm:$0xff] %vm258_vm0, %v2190_v61  ;;  %v2181_v50 = vmax.f32 %v2112_v55, 0.0  ;;  %v6406_v7 = vld [vmem:[#allocation2 + $0x111] sm:$0xff] }
 0x3c8   : > { %v6342_v49 = vld [vmem:[#allocation2 + $0xa9] sm:$0xff]  ;;  %2301 = vst.msk [vmem:[#allocation2 + $0x119] sm:$0x1] %vm314_vm1, %v2283_v48 }
 0x3c9   : > { %v2243_v53 = vld [vmem:[#allocation2 + $0xaa] sm:$0x1]  ;;  %2213 = vst.msk [vmem:[#allocation2 + $0xb1] sm:$0xff] %vm258_vm0, %v2181_v50  ;;  %2656 = vrot.lane.b32.xlu0 %v6342_v49, %s4380_s24 }
 0x3ca   : > { %v2141_v25 = vpop.f32.mrf.mxu2  ;;  %2261 = vst.msk [vmem:[#allocation2 + $0xa8] sm:$0x1] %vm314_vm1, %v2243_v53 }
 0x3cb   : > { %v2142_v8 = vadd.f32 %v6058_v31, %v2141_v25 }
 0x3cc   : > { %v2114_v42 = vpop.f32.mrf.mxu0 }
 0x3cd   : > { %v2191_v33 = vmax.f32 %v2142_v8, 0.0  ;;  %v2115_v26 = vadd.f32 %v6058_v31, %v2114_v42 }
 0x3ce   : > { %v2248_v17 = vld [vmem:[#allocation2 + $0x122] sm:$0x1] }
 0x3cf   : > { %2223 = vst.msk [vmem:[#allocation2 + $0x129] sm:$0xff] %vm258_vm0, %v2191_v33  ;;  %v2182_v40 = vmax.f32 %v2115_v26, 0.0  ;;  %v6393_v15 = vld [vmem:[#allocation2 + $0x121] sm:$0xff] }
 0x3d0   : > { %v6352_v29 = vld [vmem:[#allocation2 + $0xb1] sm:$0xff]  ;;  %2266 = vst.msk [vmem:[#allocation2 + $0x120] sm:$0x1] %vm314_vm1, %v2248_v17 }
 0x3d1   : > { %v2279_v0 = vld [vmem:[#allocation2 + $0xb7] sm:$0x1]  ;;  %2214 = vst.msk [vmem:[#allocation2 + $0xc1] sm:$0xff] %vm258_vm0, %v2182_v40  ;;  %2658 = vrot.lane.b32.xlu1 %v6352_v29, %s4380_s24  ;;  %v2373_v40 = vld [vmem:[#allocation2 + $0xa] sm:$0xff] }
 0x3d2   : > { %v2144_v38 = vpop.f32.mrf.mxu2  ;;  %2297 = vst.msk [vmem:[#allocation2 + $0xb9] sm:$0x1] %vm314_vm1, %v2279_v0 }
 0x3d3   : > { %v2145_v27 = vadd.f32 %v6058_v31, %v2144_v38 }
 0x3d4   : > { %v2117_v57 = vpop.f32.mrf.mxu0 }
 0x3d5   : > { %v2192_v39 = vmax.f32 %v2145_v27, 0.0  ;;  %v2118_v23 = vadd.f32 %v6058_v31, %v2117_v57  ;;  %v2372_v27 = vld [vmem:[#allocation2 + $0x2] sm:$0xff] }
 0x3d6   : > { %v2284_v28 = vld [vmem:[#allocation2 + $0x12f] sm:$0x1] }
 0x3d7   : > { %2224 = vst.msk [vmem:[#allocation2 + $0x139] sm:$0xff] %vm258_vm0, %v2192_v39  ;;  %v2183_v54 = vmax.f32 %v2118_v23, 0.0  ;;  %v6415_v36 = vld [vmem:[#allocation2 + $0x129] sm:$0xff] }
 0x3d8   : > { %v6364_v11 = vld [vmem:[#allocation2 + $0xc1] sm:$0xff]  ;;  %2302 = vst.msk [vmem:[#allocation2 + $0x131] sm:$0x1] %vm314_vm1, %v2284_v28 }
 0x3d9   : > { %v2244_v18 = vld [vmem:[#allocation2 + $0xc2] sm:$0x1]  ;;  %2215 = vst.msk [vmem:[#allocation2 + $0xc9] sm:$0xff] %vm258_vm0, %v2183_v54  ;;  %2664 = vrot.lane.b32.xlu1 %v6362_v37, %s4380_s24  ;;  %2660 = vrot.lane.b32.xlu2 %v6364_v11, %s4380_s24  ;;  %v6458_v54 = vld [vmem:[#allocation2 + $0x32] sm:$0xff] }
 0x3da   : > { %v2147_v14 = vpop.f32.mrf.mxu2  ;;  %2262 = vst.msk [vmem:[#allocation2 + $0xc0] sm:$0x1] %vm314_vm1, %v2244_v18  ;;  %v6460_v18 = vld [vmem:[#allocation2 + $0x1a] sm:$0xff] }
 0x3db   : > { %v2148_v6 = vadd.f32 %v6058_v31, %v2147_v14  ;;  %v6445_v17 = vpop.permute.xlu2 %2630  ;;  %v6466_v14 = vld [vmem:[#allocation2 + $0x22] sm:$0xff] }
 0x3dc   : > { %8337 = vst [vmem:[#allocation79_spill] sm:$0xff] %v6445_v17 }
 0x3dd   : > { %v2193_v35 = vmax.f32 %v2148_v6, 0.0 }
 0x3de   : > { %v2249_v3 = vld [vmem:[#allocation2 + $0x13a] sm:$0x1] }
 0x3df   : > { %2225 = vst.msk [vmem:[#allocation2 + $0x141] sm:$0xff] %vm258_vm0, %v2193_v35  ;;  %v6422_v13 = vld [vmem:[#allocation2 + $0x139] sm:$0xff] }
 0x3e0   : > { %v6375_v51 = vld [vmem:[#allocation2 + $0xc9] sm:$0xff]  ;;  %2267 = vst.msk [vmem:[#allocation2 + $0x138] sm:$0x1] %vm314_vm1, %v2249_v3  ;;  %v6475_v35 = vld [vmem:[#allocation2 + $0x52] sm:$0xff]  ;;  %v6477_v3 = vld [vmem:[#allocation2 + $0x3a] sm:$0xff] }
 0x3e1   : > { %v2280_v22 = vld [vmem:[#allocation2 + $0xcf] sm:$0x1]  ;;  %2662 = vrot.lane.b32.xlu0 %v6375_v51, %s4380_s24  ;;  %2670 = vrot.lane.b32.xlu1 %v6377_v62, %s4380_s24 }
 0x3e2   : > { %2298 = vst.msk [vmem:[#allocation2 + $0xd1] sm:$0x1] %vm314_vm1, %v2280_v22  ;;  %2666 = vrot.lane.b32.xlu2 %v6384_v9, %s4380_s24  ;;  %v2150_v21 = vpop.f32.mrf.mxu2  ;;  %v6483_v22 = vld [vmem:[#allocation2 + $0x4a] sm:$0xff] }
 0x3e3   : > { %v2151_v20 = vadd.f32 %v6058_v31, %v2150_v21  ;;  %v6469_v6 = vpop.permute.xlu2 %2636 }
 0x3e4   : > { %8338 = vst [vmem:[#allocation38_spill] sm:$0xff] %v6469_v6 }
 0x3e5   : > { %v2194_v60 = vmax.f32 %v2151_v20, 0.0 }
 0x3e6   : > { %v2285_v1 = vld [vmem:[#allocation2 + $0x147] sm:$0x1]  ;;  %v6596_v6 = vld [vmem:[#allocation2 + $0x13a] sm:$0xff] }
 0x3e7   : > { %2226 = vst.msk [vmem:[#allocation2 + $0x151] sm:$0xff] %vm258_vm0, %v2194_v60  ;;  %v6408_v44 = vld [vmem:[#allocation2 + $0x141] sm:$0xff] }
 0x3e8   : > { %2303 = vst.msk [vmem:[#allocation2 + $0x149] sm:$0x1] %vm314_vm1, %v2285_v1  ;;  %v6490_v60 = vld [vmem:[#allocation2 + $0x7a] sm:$0xff]  ;;  %v6492_v1 = vld [vmem:[#allocation2 + $0x62] sm:$0xff] }
 0x3e9   : > { %2668 = vrot.lane.b32.xlu0 %v6391_v47, %s4380_s24  ;;  %2676 = vrot.lane.b32.xlu1 %v6393_v15, %s4380_s24  ;;  %8357 = vst [vmem:[#allocation92_spill] sm:$0xff] %v6596_v6 }
 0x3ea   : > { %2672 = vrot.lane.b32.xlu2 %v6400_v52, %s4380_s24  ;;  %v2153_v32 = vpop.f32.mrf.mxu2 }
 0x3eb   : > { %v2154_v45 = vadd.f32 %v6058_v31, %v2153_v32  ;;  %v6488_v20 = vpop.permute.xlu2 %2642  ;;  %v6498_v32 = vld [vmem:[#allocation2 + $0x6a] sm:$0xff] }
 0x3ec   : > { %8340 = vst [vmem:[#allocation41_spill] sm:$0xff] %v6488_v20  ;;  %v6586_v20 = vld [vmem:[#allocation2 + $0x122] sm:$0xff] }
 0x3ed   : > { %v2195_v16 = vmax.f32 %v2154_v45, 0.0 }
 0x3ee   : > { %v2250_v5 = vld [vmem:[#allocation2 + $0x152] sm:$0x1] }
 0x3ef   : > { %2227 = vst.msk [vmem:[#allocation2 + $0x159] sm:$0xff] %vm258_vm0, %v2195_v16  ;;  %v6426_v30 = vld [vmem:[#allocation2 + $0x151] sm:$0xff] }
 0x3f0   : > { %2268 = vst.msk [vmem:[#allocation2 + $0x150] sm:$0x1] %vm314_vm1, %v2250_v5  ;;  %v6506_v5 = vld [vmem:[#allocation2 + $0x9a] sm:$0xff] }
 0x3f1   : > { %2674 = vrot.lane.b32.xlu0 %v6406_v7, %s4380_s24  ;;  %2682 = vrot.lane.b32.xlu1 %v6408_v44, %s4380_s24 }
 0x3f2   : > { %2678 = vrot.lane.b32.xlu2 %v6415_v36, %s4380_s24  ;;  %v2156_v10 = vpop.f32.mrf.mxu2 }
 0x3f3   : > { %v2157_v63 = vadd.f32 %v6058_v31, %v2156_v10  ;;  %v6508_v10 = vld [vmem:[#allocation2 + $0x82] sm:$0xff] }
 0x3f5   : > { %v2196_v24 = vmax.f32 %v2157_v63, 0.0  ;;  %v6514_v63 = vld [vmem:[#allocation2 + $0x92] sm:$0xff] }
 0x3f6   : > { %v2286_v12 = vld [vmem:[#allocation2 + $0x15f] sm:$0x1] }
 0x3f7   : > { %2234 = vst.msk [vmem:[#allocation2 + $0x199] sm:$0xff] %vm258_vm0, %v2196_v24  ;;  %v6438_v25 = vld [vmem:[#allocation2 + $0x159] sm:$0xff] }
 0x3f8   : > { %2228 = vst.msk [vmem:[#allocation2 + $0x169] sm:$0xff] %vm258_vm0, %v2196_v24  ;;  %v6518_v24 = vpop.permute.xlu0 %2632 }
 0x3f9   : > { %2680 = vrot.lane.b32.xlu0 %v6422_v13, %s4380_s24  ;;  %2304 = vst.msk [vmem:[#allocation2 + $0x161] sm:$0x1] %vm314_vm1, %v2286_v12 }
 0x3fa   : > { %2684 = vrot.lane.b32.xlu2 %v6426_v30, %s4380_s24  ;;  %v2159_v56 = vpop.f32.mrf.mxu2  ;;  %8343 = vst [vmem:[#allocation85_spill] sm:$0xff] %v6518_v24  ;;  %v6604_v24 = vld [vmem:[#allocation2 + $0x142] sm:$0xff] }
 0x3fb   : > { %v2160_v61 = vadd.f32 %v6058_v31, %v2159_v56 }
 0x3fd   : > { %v2197_v55 = vmax.f32 %v2160_v61, 0.0  ;;  %v6524_v61 = vld [vmem:[#allocation2 + $0xc2] sm:$0xff] }
 0x3fe   : > { %v2253_v53 = vld [vmem:[#allocation2 + $0x19a] sm:$0x1] }
 0x3ff   : > { %2235 = vst.msk [vmem:[#allocation2 + $0x1a1] sm:$0xff] %vm258_vm0, %v2197_v55  ;;  %v6433_v48 = vld [vmem:[#allocation2 + $0x169] sm:$0xff] }
 0x400   : > { %v2251_v50 = vld [vmem:[#allocation2 + $0x16a] sm:$0x1]  ;;  %2229 = vst.msk [vmem:[#allocation2 + $0x171] sm:$0xff] %vm258_vm0, %v2197_v55  ;;  %2688 = vrot.lane.b32.xlu1 %v6433_v48, %s4380_s24 }
 0x401   : > { %2686 = vrot.lane.b32.xlu0 %v6438_v25, %s4380_s24  ;;  %2269 = vst.msk [vmem:[#allocation2 + $0x168] sm:$0x1] %vm314_vm1, %v2251_v50  ;;  %v6526_v55 = vld [vmem:[#allocation2 + $0xaa] sm:$0xff]  ;;  %v6532_v50 = vld [vmem:[#allocation2 + $0xb2] sm:$0xff] }
 0x402   : > { %v2162_v8 = vpop.f32.mrf.mxu2  ;;  %2271 = vst.msk [vmem:[#allocation2 + $0x198] sm:$0x1] %vm314_vm1, %v2253_v53  ;;  %v6536_v53 = vpop.permute.xlu0 %2638 }
 0x403   : > { %v2163_v42 = vadd.f32 %v6058_v31, %v2162_v8  ;;  %v6504_v16 = vpop.permute.xlu2 %2648  ;;  %8346 = vst [vmem:[#allocation42_spill] sm:$0xff] %v6536_v53  ;;  %v6594_v53 = vld [vmem:[#allocation2 + $0x152] sm:$0xff] }
 0x404   : > { %8342 = vst [vmem:[#allocation33_spill] sm:$0xff] %v6504_v16 }
 0x405   : > { %v2198_v33 = vmax.f32 %v2163_v42, 0.0  ;;  %8356 = vst [vmem:[#allocation91_spill] sm:$0xff] %v6594_v53 }
 0x406   : > { %v2289_v26 = vld [vmem:[#allocation2 + $0x1a7] sm:$0x1] }
 0x407   : > { %2230 = vst.msk [vmem:[#allocation2 + $0x181] sm:$0xff] %vm258_vm0, %v2198_v33  ;;  %v6448_v0 = vld [vmem:[#allocation2 + $0x171] sm:$0xff]  ;;  %v6542_v33 = vld [vmem:[#allocation2 + $0xe2] sm:$0xff] }
 0x408   : > { %v2287_v38 = vld [vmem:[#allocation2 + $0x177] sm:$0x1]  ;;  %2758 = vrot.lane.b32.xlu1 %v2373_v40, %s4381_s25  ;;  %2690 = vrot.lane.b32.xlu2 %v6448_v0, %s4380_s24  ;;  %2307 = vst.msk [vmem:[#allocation2 + $0x1a9] sm:$0x1] %vm314_vm1, %v2289_v26  ;;  %v6544_v26 = vld [vmem:[#allocation2 + $0xca] sm:$0xff]  ;;  %v6550_v40 = vld [vmem:[#allocation2 + $0xda] sm:$0xff] }
 0x409   : > { %2305 = vst.msk [vmem:[#allocation2 + $0x179] sm:$0x1] %vm314_vm1, %v2287_v38  ;;  %2756 = vrot.lane.b32.xlu0 %v2372_v27, %s4381_s25 }
 0x40a   : > { %v2165_v57 = vpop.f32.mrf.mxu2 }
 0x40b   : > { %v2166_v39 = vadd.f32 %v6058_v31, %v2165_v57  ;;  %v6473_v31 = vpop.permute.xlu1 %2628  ;;  %v6554_v38 = vpop.permute.xlu0 %2644 }
 0x40c   : > { %8339 = vst [vmem:[#allocation81_spill] sm:$0xff] %v6473_v31 }
 0x40d   : > { %v2199_v23 = vmax.f32 %v2166_v39, 0.0  ;;  %8349 = vst [vmem:[#allocation103_spill] sm:$0xff] %v6554_v38  ;;  %v6560_v39 = vld [vmem:[#allocation2 + $0x10a] sm:$0xff]  ;;  %v6580_v38 = vld [vmem:[#allocation2 + $0x112] sm:$0xff] }
 0x40e   : > { %v2252_v28 = vld [vmem:[#allocation2 + $0x182] sm:$0x1] }
 0x40f   : > { %2231 = vst.msk [vmem:[#allocation2 + $0x189] sm:$0xff] %vm258_vm0, %v2199_v23  ;;  %v6562_v23 = vld [vmem:[#allocation2 + $0xf2] sm:$0xff] }
 0x410   : > { %2764 = vrot.lane.b32.xlu1 %v6458_v54, %s4381_s25  ;;  %2760 = vrot.lane.b32.xlu2 %v6460_v18, %s4381_s25  ;;  %2270 = vst.msk [vmem:[#allocation2 + $0x180] sm:$0x1] %vm314_vm1, %v2252_v28  ;;  %v6568_v28 = vld [vmem:[#allocation2 + $0xfa] sm:$0xff] }
 0x411   : > { %2762 = vrot.lane.b32.xlu0 %v6466_v14, %s4381_s25 }
 0x413   : > { %v6500_v45 = vpop.permute.xlu1 %2634 }
 0x414   : > { %8341 = vst [vmem:[#allocation67_spill] sm:$0xff] %v6500_v45 }
 0x416   : > { %v2288_v21 = vld [vmem:[#allocation2 + $0x18f] sm:$0x1] }
 0x417   : > { %2306 = vst.msk [vmem:[#allocation2 + $0x191] sm:$0x1] %vm314_vm1, %v2288_v21 }
 0x418   : > { %2770 = vrot.lane.b32.xlu1 %v6475_v35, %s4381_s25  ;;  %2766 = vrot.lane.b32.xlu2 %v6477_v3, %s4381_s25 }
 0x419   : > { %2768 = vrot.lane.b32.xlu0 %v6483_v22, %s4381_s25 }
 0x41b   : > { %v6520_v12 = vpop.permute.xlu1 %2640  ;;  %v6522_v56 = vpop.permute.xlu2 %2654 }
 0x41c   : > { %8344 = vst [vmem:[#allocation34_spill] sm:$0xff] %v6520_v12 }
 0x41d   : > { %8345 = vst [vmem:[#allocation87_spill] sm:$0xff] %v6522_v56 }
 0x420   : > { %2776 = vrot.lane.b32.xlu1 %v6490_v60, %s4381_s25  ;;  %2772 = vrot.lane.b32.xlu2 %v6492_v1, %s4381_s25 }
 0x421   : > { %2774 = vrot.lane.b32.xlu0 %v6498_v32, %s4381_s25 }
 0x423   : > { %v6538_v8 = vpop.permute.xlu1 %2646  ;;  %v6572_v21 = vpop.permute.xlu0 %2650 }
 0x424   : > { %8347 = vst [vmem:[#allocation55_spill] sm:$0xff] %v6538_v8  ;;  %v6578_v8 = vld [vmem:[#allocation2 + $0x12a] sm:$0xff] }
 0x425   : > { %8352 = vst [vmem:[#allocation90_spill] sm:$0xff] %v6572_v21 }
 0x428   : > { %2782 = vrot.lane.b32.xlu1 %v6506_v5, %s4381_s25  ;;  %2778 = vrot.lane.b32.xlu2 %v6508_v10, %s4381_s25 }
 0x429   : > { %2780 = vrot.lane.b32.xlu0 %v6514_v63, %s4381_s25 }
 0x42b   : > { %v6556_v27 = vpop.permute.xlu1 %2652 }
 0x42c   : > { %8350 = vst [vmem:[#allocation43_spill] sm:$0xff] %v6556_v27 }
 0x430   : > { %2788 = vrot.lane.b32.xlu1 %v6524_v61, %s4381_s25  ;;  %2784 = vrot.lane.b32.xlu2 %v6526_v55, %s4381_s25 }
 0x431   : > { %2786 = vrot.lane.b32.xlu0 %v6532_v50, %s4381_s25 }
 0x433   : > { %v6540_v42 = vpop.permute.xlu2 %2660 }
 0x434   : > { %8348 = vst [vmem:[#allocation70_spill] sm:$0xff] %v6540_v42  ;;  %v2403_v42 = vld [vmem:[#allocation2 + $0x172] sm:$0xff] }
 0x438   : > { %2794 = vrot.lane.b32.xlu1 %v6542_v33, %s4381_s25  ;;  %2790 = vrot.lane.b32.xlu2 %v6544_v26, %s4381_s25 }
 0x439   : > { %2792 = vrot.lane.b32.xlu0 %v6550_v40, %s4381_s25 }
 0x43b   : > { %v6590_v21 = vpop.permute.xlu0 %2656 }
 0x43c   : > { %v6558_v57 = vpop.permute.xlu2 %2666  ;;  %8354 = vst [vmem:[#allocation35_spill] sm:$0xff] %v6590_v21  ;;  %v2310_v21 = vld [vmem:[#allocation2 + $0x18] sm:$0xff] }
 0x43d   : > { %8351 = vst [vmem:[#allocation44_spill] sm:$0xff] %v6558_v57 }
 0x440   : > { %2800 = vrot.lane.b32.xlu1 %v6560_v39, %s4381_s25  ;;  %2796 = vrot.lane.b32.xlu2 %v6562_v23, %s4381_s25 }
 0x441   : > { %2798 = vrot.lane.b32.xlu0 %v6568_v28, %s4381_s25 }
 0x443   : > { %v6574_v27 = vpop.permute.xlu1 %2658 }
 0x444   : > { %v6576_v16 = vpop.permute.xlu2 %2672 }
 0x445   : > { %8353 = vst [vmem:[#allocation105_spill] sm:$0xff] %v6576_v16  ;;  %v6612_v16 = vld [vmem:[#allocation2 + $0x15a] sm:$0xff] }
 0x446   : > { %8361 = vst [vmem:[#allocation164_spill] sm:$0xff] %v6612_v16 }
 0x448   : > { %2806 = vrot.lane.b32.xlu1 %v6578_v8, %s4381_s25  ;;  %2802 = vrot.lane.b32.xlu2 %v6580_v38, %s4381_s25 }
 0x449   : > { %2804 = vrot.lane.b32.xlu0 %v6586_v20, %s4381_s25 }
 0x44b   : > { %v6592_v12 = vpop.permute.xlu1 %2664 }
 0x44c   : > { %8355 = vst [vmem:[#allocation59_spill] sm:$0xff] %v6592_v12  ;;  %v6598_v45 = vpop.permute.xlu2 %2678  ;;  %v2313_v12 = vld [vmem:[#allocation2 + $0x38] sm:$0xff] }
 0x44d   : > { %8358 = vst [vmem:[#allocation56_spill] sm:$0xff] %v6598_v45  ;;  %v6617_v45 = vld [vmem:[#allocation2 + $0x16a] sm:$0xff] }
 0x44e   : > { %8362 = vst [vmem:[#allocation174_spill] sm:$0xff] %v6617_v45 }
 0x450   : > { %2812 = vrot.lane.b32.xlu1 %v6594_v53, %s4381_s25  ;;  %2808 = vrot.lane.b32.xlu2 %v6596_v6, %s4381_s25  ;;  %v2435_v6 = vld [vmem:[#allocation2 + $0x188] sm:$0xff] }
 0x451   : > { %2810 = vrot.lane.b32.xlu0 %v6604_v24, %s4381_s25 }
 0x453   : > { %v6608_v17 = vpop.permute.xlu0 %2662  ;;  %v6610_v31 = vpop.permute.xlu1 %2670 }
 0x454   : > { %8359 = vst [vmem:[#allocation83_spill] sm:$0xff] %v6608_v17  ;;  %v6621_v57 = vpop.permute.xlu2 %2684  ;;  %v2312_v17 = vld [vmem:[#allocation2 + $0x30] sm:$0xff] }
 0x455   : > { %8360 = vst [vmem:[#allocation88_spill] sm:$0xff] %v6610_v31  ;;  %v2311_v31 = vld [vmem:[#allocation2 + $0x20] sm:$0xff] }
 0x456   : > { %8363 = vst [vmem:[#allocation183_spill] sm:$0xff] %v6621_v57  ;;  %v2314_v57 = vld [vmem:[#allocation2 + $0x48] sm:$0xff] }
 0x458   : > { %2818 = vrot.lane.b32.xlu1 %v2403_v42, %s4381_s25  ;;  %2814 = vrot.lane.b32.xlu2 %v6612_v16, %s4381_s25 }
 0x459   : > { %2816 = vrot.lane.b32.xlu0 %v6617_v45, %s4381_s25  ;;  %v2315_v45 = vld [vmem:[#allocation2 + $0x50] sm:$0xff] }
 0x45b   : > { %v6623_v56 = vpop.permute.xlu0 %2668  ;;  %v6625_v53 = vpop.permute.xlu1 %2676 }
 0x45c   : > { %8364 = vst [vmem:[#allocation45_spill] sm:$0xff] %v6623_v56  ;;  %v2316_v56 = vld [vmem:[#allocation2 + $0x60] sm:$0xff] }
 0x45d   : > { %8365 = vst [vmem:[#allocation61_spill] sm:$0xff] %v6625_v53 }
 0x460   : > { %2884 = vrot.lane.b32.xlu2 %v2310_v21, %s4382_s26  ;;  %2888 = vrot.lane.b32.xlu1 %v2312_v17, %s4382_s26 }
 0x461   : > { %2886 = vrot.lane.b32.xlu0 %v2311_v31, %s4382_s26  ;;  %v2318_v31 = vld [vmem:[#allocation2 + $0x78] sm:$0xff] }
 0x462   : > { %v6630_v42 = vpop.permute.xlu2 %2690 }
 0x463   : > { %8366 = vst [vmem:[#allocation74_spill] sm:$0xff] %v6630_v42  ;;  %v6632_v16 = vpop.permute.xlu0 %2674  ;;  %v6637_v53 = vpop.permute.xlu1 %2682  ;;  %v2317_v42 = vld [vmem:[#allocation2 + $0x68] sm:$0xff] }
 0x464   : > { %8367 = vst [vmem:[#allocation108_spill] sm:$0xff] %v6632_v16  ;;  %v6652_v16 = vld [vmem:[#allocation2 + $0x98] sm:$0xff] }
 0x465   : > { %8368 = vst [vmem:[#allocation120_spill] sm:$0xff] %v6637_v53  ;;  %v2320_v53 = vld [vmem:[#allocation2 + $0x90] sm:$0xff] }
 0x466   : > { %8374 = vst [vmem:[#allocation165_spill] sm:$0xff] %v6652_v16 }
 0x468   : > { %2890 = vrot.lane.b32.xlu2 %v2313_v12, %s4382_s26  ;;  %2894 = vrot.lane.b32.xlu1 %v2315_v45, %s4382_s26 }
 0x469   : > { %2892 = vrot.lane.b32.xlu0 %v2314_v57, %s4382_s26 }
 0x46a   : > { %v6639_v21 = vpop.permute.xlu2 %2760 }
 0x46b   : > { %8369 = vst [vmem:[#allocation121_spill] sm:$0xff] %v6639_v21  ;;  %v6641_v17 = vpop.permute.xlu0 %2680  ;;  %v2319_v21 = vld [vmem:[#allocation2 + $0x80] sm:$0xff] }
 0x46c   : > { %8370 = vst [vmem:[#allocation140_spill] sm:$0xff] %v6641_v17  ;;  %v6666_v17 = vld [vmem:[#allocation2 + $0xa8] sm:$0xff] }
 0x46d   : > { %8379 = vst [vmem:[#allocation95_spill] sm:$0xff] %v6666_v17 }
 0x470   : > { %2896 = vrot.lane.b32.xlu2 %v2316_v56, %s4382_s26  ;;  %2900 = vrot.lane.b32.xlu1 %v2318_v31, %s4382_s26 }
 0x471   : > { %2898 = vrot.lane.b32.xlu0 %v2317_v42, %s4382_s26 }
 0x472   : > { %v6646_v12 = vpop.permute.xlu1 %2688  ;;  %v6648_v45 = vpop.permute.xlu2 %2766 }
 0x473   : > { %8371 = vst [vmem:[#allocation62_spill] sm:$0xff] %v6646_v12  ;;  %v6650_v57 = vpop.permute.xlu0 %2686  ;;  %v6704_v12 = vld [vmem:[#allocation2 + $0xf8] sm:$0xff] }
 0x474   : > { %8372 = vst [vmem:[#allocation76_spill] sm:$0xff] %v6648_v45  ;;  %v6664_v45 = vld [vmem:[#allocation2 + $0xc0] sm:$0xff] }
 0x475   : > { %8373 = vst [vmem:[#allocation106_spill] sm:$0xff] %v6650_v57  ;;  %v6668_v57 = vld [vmem:[#allocation2 + $0xb0] sm:$0xff] }
 0x476   : > { %8378 = vst [vmem:[#allocation47_spill] sm:$0xff] %v6664_v45 }
 0x477   : > { %8391 = vst [vmem:[#allocation37_spill] sm:$0xff] %v6704_v12 }
 0x478   : > { %2902 = vrot.lane.b32.xlu2 %v2319_v21, %s4382_s26  ;;  %2906 = vrot.lane.b32.xlu1 %v6652_v16, %s4382_s26  ;;  %v6686_v16 = vld [vmem:[#allocation2 + $0xd8] sm:$0xff] }
 0x479   : > { %2904 = vrot.lane.b32.xlu0 %v2320_v53, %s4382_s26  ;;  %8385 = vst [vmem:[#allocation89_spill] sm:$0xff] %v6686_v16 }
 0x47a   : > { %v6658_v56 = vpop.permute.xlu1 %2758  ;;  %v6660_v42 = vpop.permute.xlu2 %2772 }
 0x47b   : > { %8375 = vst [vmem:[#allocation166_spill] sm:$0xff] %v6658_v56  ;;  %v6662_v31 = vpop.permute.xlu0 %2756  ;;  %v6682_v56 = vld [vmem:[#allocation2 + $0xe0] sm:$0xff] }
 0x47c   : > { %8376 = vst [vmem:[#allocation187_spill] sm:$0xff] %v6660_v42 }
 0x47d   : > { %8377 = vst [vmem:[#allocation46_spill] sm:$0xff] %v6662_v31  ;;  %v6684_v31 = vld [vmem:[#allocation2 + $0xc8] sm:$0xff] }
 0x47e   : > { %8383 = vst [vmem:[#allocation141_spill] sm:$0xff] %v6682_v56 }
 0x47f   : > { %8384 = vst [vmem:[#allocation142_spill] sm:$0xff] %v6684_v31 }
 0x480   : > { %2908 = vrot.lane.b32.xlu2 %v6666_v17, %s4382_s26  ;;  %2912 = vrot.lane.b32.xlu1 %v6664_v45, %s4382_s26  ;;  %v6700_v45 = vld [vmem:[#allocation2 + $0x108] sm:$0xff]  ;;  %v6702_v17 = vld [vmem:[#allocation2 + $0xf0] sm:$0xff] }
 0x481   : > { %2910 = vrot.lane.b32.xlu0 %v6668_v57, %s4382_s26  ;;  %8389 = vst [vmem:[#allocation188_spill] sm:$0xff] %v6700_v45 }
 0x482   : > { %v6676_v53 = vpop.permute.xlu1 %2764  ;;  %v6678_v21 = vpop.permute.xlu2 %2778  ;;  %8390 = vst [vmem:[#allocation189_spill] sm:$0xff] %v6702_v17 }
 0x483   : > { %8380 = vst [vmem:[#allocation110_spill] sm:$0xff] %v6676_v53  ;;  %v6680_v42 = vpop.permute.xlu0 %2762 }
 0x484   : > { %8381 = vst [vmem:[#allocation118_spill] sm:$0xff] %v6678_v21 }
 0x485   : > { %8382 = vst [vmem:[#allocation129_spill] sm:$0xff] %v6680_v42 }
 0x488   : > { %2914 = vrot.lane.b32.xlu2 %v6684_v31, %s4382_s26  ;;  %2918 = vrot.lane.b32.xlu1 %v6682_v56, %s4382_s26  ;;  %v6720_v31 = vld [vmem:[#allocation2 + $0x110] sm:$0xff] }
 0x489   : > { %2916 = vrot.lane.b32.xlu0 %v6686_v16, %s4382_s26  ;;  %8396 = vst [vmem:[#allocation131_spill] sm:$0xff] %v6720_v31  ;;  %v6722_v16 = vld [vmem:[#allocation2 + $0x120] sm:$0xff] }
 0x48a   : > { %v6694_v53 = vpop.permute.xlu1 %2770  ;;  %v6696_v21 = vpop.permute.xlu2 %2784  ;;  %8397 = vst [vmem:[#allocation138_spill] sm:$0xff] %v6722_v16 }
 0x48b   : > { %8386 = vst [vmem:[#allocation154_spill] sm:$0xff] %v6694_v53  ;;  %v6698_v42 = vpop.permute.xlu0 %2768 }
 0x48c   : > { %8387 = vst [vmem:[#allocation162_spill] sm:$0xff] %v6696_v21  ;;  %v6718_v21 = vld [vmem:[#allocation2 + $0x128] sm:$0xff] }
 0x48d   : > { %8388 = vst [vmem:[#allocation175_spill] sm:$0xff] %v6698_v42 }
 0x48e   : > { %8395 = vst [vmem:[#allocation122_spill] sm:$0xff] %v6718_v21 }
 0x490   : > { %2920 = vrot.lane.b32.xlu2 %v6702_v17, %s4382_s26  ;;  %2924 = vrot.lane.b32.xlu1 %v6700_v45, %s4382_s26  ;;  %v6738_v17 = vld [vmem:[#allocation2 + $0x138] sm:$0xff] }
 0x491   : > { %2922 = vrot.lane.b32.xlu0 %v6704_v12, %s4382_s26  ;;  %v6736_v12 = vld [vmem:[#allocation2 + $0x150] sm:$0xff]  ;;  %8402 = vst [vmem:[#allocation177_spill] sm:$0xff] %v6738_v17 }
 0x492   : > { %v6712_v53 = vpop.permute.xlu1 %2776  ;;  %v6714_v56 = vpop.permute.xlu2 %2790  ;;  %8401 = vst [vmem:[#allocation167_spill] sm:$0xff] %v6736_v12 }
 0x493   : > { %8392 = vst [vmem:[#allocation63_spill] sm:$0xff] %v6712_v53  ;;  %v6716_v42 = vpop.permute.xlu0 %2774 }
 0x494   : > { %8393 = vst [vmem:[#allocation96_spill] sm:$0xff] %v6714_v56  ;;  %v6740_v56 = vld [vmem:[#allocation2 + $0x140] sm:$0xff] }
 0x495   : > { %8394 = vst [vmem:[#allocation97_spill] sm:$0xff] %v6716_v42 }
 0x496   : > { %8403 = vst [vmem:[#allocation185_spill] sm:$0xff] %v6740_v56 }
 0x498   : > { %2926 = vrot.lane.b32.xlu2 %v6720_v31, %s4382_s26  ;;  %2930 = vrot.lane.b32.xlu1 %v6718_v21, %s4382_s26  ;;  %v6756_v31 = vld [vmem:[#allocation2 + $0x168] sm:$0xff] }
 0x499   : > { %2928 = vrot.lane.b32.xlu0 %v6722_v16, %s4382_s26  ;;  %v6754_v16 = vld [vmem:[#allocation2 + $0x158] sm:$0xff]  ;;  %8407 = vst [vmem:[#allocation111_spill] sm:$0xff] %v6756_v31 }
 0x49a   : > { %v6730_v53 = vpop.permute.xlu1 %2782  ;;  %v6732_v45 = vpop.permute.xlu2 %2796  ;;  %8406 = vst [vmem:[#allocation80_spill] sm:$0xff] %v6754_v16 }
 0x49b   : > { %8398 = vst [vmem:[#allocation145_spill] sm:$0xff] %v6730_v53  ;;  %v6734_v42 = vpop.permute.xlu0 %2780  ;;  %v2339_v53 = vld [vmem:[#allocation2 + $0x170] sm:$0xff] }
 0x49c   : > { %8399 = vst [vmem:[#allocation93_spill] sm:$0xff] %v6732_v45 }
 0x49d   : > { %8400 = vst [vmem:[#allocation94_spill] sm:$0xff] %v6734_v42 }
 0x4a0   : > { %2932 = vrot.lane.b32.xlu2 %v6738_v17, %s4382_s26  ;;  %2936 = vrot.lane.b32.xlu1 %v6736_v12, %s4382_s26 }
 0x4a1   : > { %2934 = vrot.lane.b32.xlu0 %v6740_v56, %s4382_s26  ;;  %v2436_v56 = vld [vmem:[#allocation2 + $0x19] sm:$0xff] }
 0x4a2   : > { %v6748_v21 = vpop.permute.xlu1 %2788  ;;  %v6750_v45 = vpop.permute.xlu2 %2802 }
 0x4a3   : > { %8404 = vst [vmem:[#allocation48_spill] sm:$0xff] %v6748_v21  ;;  %v6752_v42 = vpop.permute.xlu0 %2786 }
 0x4a4   : > { %8405 = vst [vmem:[#allocation65_spill] sm:$0xff] %v6750_v45  ;;  %v2434_v45 = vld [vmem:[#allocation2 + $0x180] sm:$0xff] }
 0x4a8   : > { %2938 = vrot.lane.b32.xlu2 %v6754_v16, %s4382_s26  ;;  %2942 = vrot.lane.b32.xlu1 %v2339_v53, %s4382_s26 }
 0x4a9   : > { %2940 = vrot.lane.b32.xlu0 %v6756_v31, %s4382_s26 }
 0x4aa   : > { %v6763_v12 = vpop.permute.xlu1 %2794  ;;  %v6765_v21 = vpop.permute.xlu2 %2808 }
 0x4ab   : > { %8408 = vst [vmem:[#allocation123_spill] sm:$0xff] %v6763_v12  ;;  %v6767_v17 = vpop.permute.xlu0 %2792  ;;  %v6778_v12 = vld [vmem:[#allocation2 + $0x39] sm:$0xff] }
 0x4b0   : > { %2944 = vrot.lane.b32.xlu2 %v2434_v45, %s4382_s26  ;;  %3012 = vrot.lane.b32.xlu1 %v2436_v56, %s4383_s27 }
 0x4b1   : > { %2946 = vrot.lane.b32.xlu0 %v2435_v6, %s4382_s26 }
 0x4b2   : > { %v6772_v16 = vpop.permute.xlu1 %2800  ;;  %v6774_v53 = vpop.permute.xlu2 %2814 }
 0x4b3   : > { %8409 = vst [vmem:[#allocation124_spill] sm:$0xff] %v6772_v16  ;;  %v6776_v31 = vpop.permute.xlu0 %2798  ;;  %v6792_v16 = vld [vmem:[#allocation2 + $0x49] sm:$0xff] }
 0x4b8   : > { %3014 = vrot.lane.b32.xlu2 %v6244_v34, %s4383_s27  ;;  %3018 = vrot.lane.b32.xlu1 %v6778_v12, %s4383_s27 }
 0x4b9   : > { %3016 = vrot.lane.b32.xlu0 %v6266_v46, %s4383_s27 }
 0x4ba   : > { %v6786_v45 = vpop.permute.xlu1 %2806  ;;  %v6788_v6 = vpop.permute.xlu2 %2884 }
 0x4bb   : > { %8410 = vst [vmem:[#allocation51_spill] sm:$0xff] %v6786_v45  ;;  %v6790_v56 = vpop.permute.xlu0 %2804 }
 0x4bc   : > { %8411 = vst [vmem:[#allocation146_spill] sm:$0xff] %v6788_v6 }
 0x4c0   : > { %3020 = vrot.lane.b32.xlu2 %v6792_v16, %s4383_s27  ;;  %3024 = vrot.lane.b32.xlu1 %v6283_v58, %s4383_s27 }
 0x4c1   : > { %3022 = vrot.lane.b32.xlu0 %v6274_v2, %s4383_s27 }
 0x4c2   : > { %v6800_v34 = vpop.permute.xlu1 %2812  ;;  %v6802_v46 = vpop.permute.xlu2 %2890 }
 0x4c3   : > { %v6804_v45 = vpop.permute.xlu0 %2810 }
 0x4c8   : > { %3026 = vrot.lane.b32.xlu2 %v6292_v59, %s4383_s27  ;;  %3030 = vrot.lane.b32.xlu1 %v6312_v19, %s4383_s27 }
 0x4c9   : > { %3028 = vrot.lane.b32.xlu0 %v6302_v4, %s4383_s27 }
 0x4ca   : > { %v6812_v6 = vpop.permute.xlu1 %2818  ;;  %v6814_v58 = vpop.permute.xlu2 %2896 }
 0x4cb   : > { %8412 = vst [vmem:[#allocation77_spill] sm:$0xff] %v6812_v6  ;;  %v6816_v2 = vpop.permute.xlu0 %2816  ;;  %v6890_v6 = vld [vmem:[#allocation2 + $0x181] sm:$0xff] }
 0x4cc   : > { %8413 = vst [vmem:[#allocation155_spill] sm:$0xff] %v6814_v58 }
 0x4d0   : > { %3032 = vrot.lane.b32.xlu2 %v6322_v43, %s4383_s27  ;;  %3036 = vrot.lane.b32.xlu1 %v6342_v49, %s4383_s27 }
 0x4d1   : > { %3034 = vrot.lane.b32.xlu0 %v6332_v41, %s4383_s27 }
 0x4d2   : > { %v6824_v59 = vpop.permute.xlu2 %2902  ;;  %v6826_v19 = vpop.permute.xlu1 %2888 }
 0x4d3   : > { %8414 = vst [vmem:[#allocation168_spill] sm:$0xff] %v6824_v59  ;;  %v6828_v4 = vpop.permute.xlu0 %2886  ;;  %v8431_v59 = vld [vmem:[#allocation92_spill] sm:$0xff] }
 0x4d8   : > { %3038 = vrot.lane.b32.xlu2 %v6352_v29, %s4383_s27  ;;  %3042 = vrot.lane.b32.xlu1 %v6375_v51, %s4383_s27 }
 0x4d9   : > { %3040 = vrot.lane.b32.xlu0 %v6364_v11, %s4383_s27 }
 0x4da   : > { %v6836_v43 = vpop.permute.xlu2 %2908  ;;  %v6838_v49 = vpop.permute.xlu1 %2894 }
 0x4db   : > { %8415 = vst [vmem:[#allocation169_spill] sm:$0xff] %v6836_v43  ;;  %v6840_v41 = vpop.permute.xlu0 %2892  ;;  %v6904_v43 = vld [vmem:[#allocation2 + $0x189] sm:$0xff] }
 0x4dc   : > { %8416 = vst [vmem:[#allocation190_spill] sm:$0xff] %v6838_v49 }
 0x4dd   : > { %8421 = vst [vmem:[#allocation112_spill] sm:$0xff] %v6904_v43 }
 0x4e0   : > { %3044 = vrot.lane.b32.xlu2 %v6362_v37, %s4383_s27  ;;  %3048 = vrot.lane.b32.xlu1 %v6391_v47, %s4383_s27 }
 0x4e1   : > { %3046 = vrot.lane.b32.xlu0 %v6384_v9, %s4383_s27 }
 0x4e2   : > { %v6848_v29 = vpop.permute.xlu2 %2914  ;;  %v6850_v51 = vpop.permute.xlu1 %2900 }
 0x4e3   : > { %8417 = vst [vmem:[#allocation36_spill] sm:$0xff] %v6850_v51  ;;  %v6852_v11 = vpop.permute.xlu0 %2898  ;;  %v8433_v51 = vld [vmem:[#allocation89_spill] sm:$0xff] }
 0x4e4   : > { %8418 = vst [vmem:[#allocation49_spill] sm:$0xff] %v6852_v11 }
 0x4e8   : > { %3050 = vrot.lane.b32.xlu2 %v6377_v62, %s4383_s27  ;;  %3054 = vrot.lane.b32.xlu1 %v6406_v7, %s4383_s27 }
 0x4e9   : > { %3052 = vrot.lane.b32.xlu0 %v6400_v52, %s4383_s27 }
 0x4ea   : > { %v6860_v37 = vpop.permute.xlu2 %2920  ;;  %v6862_v47 = vpop.permute.xlu1 %2906 }
 0x4eb   : > { %8419 = vst [vmem:[#allocation50_spill] sm:$0xff] %v6862_v47  ;;  %v6864_v9 = vpop.permute.xlu0 %2904 }
 0x4ec   : > { %8420 = vst [vmem:[#allocation100_spill] sm:$0xff] %v6864_v9 }
 0x4f0   : > { %3056 = vrot.lane.b32.xlu2 %v6393_v15, %s4383_s27  ;;  %3060 = vrot.lane.b32.xlu1 %v6422_v13, %s4383_s27 }
 0x4f1   : > { %3058 = vrot.lane.b32.xlu0 %v6415_v36, %s4383_s27 }
 0x4f2   : > { %v6872_v62 = vpop.permute.xlu2 %2926  ;;  %v6874_v7 = vpop.permute.xlu1 %2912 }
 0x4f3   : > { %v6876_v52 = vpop.permute.xlu0 %2910 }
 0x4f8   : > { %3062 = vrot.lane.b32.xlu2 %v6408_v44, %s4383_s27  ;;  %3066 = vrot.lane.b32.xlu1 %v6438_v25, %s4383_s27 }
 0x4f9   : > { %3064 = vrot.lane.b32.xlu0 %v6426_v30, %s4383_s27 }
 0x4fa   : > { %v6884_v15 = vpop.permute.xlu2 %2932  ;;  %v6886_v13 = vpop.permute.xlu1 %2918 }
 0x4fb   : > { %v6888_v36 = vpop.permute.xlu0 %2916 }
 0x500   : > { %3068 = vrot.lane.b32.xlu2 %v6433_v48, %s4383_s27  ;;  %3072 = vrot.lane.b32.xlu1 %v6890_v6, %s4383_s27 }
 0x501   : > { %3070 = vrot.lane.b32.xlu0 %v6448_v0, %s4383_s27 }
 0x502   : > { %v6898_v44 = vpop.permute.xlu2 %2938  ;;  %v6900_v30 = vpop.permute.xlu1 %2924 }
 0x503   : > { %v6902_v25 = vpop.permute.xlu0 %2922 }
 0x508   : > { %3074 = vrot.lane.b32.xlu2 %v6904_v43, %s4383_s27  ;;  %3142 = vrot.lane.b32.xlu1 %v6466_v14, %s4384_s28  ;;  %s7596_s27 = scalar_lea.vmem %s7855_s5, %s4292_s20 }
 0x509   : > { %3140 = vrot.lane.b32.xlu0 %v6460_v18, %s4384_s28 }
 0x50a   : > { %v6912_v48 = vpop.permute.xlu2 %2944  ;;  %v6914_v0 = vpop.permute.xlu1 %2930 }
 0x50b   : > { %v6916_v47 = vpop.permute.xlu0 %2928 }
 0x510   : > { %3144 = vrot.lane.b32.xlu2 %v6458_v54, %s4384_s28  ;;  %3148 = vrot.lane.b32.xlu1 %v6483_v22, %s4384_s28 }
 0x511   : > { %3146 = vrot.lane.b32.xlu0 %v6477_v3, %s4384_s28 }
 0x512   : > { %v6924_v9 = vpop.permute.xlu2 %3014  ;;  %v6926_v14 = vpop.permute.xlu1 %2936 }
 0x513   : > { %v6928_v18 = vpop.permute.xlu0 %2934 }
 0x518   : > { %3150 = vrot.lane.b32.xlu2 %v6475_v35, %s4384_s28  ;;  %3154 = vrot.lane.b32.xlu1 %v6498_v32, %s4384_s28 }
 0x519   : > { %3152 = vrot.lane.b32.xlu0 %v6492_v1, %s4384_s28 }
 0x51a   : > { %v6936_v54 = vpop.permute.xlu2 %3020  ;;  %v6938_v22 = vpop.permute.xlu1 %2942 }
 0x51b   : > { %v6940_v3 = vpop.permute.xlu0 %2940 }
 0x520   : > { %3156 = vrot.lane.b32.xlu2 %v6490_v60, %s4384_s28  ;;  %3160 = vrot.lane.b32.xlu1 %v6514_v63, %s4384_s28 }
 0x521   : > { %3158 = vrot.lane.b32.xlu0 %v6508_v10, %s4384_s28 }
 0x522   : > { %v6948_v35 = vpop.permute.xlu2 %3026  ;;  %v6950_v32 = vpop.permute.xlu1 %3012 }
 0x523   : > { %8422 = vst [vmem:[#allocation119_spill] sm:$0xff] %v6948_v35  ;;  %v6952_v1 = vpop.permute.xlu0 %2946  ;;  %v8439_v35 = vld [vmem:[#allocation96_spill] sm:$0xff] }
 0x524   : > { %8423 = vst [vmem:[#allocation132_spill] sm:$0xff] %v6952_v1 }
 0x528   : > { %3162 = vrot.lane.b32.xlu2 %v6506_v5, %s4384_s28  ;;  %3166 = vrot.lane.b32.xlu1 %v6532_v50, %s4384_s28 }
 0x529   : > { %3164 = vrot.lane.b32.xlu0 %v6526_v55, %s4384_s28 }
 0x52a   : > { %v6960_v60 = vpop.permute.xlu2 %3032  ;;  %v6962_v63 = vpop.permute.xlu1 %3018 }
 0x52b   : > { %8424 = vst [vmem:[#allocation143_spill] sm:$0xff] %v6960_v60  ;;  %v6964_v10 = vpop.permute.xlu0 %3016 }
 0x530   : > { %3168 = vrot.lane.b32.xlu2 %v6524_v61, %s4384_s28  ;;  %3172 = vrot.lane.b32.xlu1 %v6550_v40, %s4384_s28 }
 0x531   : > { %3170 = vrot.lane.b32.xlu0 %v6544_v26, %s4384_s28 }
 0x532   : > { %v6972_v5 = vpop.permute.xlu2 %3038  ;;  %v6974_v50 = vpop.permute.xlu1 %3024 }
 0x533   : > { %8425 = vst [vmem:[#allocation144_spill] sm:$0xff] %v6974_v50  ;;  %v6976_v55 = vpop.permute.xlu0 %3022 }
 0x534   : > { %8426 = vst [vmem:[#allocation98_spill] sm:$0xff] %v6976_v55 }
 0x538   : > { %3174 = vrot.lane.b32.xlu2 %v6542_v33, %s4384_s28  ;;  %3178 = vrot.lane.b32.xlu1 %v6568_v28, %s4384_s28 }
 0x539   : > { %3176 = vrot.lane.b32.xlu0 %v6562_v23, %s4384_s28 }
 0x53a   : > { %v6984_v61 = vpop.permute.xlu2 %3044  ;;  %v6986_v40 = vpop.permute.xlu1 %3030 }
 0x53b   : > { %8427 = vst [vmem:[#allocation156_spill] sm:$0xff] %v6986_v40  ;;  %v6988_v26 = vpop.permute.xlu0 %3028  ;;  %v3635_v40 = vsel %vm258_vm0, %v6668_v57, %v6574_v27 }
 0x53c   : > { %8428 = vst [vmem:[#allocation163_spill] sm:$0xff] %v6988_v26 }
 0x540   : > { %3180 = vrot.lane.b32.xlu2 %v6560_v39, %s4384_s28  ;;  %3184 = vrot.lane.b32.xlu1 %v6586_v20, %s4384_s28  ;;  %v3667_v20 = vsel %vm1714_vm2, %v3635_v40, %v6752_v42  ;;  %v8434_v42 = vld [vmem:[#allocation91_spill] sm:$0xff] }
 0x541   : > { %3182 = vrot.lane.b32.xlu0 %v6580_v38, %s4384_s28  ;;  %v8436_v40 = vld [vmem:[#allocation83_spill] sm:$0xff] }
 0x542   : > { %v6996_v33 = vpop.permute.xlu2 %3050  ;;  %v6998_v1 = vpop.permute.xlu1 %3036 }
 0x543   : > { %8429 = vst [vmem:[#allocation178_spill] sm:$0xff] %v6998_v1  ;;  %v7000_v60 = vpop.permute.xlu0 %3034  ;;  %v3699_v1 = vsel %vm1747_vm3, %v3667_v20, %v6848_v29  ;;  %v8437_v29 = vld [vmem:[#allocation142_spill] sm:$0xff] }
 0x544   : > { %8430 = vst [vmem:[#allocation191_spill] sm:$0xff] %v7000_v60  ;;  %v3637_v20 = vsel %vm258_vm0, %v8437_v29, %v8436_v40 }
 0x545   : > { %v3669_v11 = vsel %vm1714_vm2, %v3637_v20, %v8439_v35 }
 0x548   : > { %3186 = vrot.lane.b32.xlu2 %v6578_v8, %s4384_s28  ;;  %3190 = vrot.lane.b32.xlu1 %v6604_v24, %s4384_s28  ;;  %v8432_v8 = vld [vmem:[#allocation59_spill] sm:$0xff] }
 0x549   : > { %3188 = vrot.lane.b32.xlu0 %v8431_v59, %s4384_s28  ;;  %v3638_v24 = vsel %vm258_vm0, %v8433_v51, %v8432_v8  ;;  %v8435_v59 = vld [vmem:[#allocation174_spill] sm:$0xff] }
 0x54a   : > { %v7015_v60 = vpop.permute.xlu2 %3056  ;;  %v3043_v26 = vpop.permute.xlu1 %3042 }
 0x54b   : > { %v7018_v27 = vsel %vm1780_vm5, %v3699_v1, %v3043_v26  ;;  %v7020_v57 = vpop.permute.xlu0 %3040  ;;  %v3670_v1 = vsel %vm1714_vm2, %v3638_v24, %v6767_v17  ;;  %v8438_v26 = vld [vmem:[#allocation164_spill] sm:$0xff]  ;;  %v8440_v24 = vld [vmem:[#allocation189_spill] sm:$0xff] }
 0x54c   : > { %v3702_v51 = vsel %vm1747_vm3, %v3670_v1, %v6860_v37  ;;  %v2548_v37 = vld [vmem:[#allocation2 + $0xf1] sm:$0xff]  ;;  %v8441_v1 = vld [vmem:[#allocation37_spill] sm:$0xff] }
 0x550   : > { %3192 = vrot.lane.b32.xlu2 %v8434_v42, %s4384_s28  ;;  %3196 = vrot.lane.b32.xlu1 %v8435_v59, %s4384_s28  ;;  %v3701_v59 = vsel %vm1747_vm3, %v3669_v11, %v6886_v13  ;;  %v2500_v13 = vld [vmem:[#allocation2 + $0x30] sm:$0xff] }
 0x551   : > { %3194 = vrot.lane.b32.xlu0 %v8438_v26, %s4384_s28  ;;  %v2532_v26 = vld [vmem:[#allocation2 + $0x31] sm:$0xff] }
 0x552   : > { %v7040_v8 = vpop.permute.xlu2 %3062  ;;  %v3049_v42 = vpop.permute.xlu1 %3048 }
 0x553   : > { %v7045_v40 = vsel %vm1780_vm5, %v3702_v51, %v3049_v42  ;;  %v3047_v29 = vpop.permute.xlu0 %3046 }
 0x554   : > { %v7048_v17 = vsel %vm1780_vm5, %v3701_v59, %v3047_v29  ;;  %v2564_v59 = vld [vmem:[#allocation2 + $0x32] sm:$0xff] }
 0x555   : > { %v8443_v29 = vld [vmem:[#allocation120_spill] sm:$0xff] }
 0x558   : > { %3300 = vrot.lane.b32.xlu2 %v8440_v24, %s4385_s29  ;;  %3556 = vrot.lane.b32.xlu1 %v6562_v23, %s4387_s6 }
 0x559   : > { %3428 = vrot.lane.b32.xlu0 %v2548_v37, %s4386_s30  ;;  %v8444_v37 = vld [vmem:[#allocation185_spill] sm:$0xff] }
 0x55a   : > { %v7055_v35 = vpop.permute.xlu2 %3068  ;;  %v7057_v20 = vpop.permute.xlu1 %3054  ;;  %v3647_v50 = vsel %vm258_vm0, %v8444_v37, %v8443_v29  ;;  %v8445_v37 = vld [vmem:[#allocation62_spill] sm:$0xff] }
 0x55b   : > { %v7059_v11 = vpop.permute.xlu0 %3052 }
 0x560   : > { %3268 = vrot.lane.b32.xlu2 %v2500_v13, %s4385_s29  ;;  %3302 = vrot.lane.b32.xlu1 %v8441_v1, %s4385_s29  ;;  %v2549_v13 = vld [vmem:[#allocation2 + $0xf9] sm:$0xff] }
 0x561   : > { %3396 = vrot.lane.b32.xlu0 %v2532_v26, %s4386_s30  ;;  %v3679_v26 = vsel %vm1714_vm2, %v3647_v50, %v6804_v45  ;;  %v8447_v45 = vld [vmem:[#allocation188_spill] sm:$0xff]  ;;  %v8448_v50 = vld [vmem:[#allocation106_spill] sm:$0xff] }
 0x562   : > { %v7065_v51 = vpop.permute.xlu2 %3074  ;;  %v7067_v23 = vpop.permute.xlu1 %3060 }
 0x563   : > { %8442 = vst [vmem:[#allocation192_spill] sm:$0xff] %v7065_v51  ;;  %v7069_v42 = vpop.permute.xlu0 %3058  ;;  %v3711_v51 = vsel %vm1747_vm3, %v3679_v26, %v6898_v44  ;;  %v8449_v44 = vld [vmem:[#allocation80_spill] sm:$0xff] }
 0x568   : > { %3524 = vrot.lane.b32.xlu2 %v2564_v59, %s4387_s6  ;;  %3558 = vrot.lane.b32.xlu1 %v6568_v28, %s4387_s6  ;;  %v2501_v59 = vld [vmem:[#allocation2 + $0x38] sm:$0xff]  ;;  %v8446_v28 = vld [vmem:[#allocation111_spill] sm:$0xff] }
 0x569   : > { %3430 = vrot.lane.b32.xlu0 %v2549_v13, %s4386_s30  ;;  %v3650_v49 = vsel %vm258_vm0, %v8446_v28, %v8445_v37  ;;  %v3649_v13 = vsel %vm258_vm0, %v8449_v44, %v8448_v50 }
 0x56a   : > { %v7082_v58 = vpop.permute.xlu2 %3144  ;;  %v3067_v43 = vpop.permute.xlu1 %3066 }
 0x56b   : > { %v7085_v55 = vsel %vm1780_vm5, %v3711_v51, %v3067_v43  ;;  %v7087_v29 = vpop.permute.xlu0 %3064  ;;  %v3682_v43 = vsel %vm1714_vm2, %v3650_v49, %v6816_v2  ;;  %v3681_v51 = vsel %vm1714_vm2, %v3649_v13, %v6774_v53  ;;  %v2550_v53 = vld [vmem:[#allocation2 + $0x109] sm:$0xff] }
 0x56c   : > { %v3714_v26 = vsel %vm1747_vm3, %v3682_v43, %v6912_v48  ;;  %v3713_v28 = vsel %vm1747_vm3, %v3681_v51, %v6938_v22  ;;  %v2502_v13 = vld [vmem:[#allocation2 + $0x48] sm:$0xff]  ;;  %v8454_v43 = vld [vmem:[#allocation131_spill] sm:$0xff] }
 0x570   : > { %3270 = vrot.lane.b32.xlu2 %v2501_v59, %s4385_s29  ;;  %3304 = vrot.lane.b32.xlu1 %v8447_v45, %s4385_s29 }
 0x571   : > { %3398 = vrot.lane.b32.xlu0 %v6778_v12, %s4386_s30  ;;  %v2565_v12 = vld [vmem:[#allocation2 + $0x3a] sm:$0xff] }
 0x572   : > { %v7106_v59 = vpop.permute.xlu2 %3150  ;;  %v3073_v37 = vpop.permute.xlu1 %3072 }
 0x573   : > { %8450 = vst [vmem:[#allocation40_spill] sm:$0xff] %v7106_v59  ;;  %v7111_v50 = vsel %vm1780_vm5, %v3714_v26, %v3073_v37  ;;  %v3071_v44 = vpop.permute.xlu0 %3070  ;;  %v8456_v37 = vld [vmem:[#allocation35_spill] sm:$0xff] }
 0x574   : > { %8451 = vst [vmem:[#allocation66_spill] sm:$0xff] %v7111_v50  ;;  %v7114_v2 = vsel %vm1780_vm5, %v3713_v28, %v3071_v44  ;;  %v8457_v28 = vld [vmem:[#allocation95_spill] sm:$0xff] }
 0x575   : > { %8452 = vst [vmem:[#allocation101_spill] sm:$0xff] %v7114_v2  ;;  %v3634_v44 = vsel %vm258_vm0, %v8457_v28, %v8456_v37 }
 0x578   : > { %3526 = vrot.lane.b32.xlu2 %v2565_v12, %s4387_s6  ;;  %3560 = vrot.lane.b32.xlu1 %v6560_v39, %s4387_s6  ;;  %v2566_v12 = vld [vmem:[#allocation2 + $0x4a] sm:$0xff] }
 0x579   : > { %3432 = vrot.lane.b32.xlu0 %v2550_v53, %s4386_s30  ;;  %v8458_v53 = vld [vmem:[#allocation162_spill] sm:$0xff] }
 0x57a   : > { %v7120_v49 = vpop.permute.xlu2 %3156  ;;  %v7122_v48 = vpop.permute.xlu1 %3142 }
 0x57b   : > { %8453 = vst [vmem:[#allocation102_spill] sm:$0xff] %v7120_v49  ;;  %v7124_v22 = vpop.permute.xlu0 %3140  ;;  %v2584_v49 = vld [vmem:[#allocation2 + $0x122] sm:$0xff] }
 0x580   : > { %3272 = vrot.lane.b32.xlu2 %v2502_v13, %s4385_s29  ;;  %3306 = vrot.lane.b32.xlu1 %v8454_v43, %s4385_s29  ;;  %v3666_v13 = vsel %vm1714_vm2, %v3634_v44, %v8458_v53 }
 0x581   : > { %3400 = vrot.lane.b32.xlu0 %v6792_v16, %s4386_s30  ;;  %v2551_v16 = vld [vmem:[#allocation2 + $0x111] sm:$0xff]  ;;  %v3698_v50 = vsel %vm1747_vm3, %v3666_v13, %v6874_v7 }
 0x582   : > { %v7131_v51 = vpop.permute.xlu2 %3162  ;;  %v7133_v39 = vpop.permute.xlu1 %3148  ;;  %v3730_v2 = vsel %vm1780_vm5, %v3698_v50, %v7020_v57  ;;  %v2535_v7 = vld [vmem:[#allocation2 + $0x51] sm:$0xff] }
 0x583   : > { %8455 = vst [vmem:[#allocation125_spill] sm:$0xff] %v7131_v51  ;;  %v7135_v26 = vpop.permute.xlu0 %3146  ;;  %v8464_v13 = vld [vmem:[#allocation87_spill] sm:$0xff] }
 0x588   : > { %3528 = vrot.lane.b32.xlu2 %v2566_v12, %s4387_s6  ;;  %3562 = vrot.lane.b32.xlu1 %v6580_v38, %s4387_s6  ;;  %v2503_v12 = vld [vmem:[#allocation2 + $0x50] sm:$0xff]  ;;  %v8462_v38 = vld [vmem:[#allocation138_spill] sm:$0xff] }
 0x589   : > { %3434 = vrot.lane.b32.xlu0 %v2551_v16, %s4386_s30  ;;  %v8466_v16 = vld [vmem:[#allocation45_spill] sm:$0xff] }
 0x58a   : > { %v3169_v51 = vpop.permute.xlu2 %3168  ;;  %v7150_v37 = vpop.permute.xlu1 %3154 }
 0x58b   : > { %8459 = vst [vmem:[#allocation133_spill] sm:$0xff] %v7150_v37  ;;  %v7153_v28 = vsel %vm1813_vm4, %v3730_v2, %v3169_v51  ;;  %v7155_v44 = vpop.permute.xlu0 %3152  ;;  %v8465_v2 = vld [vmem:[#allocation165_spill] sm:$0xff] }
 0x58c   : > { %8460 = vst [vmem:[#allocation139_spill] sm:$0xff] %v7153_v28  ;;  %v3633_v51 = vsel %vm258_vm0, %v8465_v2, %v8464_v13  ;;  %v2567_v28 = vld [vmem:[#allocation2 + $0x52] sm:$0xff]  ;;  %v8467_v37 = vld [vmem:[#allocation145_spill] sm:$0xff] }
 0x58d   : > { %8461 = vst [vmem:[#allocation147_spill] sm:$0xff] %v7155_v44  ;;  %v3665_v44 = vsel %vm1714_vm2, %v3633_v51, %v8467_v37 }
 0x58e   : > { %v3697_v13 = vsel %vm1747_vm3, %v3665_v44, %v6876_v52  ;;  %v2504_v44 = vld [vmem:[#allocation2 + $0x60] sm:$0xff] }
 0x590   : > { %3274 = vrot.lane.b32.xlu2 %v2503_v12, %s4385_s29  ;;  %3308 = vrot.lane.b32.xlu1 %v8462_v38, %s4385_s29  ;;  %v3640_v12 = vsel %vm258_vm0, %v8440_v24, %v8466_v16  ;;  %v3729_v24 = vsel %vm1780_vm5, %v3697_v13, %v6972_v5  ;;  %v3883_v5 = vld [vmem:[%s7853_s3 + $0x38] sm:$0xff]  ;;  %v2536_v13 = vld [vmem:[#allocation2 + $0x61] sm:$0xff] }
 0x591   : > { %3402 = vrot.lane.b32.xlu0 %v2535_v7, %s4386_s30  ;;  %v8468_v7 = vld [vmem:[#allocation93_spill] sm:$0xff] }
 0x592   : > { %v7161_v53 = vpop.permute.xlu2 %3174  ;;  %v7163_v57 = vpop.permute.xlu1 %3160  ;;  %v3672_v59 = vsel %vm1714_vm2, %v3640_v12, %v8468_v7  ;;  %v8470_v12 = vld [vmem:[#allocation65_spill] sm:$0xff] }
 0x593   : > { %8463 = vst [vmem:[#allocation99_spill] sm:$0xff] %v7163_v57  ;;  %v7165_v50 = vpop.permute.xlu0 %3158  ;;  %v2552_v57 = vld [vmem:[#allocation2 + $0x121] sm:$0xff]  ;;  %v3704_v2 = vsel %vm1747_vm3, %v3672_v59, %v6900_v30 }
 0x594   : > { %v3736_v37 = vsel %vm1780_vm5, %v3704_v2, %v7059_v11  ;;  %v3884_v30 = vld [vmem:[%s7853_s3 + $0x40] sm:$0xff]  ;;  %v8469_v11 = vld [vmem:[#allocation108_spill] sm:$0xff]  ;;  %v3882_v2 = vld [vmem:[%s7853_s3 + $0x30] sm:$0xff] }
 0x595   : > { %4303 = vmatpush.msra.mxu3 %v3884_v30  ;;  %3992 = vmatpush.msra.mxu1 %v3884_v30  ;;  %v3643_v59 = vsel %vm258_vm0, %v8454_v43, %v8469_v11  ;;  %v3879_v11 = vld [vmem:[%s7853_s3 + $0x18] sm:$0xff] }
 0x596   : > { %v3675_v7 = vsel %vm1714_vm2, %v3643_v59, %v8470_v12  ;;  %v8471_v59 = vld [vmem:[#allocation44_spill] sm:$0xff] }
 0x597   : > { %4304 = vmatpush.msra.mxu3 %v3883_v5  ;;  %3993 = vmatpush.msra.mxu1 %v3883_v5  ;;  %v3881_v5 = vld [vmem:[%s7853_s3 + $0x28] sm:$0xff]  ;;  %v8473_v12 = vld [vmem:[#allocation140_spill] sm:$0xff] }
 0x598   : > { %3530 = vrot.lane.b32.xlu2 %v2567_v28, %s4387_s6  ;;  %3564 = vrot.lane.b32.xlu1 %v2584_v49, %s4387_s6 }
 0x599   : > { %3436 = vrot.lane.b32.xlu0 %v2552_v57, %s4386_s30  ;;  %v2521_v57 = vld [vmem:[#allocation2 + $0x128] sm:$0xff]  ;;  %4305 = vmatpush.msra.mxu3 %v3882_v2 }
 0x59a   : > { %v3181_v51 = vpop.permute.xlu2 %3180  ;;  %v3167_v16 = vpop.permute.xlu1 %3166  ;;  %3994 = vmatpush.msra.mxu1 %v3882_v2  ;;  %v2585_v2 = vld [vmem:[#allocation2 + $0x12a] sm:$0xff] }
 0x59b   : > { %v7189_v28 = vsel %vm1813_vm4, %v3736_v37, %v3181_v51  ;;  %v7192_v49 = vsel %vm1813_vm4, %v3729_v24, %v3167_v16  ;;  %v7194_v52 = vpop.permute.xlu0 %3164  ;;  %v3707_v24 = vsel %vm1747_vm3, %v3675_v7, %v6914_v0  ;;  %4306 = vmatpush.msra.mxu3 %v3881_v5  ;;  %v8474_v7 = vld [vmem:[#allocation177_spill] sm:$0xff] }
 0x59c   : > { %v3739_v43 = vsel %vm1780_vm5, %v3707_v24, %v7069_v42  ;;  %v3880_v42 = vld [vmem:[%s7853_s3 + $0x20] sm:$0xff]  ;;  %3995 = vmatpush.msra.mxu1 %v3881_v5  ;;  %v8475_v24 = vld [vmem:[#allocation123_spill] sm:$0xff] }
 0x59d   : > { %4307 = vmatpush.msra.mxu3 %v3880_v42  ;;  %v3878_v5 = vld [vmem:[%s7853_s3 + $0x10] sm:$0xff] }
 0x59e   : > { %3996 = vmatpush.msra.mxu1 %v3880_v42 }
 0x59f   : > { %4308 = vmatpush.msra.mxu3 %v3879_v11 }
 0x5a0   : > { %3276 = vrot.lane.b32.xlu2 %v2504_v44, %s4385_s29  ;;  %3310 = vrot.lane.b32.xlu1 %v2521_v57, %s4385_s29  ;;  %v8472_v44 = vld [vmem:[#allocation141_spill] sm:$0xff] }
 0x5a1   : > { %3404 = vrot.lane.b32.xlu0 %v2536_v13, %s4386_s30  ;;  %v3639_v57 = vsel %vm258_vm0, %v8472_v44, %v8471_v59  ;;  %v2568_v13 = vld [vmem:[#allocation2 + $0x62] sm:$0xff]  ;;  %3997 = vmatpush.msra.mxu1 %v3879_v11 }
 0x5a2   : > { %v3187_v37 = vpop.permute.xlu2 %3186  ;;  %v7217_v51 = vpop.permute.xlu1 %3172  ;;  %4309 = vmatpush.msra.mxu3 %v3878_v5 }
 0x5a3   : > { %v7220_v16 = vsel %vm1813_vm4, %v3739_v43, %v3187_v37  ;;  %v3171_v30 = vpop.permute.xlu0 %3170  ;;  %v3671_v43 = vsel %vm1714_vm2, %v3639_v57, %v8475_v24  ;;  %3998 = vmatpush.msra.mxu1 %v3878_v5  ;;  %v8477_v24 = vld [vmem:[#allocation88_spill] sm:$0xff]  ;;  %v2537_v5 = vld [vmem:[#allocation2 + $0x69] sm:$0xff] }
 0x5a4   : > { %v7227_v0 = vsel %vm1813_vm4, %v7018_v27, %v3171_v30  ;;  %v3646_v27 = vsel %vm258_vm0, %v8474_v7, %v8473_v12  ;;  %v2553_v30 = vld [vmem:[#allocation2 + $0x129] sm:$0xff]  ;;  %v3703_v42 = vsel %vm1747_vm3, %v3671_v43, %v6902_v25  ;;  %v3641_v43 = vsel %vm258_vm0, %v8441_v1, %v8477_v24  ;;  %v2554_v24 = vld [vmem:[#allocation2 + $0x139] sm:$0xff] }
 0x5a5   : > { %v3678_v37 = vsel %vm1714_vm2, %v3646_v27, %v6765_v21  ;;  %v3735_v21 = vsel %vm1780_vm5, %v3703_v42, %v6996_v33  ;;  %v3876_v33 = vld [vmem:[%s7853_s3] sm:$0xff]  ;;  %v3673_v42 = vsel %vm1714_vm2, %v3641_v43, %v6776_v31 }
 0x5a6   : > { %v3710_v59 = vsel %vm1747_vm3, %v3678_v37, %v6926_v14  ;;  %v3877_v14 = vld [vmem:[%s7853_s3 + $0x8] sm:$0xff]  ;;  %v8478_v37 = vld [vmem:[#allocation124_spill] sm:$0xff]  ;;  %v3705_v1 = vsel %vm1747_vm3, %v3673_v42, %v6872_v62 }
 0x5a7   : > { %v3742_v44 = vsel %vm1780_vm5, %v3710_v59, %v7087_v29  ;;  %4310 = vmatpush.msra.mxu3 %v3877_v14  ;;  %3999 = vmatpush.msra.mxu1 %v3877_v14  ;;  %v8476_v29 = vld [vmem:[#allocation105_spill] sm:$0xff]  ;;  %v8480_v14 = vld [vmem:[#allocation122_spill] sm:$0xff] }
 0x5a8   : > { %3532 = vrot.lane.b32.xlu2 %v2568_v13, %s4387_s6  ;;  %3566 = vrot.lane.b32.xlu1 %v2585_v2, %s4387_s6  ;;  %v3642_v11 = vsel %vm258_vm0, %v8447_v45, %v8476_v29  ;;  %v2505_v2 = vld [vmem:[#allocation2 + $0x68] sm:$0xff]  ;;  %v2586_v29 = vld [vmem:[#allocation2 + $0x13a] sm:$0xff] }
 0x5a9   : > { %3438 = vrot.lane.b32.xlu0 %v2553_v30, %s4386_s30  ;;  %4311 = vmatpush.msra.mxu3 %v3876_v33  ;;  %v3674_v30 = vsel %vm1714_vm2, %v3642_v11, %v8478_v37  ;;  %v2569_v62 = vld [vmem:[#allocation2 + $0x6a] sm:$0xff]  ;;  %v8481_v11 = vld [vmem:[#allocation61_spill] sm:$0xff] }
 0x5aa   : > { %v3193_v57 = vpop.permute.xlu2 %3192  ;;  %v3179_v12 = vpop.permute.xlu1 %3178  ;;  %v3706_v45 = vsel %vm1747_vm3, %v3674_v30, %v6916_v47  ;;  %4000 = vmatpush.msra.mxu1 %v3876_v33 }
 0x5ab   : > { %v7260_v27 = vsel %vm1813_vm4, %v3742_v44, %v3193_v57  ;;  %v7263_v25 = vsel %vm1813_vm4, %v3735_v21, %v3179_v12  ;;  %v7265_v13 = vpop.permute.xlu0 %3176  ;;  %v3738_v59 = vsel %vm1780_vm5, %v3706_v45, %v7015_v60  ;;  %v8479_v12 = vld [vmem:[#allocation56_spill] sm:$0xff]  ;;  %v3644_v60 = vsel %vm258_vm0, %v8462_v38, %v8481_v11 }
 0x5ac   : > { %v3645_v33 = vsel %vm258_vm0, %v8480_v14, %v8479_v12  ;;  %v3676_v43 = vsel %vm1714_vm2, %v3644_v60, %v6790_v56  ;;  %v8485_v60 = vld [vmem:[#allocation70_spill] sm:$0xff] }
 0x5ad   : > { %v3708_v30 = vsel %vm1747_vm3, %v3676_v43, %v6884_v15  ;;  %v2506_v15 = vld [vmem:[#allocation2 + $0x78] sm:$0xff] }
 0x5ae   : > { %v3740_v45 = vsel %vm1780_vm5, %v3708_v30, %v7067_v23  ;;  %v2538_v23 = vld [vmem:[#allocation2 + $0x79] sm:$0xff]  ;;  %v2555_v30 = vld [vmem:[#allocation2 + $0x141] sm:$0xff] }
 0x5af   : > { %v2570_v43 = vld [vmem:[#allocation2 + $0x7a] sm:$0xff] }
 0x5b0   : > { %3278 = vrot.lane.b32.xlu2 %v2505_v2, %s4385_s29  ;;  %3312 = vrot.lane.b32.xlu1 %v8474_v7, %s4385_s29  ;;  %v3737_v7 = vsel %vm1780_vm5, %v3705_v1, %v7057_v20  ;;  %v8482_v2 = vld [vmem:[#allocation51_spill] sm:$0xff] }
 0x5b1   : > { %3406 = vrot.lane.b32.xlu0 %v2537_v5, %s4386_s30  ;;  %v3677_v20 = vsel %vm1714_vm2, %v3645_v33, %v8482_v2  ;;  %v8486_v2 = vld [vmem:[#allocation47_spill] sm:$0xff] }
 0x5b2   : > { %v3301_v21 = vpop.permute.xlu2 %3300  ;;  %v3185_v44 = vpop.permute.xlu1 %3184  ;;  %v3709_v37 = vsel %vm1747_vm3, %v3677_v20, %v6928_v18  ;;  %v8483_v18 = vld [vmem:[#allocation183_spill] sm:$0xff]  ;;  %v3636_v20 = vsel %vm258_vm0, %v8486_v2, %v8485_v60 }
 0x5b3   : > { %v7296_v57 = vsel %vm1813_vm4, %v3738_v59, %v3185_v44  ;;  %v3183_v31 = vpop.permute.xlu0 %3182  ;;  %v3741_v38 = vsel %vm1780_vm5, %v3709_v37, %v7040_v8  ;;  %v8484_v44 = vld [vmem:[#allocation167_spill] sm:$0xff]  ;;  %v2587_v37 = vld [vmem:[#allocation2 + $0x142] sm:$0xff] }
 0x5b4   : > { %v7299_v47 = vsel %vm1813_vm4, %v3737_v7, %v3183_v31  ;;  %v3648_v7 = vsel %vm258_vm0, %v8484_v44, %v8483_v18  ;;  %v2523_v31 = vld [vmem:[#allocation2 + $0x140] sm:$0xff] }
 0x5b5   : > { %v3680_v8 = vsel %vm1714_vm2, %v3648_v7, %v6800_v34  ;;  %v2308_v44 = vld [vmem:[#allocation2] sm:$0xff] }
 0x5b6   : > { %v3712_v12 = vsel %vm1747_vm3, %v3680_v8, %v6940_v3  ;;  %v8487_v3 = vld [vmem:[#allocation48_spill] sm:$0xff] }
 0x5b7   : > { %v3744_v14 = vsel %vm1780_vm5, %v3712_v12, %v7055_v35  ;;  %v8490_v12 = vld [vmem:[#allocation146_spill] sm:$0xff] }
 0x5b8   : > { %3534 = vrot.lane.b32.xlu2 %v2569_v62, %s4387_s6  ;;  %3568 = vrot.lane.b32.xlu1 %v2586_v29, %s4387_s6 }
 0x5b9   : > { %3440 = vrot.lane.b32.xlu0 %v2554_v24, %s4386_s30  ;;  %v3668_v24 = vsel %vm1714_vm2, %v3636_v20, %v8487_v3 }
 0x5ba   : > { %v3269_v5 = vpop.permute.xlu2 %3268  ;;  %v3191_v42 = vpop.permute.xlu1 %3190  ;;  %v3700_v35 = vsel %vm1747_vm3, %v3668_v24, %v6888_v36 }
 0x5bb   : > { %v7323_v1 = vsel %vm1813_vm4, %v3741_v38, %v3191_v42  ;;  %v3189_v56 = vpop.permute.xlu0 %3188 }
 0x5bc   : > { %v7326_v59 = vsel %vm1813_vm4, %v3740_v45, %v3189_v56 }
 0x5c0   : > { %3280 = vrot.lane.b32.xlu2 %v2506_v15, %s4385_s29  ;;  %3314 = vrot.lane.b32.xlu1 %v2523_v31, %s4385_s29  ;;  %v8488_v15 = vld [vmem:[#allocation81_spill] sm:$0xff] }
 0x5c1   : > { %3408 = vrot.lane.b32.xlu0 %v2538_v23, %s4386_s30  ;;  %v3620_v31 = vsel %vm258_vm0, %v2308_v44, %v8488_v15  ;;  %v2507_v23 = vld [vmem:[#allocation2 + $0x80] sm:$0xff]  ;;  %v8492_v44 = vld [vmem:[#allocation166_spill] sm:$0xff]  ;;  %v2508_v15 = vld [vmem:[#allocation2 + $0x90] sm:$0xff] }
 0x5c2   : > { %v3525_v33 = vpop.permute.xlu2 %3524  ;;  %v3197_v62 = vpop.permute.xlu1 %3196 }
 0x5c3   : > { %v7341_v29 = vsel %vm1813_vm4, %v3744_v14, %v3197_v62  ;;  %v3195_v11 = vpop.permute.xlu0 %3194 }
 0x5c4   : > { %v7345_v34 = vsel %vm1813_vm4, %v7085_v55, %v3195_v11  ;;  %v3732_v55 = vsel %vm1780_vm5, %v3700_v35, %v6984_v61  ;;  %v8489_v61 = vld [vmem:[#allocation46_spill] sm:$0xff]  ;;  %v2588_v35 = vld [vmem:[#allocation2 + $0x152] sm:$0xff] }
 0x5c5   : > { %v3764_v38 = vsel %vm1813_vm4, %v3732_v55, %v7217_v51  ;;  %v3652_v8 = vsel %vm1714_vm2, %v3620_v31, %v8489_v61  ;;  %v2524_v51 = vld [vmem:[#allocation2 + $0x150] sm:$0xff] }
 0x5c6   : > { %v3796_v56 = vsel %vm1846_vm6, %v3764_v38, %v3301_v21  ;;  %v3684_v14 = vsel %vm1747_vm3, %v3652_v8, %v8490_v12  ;;  %v2539_v21 = vld [vmem:[#allocation2 + $0x81] sm:$0xff]  ;;  %v2540_v31 = vld [vmem:[#allocation2 + $0x91] sm:$0xff] }
 0x5c7   : > { %v3716_v62 = vsel %vm1780_vm5, %v3684_v14, %v6950_v32  ;;  %v2556_v32 = vld [vmem:[#allocation2 + $0x151] sm:$0xff] }
 0x5c8   : > { %3536 = vrot.lane.b32.xlu2 %v2570_v43, %s4387_s6  ;;  %3570 = vrot.lane.b32.xlu1 %v2587_v37, %s4387_s6  ;;  %v3748_v11 = vsel %vm1813_vm4, %v3716_v62, %v7124_v22  ;;  %v2571_v37 = vld [vmem:[#allocation2 + $0x82] sm:$0xff]  ;;  %v3765_v22 = vsel %vm1813_vm4, %v7048_v17, %v7161_v53  ;;  %v2525_v17 = vld [vmem:[#allocation2 + $0x158] sm:$0xff] }
 0x5c9   : > { %3442 = vrot.lane.b32.xlu0 %v2555_v30, %s4386_s30  ;;  %v3780_v20 = vsel %vm1846_vm6, %v3748_v11, %v3269_v5  ;;  %v2572_v62 = vld [vmem:[#allocation2 + $0x92] sm:$0xff]  ;;  %v2589_v11 = vld [vmem:[#allocation2 + $0x15a] sm:$0xff] }
 0x5ca   : > { %v3271_v42 = vpop.permute.xlu2 %3270  ;;  %v3557_v45 = vpop.permute.xlu1 %3556 }
 0x5cb   : > { %v3429_v18 = vpop.permute.xlu0 %3428 }
 0x5cc   : > { %v3828_v36 = vsel %vm1879_vm8, %v3796_v56, %v3429_v18  ;;  %v8491_v18 = vld [vmem:[#allocation79_spill] sm:$0xff] }
 0x5cd   : > { %v3860_v7 = vsel %vm1912_vm7, %v3828_v36, %v3557_v45  ;;  %v2309_v45 = vld [vmem:[#allocation2 + $0x8] sm:$0xff] }
 0x5ce   : > { %4274 = vmatmul.msk.f32.vlgmr.msra.gmra.mxu3 %vm1958_vm9, %v3860_v7  ;;  %v3621_v36 = vsel %vm258_vm0, %v2309_v45, %v8491_v18 }
 0x5cf   : > { %v3653_v7 = vsel %vm1714_vm2, %v3621_v36, %v8492_v44 }
 0x5d0   : > { %3282 = vrot.lane.b32.xlu2 %v2507_v23, %s4385_s29  ;;  %3316 = vrot.lane.b32.xlu1 %v2524_v51, %s4385_s29  ;;  %v3685_v53 = vsel %vm1747_vm3, %v3653_v7, %v6828_v4  ;;  %v2573_v7 = vld [vmem:[#allocation2 + $0x9a] sm:$0xff] }
 0x5d1   : > { %3410 = vrot.lane.b32.xlu0 %v2539_v21, %s4386_s30  ;;  %v3717_v61 = vsel %vm1780_vm5, %v3685_v53, %v6924_v9  ;;  %v2557_v9 = vld [vmem:[#allocation2 + $0x159] sm:$0xff] }
 0x5d2   : > { %v3527_v60 = vpop.permute.xlu2 %3526  ;;  %v3303_v2 = vpop.permute.xlu1 %3302  ;;  %v3749_v8 = vsel %vm1813_vm4, %v3717_v61, %v7122_v48  ;;  %v3766_v48 = vsel %vm1813_vm4, %v7045_v40, %v7265_v13  ;;  %v2526_v40 = vld [vmem:[#allocation2 + $0x168] sm:$0xff] }
 0x5d3   : > { %v3397_v3 = vpop.permute.xlu0 %3396  ;;  %v3797_v55 = vsel %vm1846_vm6, %v3765_v22, %v3303_v2  ;;  %v3781_v12 = vsel %vm1846_vm6, %v3749_v8, %v3271_v42  ;;  %v4361_v8 = vld [vmem:[#allocation2 + $0x20] sm:$0xff] }
 0x5d4   : > { %v3812_v24 = vsel %vm1879_vm8, %v3780_v20, %v3397_v3 }
 0x5d5   : > { %v3844_v43 = vsel %vm1912_vm7, %v3812_v24, %v3525_v33 }
 0x5d6   : > { %4258 = vmatmul.msk.f32.vlgmr.msra.gmra.mxu1 %vm1958_vm9, %v3844_v43  ;;  %v4360_v43 = vld [vmem:[#allocation2 + $0x18] sm:$0xff] }
 0x5d8   : > { %3538 = vrot.lane.b32.xlu2 %v2571_v37, %s4387_s6  ;;  %3572 = vrot.lane.b32.xlu1 %v2588_v35, %s4387_s6  ;;  %v8493_v37 = vld [vmem:[#allocation85_spill] sm:$0xff] }
 0x5d9   : > { %3444 = vrot.lane.b32.xlu0 %v2556_v32, %s4386_s30  ;;  %v3622_v35 = vsel %vm258_vm0, %v4360_v43, %v8493_v37  ;;  %v8494_v32 = vld [vmem:[#allocation121_spill] sm:$0xff]  ;;  %v2591_v43 = vld [vmem:[#allocation2 + $0x172] sm:$0xff] }
 0x5da   : > { %v3273_v5 = vpop.permute.xlu2 %3272  ;;  %v3559_v30 = vpop.permute.xlu1 %3558  ;;  %v3654_v22 = vsel %vm1714_vm2, %v3622_v35, %v8494_v32 }
 0x5db   : > { %v3431_v33 = vpop.permute.xlu0 %3430  ;;  %v3686_v13 = vsel %vm1747_vm3, %v3654_v22, %v6826_v19 }
 0x5dc   : > { %v3829_v38 = vsel %vm1879_vm8, %v3797_v55, %v3431_v33  ;;  %v2541_v55 = vld [vmem:[#allocation2 + $0x99] sm:$0xff]  ;;  %v3718_v33 = vsel %vm1780_vm5, %v3686_v13, %v6964_v10  ;;  %v2558_v10 = vld [vmem:[#allocation2 + $0x169] sm:$0xff] }
 0x5dd   : > { %v3861_v56 = vsel %vm1912_vm7, %v3829_v38, %v3559_v30  ;;  %v2509_v30 = vld [vmem:[#allocation2 + $0x98] sm:$0xff]  ;;  %v3750_v38 = vsel %vm1813_vm4, %v3718_v33, %v7082_v58 }
 0x5de   : > { %4275 = vmatmul.msk.f32.gmra.mxu3 %vm1958_vm9, %v3861_v56  ;;  %v3782_v18 = vsel %vm1846_vm6, %v3750_v38, %v3273_v5  ;;  %v2511_v38 = vld [vmem:[#allocation2 + $0xb0] sm:$0xff] }
 0x5e0   : > { %3284 = vrot.lane.b32.xlu2 %v2508_v15, %s4385_s29  ;;  %3318 = vrot.lane.b32.xlu1 %v2525_v17, %s4385_s29  ;;  %v2590_v15 = vld [vmem:[#allocation2 + $0x16a] sm:$0xff] }
 0x5e1   : > { %3412 = vrot.lane.b32.xlu0 %v2540_v31, %s4386_s30 }
 0x5e2   : > { %v3529_v23 = vpop.permute.xlu2 %3528  ;;  %v3305_v51 = vpop.permute.xlu1 %3304 }
 0x5e3   : > { %v3399_v14 = vpop.permute.xlu0 %3398  ;;  %v3798_v20 = vsel %vm1846_vm6, %v3766_v48, %v3305_v51 }
 0x5e4   : > { %v3813_v4 = vsel %vm1879_vm8, %v3781_v12, %v3399_v14  ;;  %v8496_v12 = vld [vmem:[#allocation129_spill] sm:$0xff] }
 0x5e5   : > { %v3845_v21 = vsel %vm1912_vm7, %v3813_v4, %v3527_v60  ;;  %v2510_v4 = vld [vmem:[#allocation2 + $0xa8] sm:$0xff] }
 0x5e6   : > { %4259 = vmatmul.msk.f32.gmra.mxu1 %vm1958_vm9, %v3845_v21  ;;  %v2527_v21 = vld [vmem:[#allocation2 + $0x170] sm:$0xff] }
 0x5e8   : > { %3540 = vrot.lane.b32.xlu2 %v2572_v62, %s4387_s6  ;;  %3574 = vrot.lane.b32.xlu1 %v2589_v11, %s4387_s6 }
 0x5e9   : > { %3446 = vrot.lane.b32.xlu0 %v2557_v9, %s4386_s30 }
 0x5ea   : > { %v3275_v42 = vpop.permute.xlu2 %3274  ;;  %v3561_v2 = vpop.permute.xlu1 %3560 }
 0x5eb   : > { %v3433_v60 = vpop.permute.xlu0 %3432 }
 0x5ec   : > { %v3830_v3 = vsel %vm1879_vm8, %v3798_v20, %v3433_v60 }
 0x5ed   : > { %v3862_v24 = vsel %vm1912_vm7, %v3830_v3, %v3561_v2 }
 0x5ee   : > { %4276 = vmatmul.msk.f32.gmra.mxu3 %vm1958_vm9, %v3862_v24  ;;  %v2574_v24 = vld [vmem:[#allocation2 + $0xaa] sm:$0xff] }
 0x5f0   : > { %3286 = vrot.lane.b32.xlu2 %v2509_v30, %s4385_s29  ;;  %3320 = vrot.lane.b32.xlu1 %v2526_v40, %s4385_s29  ;;  %v4362_v30 = vld [vmem:[#allocation2 + $0x30] sm:$0xff]  ;;  %v8497_v40 = vld [vmem:[#allocation38_spill] sm:$0xff] }
 0x5f1   : > { %3414 = vrot.lane.b32.xlu0 %v2541_v55, %s4386_s30  ;;  %v3624_v13 = vsel %vm258_vm0, %v4362_v30, %v8497_v40  ;;  %v8498_v55 = vld [vmem:[#allocation110_spill] sm:$0xff] }
 0x5f2   : > { %v3531_v45 = vpop.permute.xlu2 %3530  ;;  %v3307_v56 = vpop.permute.xlu1 %3306  ;;  %v3656_v33 = vsel %vm1714_vm2, %v3624_v13, %v8498_v55  ;;  %v4364_v30 = vld [vmem:[#allocation2 + $0x48] sm:$0xff]  ;;  %v8506_v55 = vld [vmem:[#allocation175_spill] sm:$0xff] }
 0x5f3   : > { %v3401_v36 = vpop.permute.xlu0 %3400  ;;  %v3799_v5 = vsel %vm1846_vm6, %v7263_v25, %v3307_v56  ;;  %v2542_v25 = vld [vmem:[#allocation2 + $0xa9] sm:$0xff]  ;;  %v3688_v56 = vsel %vm1747_vm3, %v3656_v33, %v6840_v41 }
 0x5f4   : > { %v3814_v19 = vsel %vm1879_vm8, %v3782_v18, %v3401_v36  ;;  %v3720_v18 = vsel %vm1780_vm5, %v3688_v56, %v6936_v54  ;;  %v8505_v40 = vld [vmem:[#allocation34_spill] sm:$0xff] }
 0x5f5   : > { %v3846_v44 = vsel %vm1912_vm7, %v3814_v19, %v3529_v23  ;;  %v8495_v23 = vld [vmem:[#allocation67_spill] sm:$0xff]  ;;  %v3752_v36 = vsel %vm1813_vm4, %v3720_v18, %v7133_v39  ;;  %v3626_v13 = vsel %vm258_vm0, %v4364_v30, %v8505_v40  ;;  %v4366_v40 = vld [vmem:[#allocation2 + $0x60] sm:$0xff] }
 0x5f6   : > { %4260 = vmatmul.msk.f32.gmra.mxu1 %vm1958_vm9, %v3846_v44  ;;  %v3623_v51 = vsel %vm258_vm0, %v4361_v8, %v8495_v23  ;;  %v4363_v8 = vld [vmem:[#allocation2 + $0x38] sm:$0xff]  ;;  %v8499_v23 = vld [vmem:[#allocation42_spill] sm:$0xff]  ;;  %v3658_v33 = vsel %vm1714_vm2, %v3626_v13, %v8506_v55  ;;  %v8515_v13 = vld [vmem:[#allocation103_spill] sm:$0xff] }
 0x5f7   : > { %v3655_v14 = vsel %vm1714_vm2, %v3623_v51, %v8496_v12  ;;  %v3625_v51 = vsel %vm258_vm0, %v4363_v8, %v8499_v23  ;;  %v8500_v12 = vld [vmem:[#allocation76_spill] sm:$0xff]  ;;  %v3628_v55 = vsel %vm258_vm0, %v4366_v40, %v8515_v13 }
 0x5f8   : > { %3542 = vrot.lane.b32.xlu2 %v2573_v7, %s4387_s6  ;;  %3576 = vrot.lane.b32.xlu1 %v2590_v15, %s4387_s6  ;;  %v3687_v62 = vsel %vm1747_vm3, %v3655_v14, %v6802_v46  ;;  %v3657_v14 = vsel %vm1714_vm2, %v3625_v51, %v8500_v12  ;;  %v4365_v51 = vld [vmem:[#allocation2 + $0x50] sm:$0xff]  ;;  %v8510_v12 = vld [vmem:[#allocation41_spill] sm:$0xff] }
 0x5f9   : > { %3448 = vrot.lane.b32.xlu0 %v2558_v10, %s4386_s30  ;;  %v3719_v11 = vsel %vm1780_vm5, %v3687_v62, %v6962_v63  ;;  %v2559_v63 = vld [vmem:[#allocation2 + $0x171] sm:$0xff] }
 0x5fa   : > { %v3277_v58 = vpop.permute.xlu2 %3276  ;;  %v3563_v17 = vpop.permute.xlu1 %3562  ;;  %v3751_v9 = vsel %vm1813_vm4, %v3719_v11, %v7135_v26  ;;  %v8503_v11 = vld [vmem:[#allocation40_spill] sm:$0xff] }
 0x5fb   : > { %v3435_v53 = vpop.permute.xlu0 %3434  ;;  %v3783_v20 = vsel %vm1846_vm6, %v3751_v9, %v3275_v42  ;;  %v3784_v7 = vsel %vm1846_vm6, %v3752_v36, %v3277_v58  ;;  %v8509_v36 = vld [vmem:[#allocation147_spill] sm:$0xff] }
 0x5fc   : > { %v3831_v31 = vsel %vm1879_vm8, %v3799_v5, %v3435_v53  ;;  %v2592_v5 = vld [vmem:[#allocation2 + $0x182] sm:$0xff] }
 0x5fd   : > { %v3863_v61 = vsel %vm1912_vm7, %v3831_v31, %v3563_v17  ;;  %v2575_v17 = vld [vmem:[#allocation2 + $0xb2] sm:$0xff] }
 0x5fe   : > { %4277 = vmatmul.msk.f32.gmra.mxu3 %vm1958_vm9, %v3863_v61 }
 0x600   : > { %3288 = vrot.lane.b32.xlu2 %v2510_v4, %s4385_s29  ;;  %3322 = vrot.lane.b32.xlu1 %v2527_v21, %s4385_s29  ;;  %v2544_v4 = vld [vmem:[#allocation2 + $0xc1] sm:$0xff] }
 0x601   : > { %3416 = vrot.lane.b32.xlu0 %v2542_v25, %s4386_s30  ;;  %v8501_v21 = vld [vmem:[#allocation190_spill] sm:$0xff] }
 0x602   : > { %v3533_v48 = vpop.permute.xlu2 %3532  ;;  %v3309_v2 = vpop.permute.xlu1 %3308  ;;  %v3689_v62 = vsel %vm1747_vm3, %v3657_v14, %v8501_v21  ;;  %v3627_v14 = vsel %vm258_vm0, %v4365_v51, %v8510_v12  ;;  %v2562_v21 = vld [vmem:[#allocation2 + $0x199] sm:$0xff] }
 0x603   : > { %v3403_v60 = vpop.permute.xlu0 %3402  ;;  %v3800_v42 = vsel %vm1846_vm6, %v7189_v28, %v3309_v2  ;;  %v2543_v28 = vld [vmem:[#allocation2 + $0xb1] sm:$0xff]  ;;  %v2515_v12 = vld [vmem:[#allocation2 + $0xe0] sm:$0xff] }
 0x604   : > { %v3815_v46 = vsel %vm1879_vm8, %v3783_v20, %v3403_v60 }
 0x605   : > { %v3847_v3 = vsel %vm1912_vm7, %v3815_v46, %v3531_v45  ;;  %v2528_v45 = vld [vmem:[#allocation2 + $0x180] sm:$0xff] }
 0x606   : > { %4261 = vmatmul.msk.f32.gmra.mxu1 %vm1958_vm9, %v3847_v3 }
 0x608   : > { %3544 = vrot.lane.b32.xlu2 %v2574_v24, %s4387_s6  ;;  %3578 = vrot.lane.b32.xlu1 %v2591_v43, %s4387_s6  ;;  %v2529_v24 = vld [vmem:[#allocation2 + $0x188] sm:$0xff] }
 0x609   : > { %3450 = vrot.lane.b32.xlu0 %v2559_v63, %s4386_s30  ;;  %v8504_v63 = vld [vmem:[#allocation112_spill] sm:$0xff] }
 0x60a   : > { %v3279_v26 = vpop.permute.xlu2 %3278  ;;  %v3565_v37 = vpop.permute.xlu1 %3564 }
 0x60b   : > { %v3437_v35 = vpop.permute.xlu0 %3436 }
 0x60c   : > { %v3832_v32 = vsel %vm1879_vm8, %v3800_v42, %v3437_v35 }
 0x60d   : > { %v3864_v22 = vsel %vm1912_vm7, %v3832_v32, %v3565_v37 }
 0x60e   : > { %4278 = vmatmul.msk.f32.gmra.mxu3 %vm1958_vm9, %v3864_v22 }
 0x610   : > { %3290 = vrot.lane.b32.xlu2 %v2511_v38, %s4385_s29  ;;  %3324 = vrot.lane.b32.xlu1 %v2528_v45, %s4385_s29  ;;  %v2593_v38 = vld [vmem:[#allocation2 + $0x18a] sm:$0xff] }
 0x611   : > { %3418 = vrot.lane.b32.xlu0 %v2543_v28, %s4386_s30  ;;  %v8507_v45 = vld [vmem:[#allocation155_spill] sm:$0xff]  ;;  %v8508_v28 = vld [vmem:[#allocation144_spill] sm:$0xff] }
 0x612   : > { %v3535_v19 = vpop.permute.xlu2 %3534  ;;  %v3311_v44 = vpop.permute.xlu1 %3310  ;;  %v3690_v56 = vsel %vm1747_vm3, %v3658_v33, %v8507_v45  ;;  %v7576_v33 = vld [vmem:[%s7854_s4] ss:$0 sm:$0xff] }
 0x613   : > { %v3405_v15 = vpop.permute.xlu0 %3404  ;;  %v3801_v58 = vsel %vm1846_vm6, %v7299_v47, %v3311_v44  ;;  %v8502_v47 = vld [vmem:[#allocation98_spill] sm:$0xff]  ;;  %v3722_v18 = vsel %vm1780_vm5, %v3690_v56, %v8508_v28  ;;  %v2578_v45 = vld [vmem:[#allocation2 + $0xda] sm:$0xff] }
 0x614   : > { %v3816_v41 = vsel %vm1879_vm8, %v3784_v7, %v3405_v15  ;;  %v3721_v25 = vsel %vm1780_vm5, %v3689_v62, %v8502_v47  ;;  %v2514_v62 = vld [vmem:[#allocation2 + $0xd8] sm:$0xff]  ;;  %v8512_v47 = vld [vmem:[#allocation49_spill] sm:$0xff] }
 0x615   : > { %v3848_v10 = vsel %vm1912_vm7, %v3816_v41, %v3533_v48  ;;  %v3753_v9 = vsel %vm1813_vm4, %v3721_v25, %v8503_v11  ;;  %v8513_v11 = vld [vmem:[#allocation119_spill] sm:$0xff]  ;;  %v2595_v56 = vld [vmem:[#allocation2 + $0x1a2] sm:$0xff] }
 0x616   : > { %4262 = vmatmul.msk.f32.gmra.mxu1 %vm1958_vm9, %v3848_v10  ;;  %v3785_v20 = vsel %vm1846_vm6, %v3753_v9, %v3279_v26 }
 0x618   : > { %3546 = vrot.lane.b32.xlu2 %v2575_v17, %s4387_s6  ;;  %3580 = vrot.lane.b32.xlu1 %v2592_v5, %s4387_s6 }
 0x619   : > { %3452 = vrot.lane.b32.xlu0 %v6890_v6, %s4386_s30  ;;  %v2512_v6 = vld [vmem:[#allocation2 + $0xc0] sm:$0xff] }
 0x61a   : > { %v3281_v54 = vpop.permute.xlu2 %3280  ;;  %v3567_v39 = vpop.permute.xlu1 %3566 }
 0x61b   : > { %v3439_v53 = vpop.permute.xlu0 %3438 }
 0x61c   : > { %v3833_v31 = vsel %vm1879_vm8, %v3801_v58, %v3439_v53  ;;  %v2530_v58 = vld [vmem:[#allocation2 + $0x198] sm:$0xff] }
 0x61d   : > { %v3865_v61 = vsel %vm1912_vm7, %v3833_v31, %v3567_v39  ;;  %v2577_v39 = vld [vmem:[#allocation2 + $0xca] sm:$0xff] }
 0x61e   : > { %4279 = vmatmul.msk.f32.gmra.mxu3 %vm1958_vm9, %v3865_v61 }
 0x620   : > { %3292 = vrot.lane.b32.xlu2 %v2512_v6, %s4385_s29  ;;  %3420 = vrot.lane.b32.xlu1 %v2544_v4, %s4386_s30  ;;  %v8511_v6 = vld [vmem:[#allocation154_spill] sm:$0xff] }
 0x621   : > { %3198 = vrot.lane.b32.xlu0 %v2591_v43, %s4384_s28  ;;  %v2576_v43 = vld [vmem:[#allocation2 + $0xc2] sm:$0xff]  ;;  %v3659_v4 = vsel %vm1714_vm2, %v3627_v14, %v8511_v6 }
 0x622   : > { %v3537_v48 = vpop.permute.xlu2 %3536  ;;  %v3313_v2 = vpop.permute.xlu1 %3312  ;;  %v3691_v25 = vsel %vm1747_vm3, %v3659_v4, %v8512_v47  ;;  %v2579_v14 = vld [vmem:[#allocation2 + $0xe2] sm:$0xff] }
 0x623   : > { %v3407_v60 = vpop.permute.xlu0 %3406  ;;  %v3802_v26 = vsel %vm1846_vm6, %v7296_v57, %v3313_v2  ;;  %v2513_v57 = vld [vmem:[#allocation2 + $0xc8] sm:$0xff]  ;;  %v3723_v9 = vsel %vm1780_vm5, %v3691_v25, %v8513_v11 }
 0x624   : > { %v3817_v46 = vsel %vm1879_vm8, %v3785_v20, %v3407_v60  ;;  %v2547_v6 = vld [vmem:[#allocation2 + $0xe1] sm:$0xff] }
 0x625   : > { %v3849_v3 = vsel %vm1912_vm7, %v3817_v46, %v3535_v19  ;;  %v3754_v19 = vsel %vm1813_vm4, %v3722_v18, %v8509_v36  ;;  %v2563_v18 = vld [vmem:[#allocation2 + $0x1a1] sm:$0xff]  ;;  %v8518_v36 = vld [vmem:[#allocation163_spill] sm:$0xff] }
 0x626   : > { %4263 = vmatmul.msk.f32.gmra.mxu1 %vm1958_vm9, %v3849_v3  ;;  %v3786_v15 = vsel %vm1846_vm6, %v3754_v19, %v3281_v54  ;;  %v4367_v11 = vld [vmem:[#allocation2 + $0x68] sm:$0xff] }
 0x628   : > { %3326 = vrot.lane.b32.xlu2 %v2529_v24, %s4385_s29  ;;  %3454 = vrot.lane.b32.xlu1 %v8504_v63, %s4386_s30 }
 0x629   : > { %3548 = vrot.lane.b32.xlu0 %v2576_v43, %s4387_s6  ;;  %v2531_v43 = vld [vmem:[#allocation2 + $0x1a0] sm:$0xff] }
 0x62a   : > { %v3283_v37 = vpop.permute.xlu2 %3282  ;;  %v3569_v42 = vpop.permute.xlu1 %3568 }
 0x62b   : > { %v3441_v35 = vpop.permute.xlu0 %3440 }
 0x62c   : > { %v3834_v32 = vsel %vm1879_vm8, %v3802_v26, %v3441_v35 }
 0x62d   : > { %v3866_v22 = vsel %vm1912_vm7, %v3834_v32, %v3569_v42  ;;  %v2546_v42 = vld [vmem:[#allocation2 + $0xd9] sm:$0xff] }
 0x62e   : > { %4280 = vmatmul.msk.f32.gmra.mxu3 %vm1958_vm9, %v3866_v22 }
 0x630   : > { %3582 = vrot.lane.b32.xlu2 %v2593_v38, %s4387_s6  ;;  %3200 = vrot.lane.b32.xlu1 %v2592_v5, %s4384_s28  ;;  %v2545_v5 = vld [vmem:[#allocation2 + $0xc9] sm:$0xff] }
 0x631   : > { %3294 = vrot.lane.b32.xlu0 %v2513_v57, %s4385_s29  ;;  %v8517_v57 = vld [vmem:[#allocation36_spill] sm:$0xff] }
 0x632   : > { %v3539_v44 = vpop.permute.xlu2 %3538  ;;  %v3315_v7 = vpop.permute.xlu1 %3314 }
 0x633   : > { %v3409_v41 = vpop.permute.xlu0 %3408  ;;  %v3803_v54 = vsel %vm1846_vm6, %v7220_v16, %v3315_v7  ;;  %v2594_v16 = vld [vmem:[#allocation2 + $0x19a] sm:$0xff]  ;;  %v8519_v7 = vld [vmem:[#allocation102_spill] sm:$0xff] }
 0x634   : > { %v3818_v10 = vsel %vm1879_vm8, %v3786_v15, %v3409_v41 }
 0x635   : > { %v3850_v17 = vsel %vm1912_vm7, %v3818_v10, %v3537_v48  ;;  %v8514_v48 = vld [vmem:[#allocation133_spill] sm:$0xff] }
 0x636   : > { %4264 = vmatmul.msk.f32.gmra.mxu1 %vm1958_vm9, %v3850_v17  ;;  %v3755_v2 = vsel %vm1813_vm4, %v3723_v9, %v8514_v48  ;;  %v8522_v9 = vld [vmem:[#allocation55_spill] sm:$0xff] }
 0x637   : > { %v3787_v46 = vsel %vm1846_vm6, %v3755_v2, %v3283_v37  ;;  %v3629_v48 = vsel %vm258_vm0, %v4367_v11, %v8522_v9  ;;  %v8523_v2 = vld [vmem:[#allocation97_spill] sm:$0xff] }
 0x638   : > { %3422 = vrot.lane.b32.xlu2 %v2545_v5, %s4386_s30  ;;  %3550 = vrot.lane.b32.xlu1 %v2577_v39, %s4387_s6 }
 0x639   : > { %3328 = vrot.lane.b32.xlu0 %v2530_v58, %s4385_s29 }
 0x63a   : > { %v3285_v53 = vpop.permute.xlu2 %3284  ;;  %v3571_v31 = vpop.permute.xlu1 %3570 }
 0x63b   : > { %v3443_v61 = vpop.permute.xlu0 %3442 }
 0x63c   : > { %v3835_v8 = vsel %vm1879_vm8, %v3803_v54, %v3443_v61 }
 0x63d   : > { %v3867_v23 = vsel %vm1912_vm7, %v3835_v8, %v3571_v31  ;;  %v8520_v31 = vld [vmem:[#allocation19_spill] sm:$0xff] }
 0x63e   : > { %4281 = vmatmul.msk.f32.gmra.mxu3 %vm1958_vm9, %v3867_v23 }
 0x640   : > { %3456 = vrot.lane.b32.xlu2 %v2562_v21, %s4386_s30  ;;  %3296 = vrot.lane.b32.xlu1 %v2514_v62, %s4385_s29 }
 0x641   : > { %3584 = vrot.lane.b32.xlu0 %v2594_v16, %s4387_s6 }
 0x642   : > { %v3541_v20 = vpop.permute.xlu2 %3540  ;;  %v3317_v60 = vpop.permute.xlu1 %3316 }
 0x643   : > { %v3411_v3 = vpop.permute.xlu0 %3410  ;;  %v3804_v37 = vsel %vm1846_vm6, %v7326_v59, %v3317_v60  ;;  %v8524_v60 = vld [vmem:[#allocation168_spill] sm:$0xff] }
 0x644   : > { %v3819_v24 = vsel %vm1879_vm8, %v3787_v46, %v3411_v3  ;;  %v8525_v3 = vld [vmem:[#allocation156_spill] sm:$0xff] }
 0x645   : > { %v3851_v63 = vsel %vm1912_vm7, %v3819_v24, %v3539_v44 }
 0x646   : > { %4265 = vmatmul.msk.f32.gmra.mxu1 %vm1958_vm9, %v3851_v63 }
 0x648   : > { %3202 = vrot.lane.b32.xlu2 %v2593_v38, %s4384_s28  ;;  %3330 = vrot.lane.b32.xlu1 %v2531_v43, %s4385_s29  ;;  %v8516_v38 = vld [vmem:[#allocation187_spill] sm:$0xff] }
 0x649   : > { %3424 = vrot.lane.b32.xlu0 %v2546_v42, %s4386_s30  ;;  %v3660_v59 = vsel %vm1714_vm2, %v3628_v55, %v8516_v38 }
 0x64a   : > { %v3287_v26 = vpop.permute.xlu2 %3286  ;;  %v3573_v35 = vpop.permute.xlu1 %3572  ;;  %v3692_v28 = vsel %vm1747_vm3, %v3660_v59, %v8517_v57  ;;  %v8527_v59 = vld [vmem:[#allocation6_spill] sm:$0xff] }
 0x64b   : > { %v3445_v32 = vpop.permute.xlu0 %3444  ;;  %v3724_v19 = vsel %vm1780_vm5, %v3692_v28, %v8518_v36  ;;  %v4368_v36 = vld [vmem:[#allocation2 + $0x78] sm:$0xff] }
 0x64c   : > { %v3836_v22 = vsel %vm1879_vm8, %v3804_v37, %v3445_v32  ;;  %v3756_v15 = vsel %vm1813_vm4, %v3724_v19, %v8519_v7  ;;  %v8528_v19 = vld [vmem:[#allocation33_spill] sm:$0xff]  ;;  %v8529_v7 = vld [vmem:[#allocation63_spill] sm:$0xff] }
 0x64d   : > { %v3868_v30 = vsel %vm1912_vm7, %v3836_v22, %v3573_v35  ;;  %v3788_v5 = vsel %vm1846_vm6, %v3756_v15, %v3285_v53  ;;  %v8521_v53 = vld [vmem:[#allocation4_spill] sm:$0xff] }
 0x64e   : > { %4282 = vmatmul.msk.f32.gmra.mxu3 %vm1958_vm9, %v3868_v30  ;;  %v8526_v30 = vld [vmem:[#allocation21_spill] sm:$0xff] }
 0x650   : > { %3552 = vrot.lane.b32.xlu2 %v2578_v45, %s4387_s6  ;;  %3586 = vrot.lane.b32.xlu1 %v2595_v56, %s4387_s6 }
 0x651   : > { %3458 = vrot.lane.b32.xlu0 %v2563_v18, %s4386_s30  ;;  %v4050_v44 = vpop.f32.mrf.mxu3 }
 0x652   : > { %v3543_v41 = vpop.permute.xlu2 %3542  ;;  %v4051_v10 = vadd.f32 %v7576_v33, %v4050_v44  ;;  %v3319_v17 = vpop.permute.xlu1 %3318  ;;  %v3630_v44 = vsel %vm258_vm0, %v4368_v36, %v8528_v19 }
 0x653   : > { %v3413_v39 = vpop.permute.xlu0 %3412  ;;  %v4002_v58 = vpop.f32.mrf.mxu1  ;;  %v3805_v62 = vsel %vm1846_vm6, %v7323_v1, %v3319_v17  ;;  %v3662_v15 = vsel %vm1714_vm2, %v3630_v44, %v8529_v7 }
 0x654   : > { %v4114_v54 = vadd.f32 %v4051_v10, %v8520_v31  ;;  %v3820_v61 = vsel %vm1879_vm8, %v3788_v5, %v3413_v39  ;;  %v4003_v8 = vadd.f32 %v7576_v33, %v4002_v58  ;;  %v8532_v39 = vld [vmem:[#allocation99_spill] sm:$0xff] }
 0x655   : > { %v3852_v23 = vsel %vm1912_vm7, %v3820_v61, %v3541_v20  ;;  %v3661_v20 = vsel %vm1714_vm2, %v3629_v48, %v8523_v2  ;;  %v4369_v48 = vld [vmem:[#allocation2 + $0x80] sm:$0xff]  ;;  %v8535_v2 = vld [vmem:[#allocation90_spill] sm:$0xff] }
 0x656   : > { %4146 = vst.msk [vmem:[%s7596_s27 + $0x80] sm:$0xff] %vm258_vm0, %v4114_v54  ;;  %v4098_v51 = vadd.f32 %v4003_v8, %v8521_v53  ;;  %4266 = vmatmul.msk.f32.gmra.mxu1 %vm1958_vm9, %v3852_v23  ;;  %v3693_v46 = vsel %vm1747_vm3, %v3661_v20, %v8524_v60  ;;  %v8533_v53 = vld [vmem:[#allocation20_spill] sm:$0xff]  ;;  %v3631_v20 = vsel %vm258_vm0, %v4369_v48, %v8535_v2  ;;  %v8536_v60 = vld [vmem:[#allocation118_spill] sm:$0xff] }
 0x657   : > { %v3725_v1 = vsel %vm1780_vm5, %v3693_v46, %v8525_v3  ;;  %v3663_v46 = vsel %vm1714_vm2, %v3631_v20, %v8536_v60  ;;  %v8537_v3 = vld [vmem:[#allocation50_spill] sm:$0xff] }
 0x658   : > { %4130 = vst.msk [vmem:[%s7596_s27] sm:$0xff] %vm258_vm0, %v4098_v51  ;;  %3298 = vrot.lane.b32.xlu2 %v2515_v12, %s4385_s29  ;;  %3554 = vrot.lane.b32.xlu1 %v2579_v14, %s4387_s6  ;;  %v3757_v63 = vsel %vm1813_vm4, %v3725_v1, %v7165_v50  ;;  %v3695_v1 = vsel %vm1747_vm3, %v3663_v46, %v8537_v3 }
 0x659   : > { %3426 = vrot.lane.b32.xlu0 %v2547_v6, %s4386_s30  ;;  %v3789_v37 = vsel %vm1846_vm6, %v3757_v63, %v3287_v26 }
 0x65a   : > { %v3289_v4 = vpop.permute.xlu2 %3288  ;;  %v3575_v21 = vpop.permute.xlu1 %3574 }
 0x65b   : > { %v3447_v47 = vpop.permute.xlu0 %3446 }
 0x65c   : > { %v3837_v25 = vsel %vm1879_vm8, %v3805_v62, %v3447_v47  ;;  %v8534_v62 = vld [vmem:[#allocation3_spill] sm:$0xff] }
 0x65d   : > { %v3869_v16 = vsel %vm1912_vm7, %v3837_v25, %v3575_v21 }
 0x65e   : > { %4283 = vmatmul.msk.f32.gmra.mxu3 %vm1958_vm9, %v3869_v16 }
 0x661   : > { %v4053_v24 = vpop.f32.mrf.mxu3 }
 0x662   : > { %v3545_v43 = vpop.permute.xlu2 %3544  ;;  %v4054_v42 = vadd.f32 %v7576_v33, %v4053_v24  ;;  %v3321_v35 = vpop.permute.xlu1 %3320 }
 0x663   : > { %v3415_v32 = vpop.permute.xlu0 %3414  ;;  %v4005_v22 = vpop.f32.mrf.mxu1  ;;  %v3806_v26 = vsel %vm1846_vm6, %v7260_v27, %v3321_v35  ;;  %v8531_v27 = vld [vmem:[#allocation143_spill] sm:$0xff] }
 0x664   : > { %v4115_v40 = vadd.f32 %v4054_v42, %v8526_v30  ;;  %v3821_v13 = vsel %vm1879_vm8, %v3789_v37, %v3415_v32  ;;  %v4006_v55 = vadd.f32 %v7576_v33, %v4005_v22  ;;  %v8539_v42 = vld [vmem:[#allocation125_spill] sm:$0xff] }
 0x665   : > { %v3853_v38 = vsel %vm1912_vm7, %v3821_v13, %v3543_v41  ;;  %v8530_v41 = vld [vmem:[#allocation100_spill] sm:$0xff]  ;;  %v8540_v13 = vld [vmem:[#allocation22_spill] sm:$0xff] }
 0x666   : > { %4147 = vst.msk [vmem:[%s7596_s27 + $0x88] sm:$0xff] %vm258_vm0, %v4115_v40  ;;  %v4099_v50 = vadd.f32 %v4006_v55, %v8527_v59  ;;  %4267 = vmatmul.msk.f32.gmra.mxu1 %vm1958_vm9, %v3853_v38  ;;  %v3694_v10 = vsel %vm1747_vm3, %v3662_v15, %v8530_v41 }
 0x667   : > { %v3726_v17 = vsel %vm1780_vm5, %v3694_v10, %v8531_v27 }
 0x668   : > { %4131 = vst.msk [vmem:[%s7596_s27 + $0x8] sm:$0xff] %vm258_vm0, %v4099_v50  ;;  %v3758_v58 = vsel %vm1813_vm4, %v3726_v17, %v8532_v39  ;;  %v8542_v17 = vld [vmem:[#allocation24_spill] sm:$0xff]  ;;  %v4370_v39 = vld [vmem:[#allocation2 + $0x90] sm:$0xff] }
 0x669   : > { %v3790_v61 = vsel %vm1846_vm6, %v3758_v58, %v3289_v4  ;;  %v8543_v58 = vld [vmem:[#allocation43_spill] sm:$0xff] }
 0x66a   : > { %v3577_v45 = vpop.permute.xlu1 %3576  ;;  %v3291_v57 = vpop.permute.xlu2 %3290 }
 0x66b   : > { %v3449_v56 = vpop.permute.xlu0 %3448 }
 0x66c   : > { %v3838_v28 = vsel %vm1879_vm8, %v3806_v26, %v3449_v56 }
 0x66d   : > { %v3870_v18 = vsel %vm1912_vm7, %v3838_v28, %v3577_v45  ;;  %v8541_v45 = vld [vmem:[#allocation5_spill] sm:$0xff] }
 0x66e   : > { %4284 = vmatmul.msk.f32.gmra.mxu3 %vm1958_vm9, %v3870_v18 }
 0x671   : > { %v4056_v5 = vpop.f32.mrf.mxu3 }
 0x672   : > { %v4057_v31 = vadd.f32 %v7576_v33, %v4056_v5  ;;  %v3323_v54 = vpop.permute.xlu1 %3322  ;;  %v3547_v21 = vpop.permute.xlu2 %3546 }
 0x673   : > { %v3417_v8 = vpop.permute.xlu0 %3416  ;;  %v4008_v23 = vpop.f32.mrf.mxu1  ;;  %v3807_v25 = vsel %vm1846_vm6, %v7345_v34, %v3323_v54  ;;  %v8538_v34 = vld [vmem:[#allocation191_spill] sm:$0xff]  ;;  %v8544_v54 = vld [vmem:[#allocation94_spill] sm:$0xff] }
 0x674   : > { %v4116_v51 = vadd.f32 %v4057_v31, %v8533_v53  ;;  %v3822_v12 = vsel %vm1879_vm8, %v3790_v61, %v3417_v8  ;;  %v4009_v14 = vadd.f32 %v7576_v33, %v4008_v23  ;;  %v3727_v63 = vsel %vm1780_vm5, %v3695_v1, %v8538_v34  ;;  %v8545_v8 = vld [vmem:[#allocation7_spill] sm:$0xff]  ;;  %v8546_v53 = vld [vmem:[#allocation169_spill] sm:$0xff] }
 0x675   : > { %v3854_v6 = vsel %vm1912_vm7, %v3822_v12, %v3545_v43  ;;  %v3759_v35 = vsel %vm1813_vm4, %v3727_v63, %v8539_v42  ;;  %v3632_v31 = vsel %vm258_vm0, %v4370_v39, %v8543_v58  ;;  %v8547_v12 = vld [vmem:[#allocation101_spill] sm:$0xff]  ;;  %v4371_v39 = vld [vmem:[#allocation2 + $0x170] sm:$0xff]  ;;  %v8555_v58 = vld [vmem:[#allocation74_spill] sm:$0xff] }
 0x676   : > { %4148 = vst.msk [vmem:[%s7596_s27 + $0x90] sm:$0xff] %vm258_vm0, %v4116_v51  ;;  %v4100_v47 = vadd.f32 %v4009_v14, %v8534_v62  ;;  %4268 = vmatmul.msk.f32.gmra.mxu1 %vm1958_vm9, %v3854_v6  ;;  %v3791_v22 = vsel %vm1846_vm6, %v3759_v35, %v3291_v57  ;;  %v3664_v61 = vsel %vm1714_vm2, %v3632_v31, %v8544_v54  ;;  %v8548_v6 = vld [vmem:[#allocation178_spill] sm:$0xff]  ;;  %v8556_v54 = vld [vmem:[#allocation77_spill] sm:$0xff] }
 0x677   : > { %v3696_v51 = vsel %vm1747_vm3, %v3664_v61, %v8546_v53  ;;  %v3651_v31 = vsel %vm258_vm0, %v4371_v39, %v8555_v58  ;;  %v8558_v53 = vld [vmem:[#allocation192_spill] sm:$0xff]  ;;  %v8569_v39 = vld [vmem:[#allocation31_spill] sm:$0xff] }
 0x678   : > { %4132 = vst.msk [vmem:[%s7596_s27 + $0x10] sm:$0xff] %vm258_vm0, %v4100_v47  ;;  %v3683_v61 = vsel %vm1714_vm2, %v3651_v31, %v8556_v54 }
 0x67a   : > { %v3579_v4 = vpop.permute.xlu1 %3578  ;;  %v3293_v24 = vpop.permute.xlu2 %3292 }
 0x67b   : > { %v3451_v16 = vpop.permute.xlu0 %3450 }
 0x67c   : > { %v3839_v11 = vsel %vm1879_vm8, %v3807_v25, %v3451_v16 }
 0x67d   : > { %v3871_v9 = vsel %vm1912_vm7, %v3839_v11, %v3579_v4 }
 0x67e   : > { %4285 = vmatmul.msk.f32.gmra.mxu3 %vm1958_vm9, %v3871_v9 }
 0x681   : > { %v4059_v43 = vpop.f32.mrf.mxu3 }
 0x682   : > { %v4060_v37 = vadd.f32 %v7576_v33, %v4059_v43  ;;  %v3325_v32 = vpop.permute.xlu1 %3324  ;;  %v3327_v56 = vpop.permute.xlu2 %3326  ;;  %v8550_v43 = vld [vmem:[#allocation9_spill] sm:$0xff] }
 0x683   : > { %v3419_v30 = vpop.permute.xlu0 %3418  ;;  %v4011_v40 = vpop.f32.mrf.mxu1  ;;  %v3808_v28 = vsel %vm1846_vm6, %v7341_v29, %v3325_v32 }
 0x684   : > { %v4117_v55 = vadd.f32 %v4060_v37, %v8540_v13  ;;  %v3823_v38 = vsel %vm1879_vm8, %v3791_v22, %v3419_v30  ;;  %v4012_v59 = vadd.f32 %v7576_v33, %v4011_v40  ;;  %v8551_v13 = vld [vmem:[#allocation66_spill] sm:$0xff] }
 0x685   : > { %v3855_v50 = vsel %vm1912_vm7, %v3823_v38, %v3547_v21  ;;  %v3728_v21 = vsel %vm1780_vm5, %v3696_v51, %v8548_v6 }
 0x686   : > { %4149 = vst.msk [vmem:[%s7596_s27 + $0x98] sm:$0xff] %vm258_vm0, %v4117_v55  ;;  %v4101_v26 = vadd.f32 %v4012_v59, %v8541_v45  ;;  %4269 = vmatmul.msk.f32.gmra.mxu1 %vm1958_vm9, %v3855_v50  ;;  %v3760_v62 = vsel %vm1813_vm4, %v3728_v21, %v7194_v52 }
 0x687   : > { %v3792_v47 = vsel %vm1846_vm6, %v3760_v62, %v3293_v24  ;;  %v8549_v24 = vld [vmem:[#allocation23_spill] sm:$0xff] }
 0x688   : > { %4133 = vst.msk [vmem:[%s7596_s27 + $0x18] sm:$0xff] %vm258_vm0, %v4101_v26 }
 0x68a   : > { %v3581_v57 = vpop.permute.xlu1 %3580  ;;  %v3583_v27 = vpop.permute.xlu2 %3582 }
 0x68b   : > { %v3453_v18 = vpop.permute.xlu0 %3452 }
 0x68c   : > { %v3840_v36 = vsel %vm1879_vm8, %v3808_v28, %v3453_v18  ;;  %v8552_v28 = vld [vmem:[#allocation25_spill] sm:$0xff] }
 0x68d   : > { %v3872_v19 = vsel %vm1912_vm7, %v3840_v36, %v3581_v57 }
 0x68e   : > { %4286 = vmatmul.msk.f32.gmra.mxu3 %vm1958_vm9, %v3872_v19 }
 0x691   : > { %v4062_v44 = vpop.f32.mrf.mxu3 }
 0x692   : > { %v4063_v7 = vadd.f32 %v7576_v33, %v4062_v44  ;;  %v3421_v15 = vpop.permute.xlu1 %3420  ;;  %v3423_v52 = vpop.permute.xlu2 %3422  ;;  %v8553_v44 = vld [vmem:[#allocation8_spill] sm:$0xff] }
 0x693   : > { %v3199_v41 = vpop.permute.xlu0 %3198  ;;  %v4014_v10 = vpop.f32.mrf.mxu1  ;;  %v3824_v16 = vsel %vm1879_vm8, %v3792_v47, %v3421_v15 }
 0x694   : > { %v4118_v5 = vadd.f32 %v4063_v7, %v8542_v17  ;;  %v4015_v29 = vadd.f32 %v7576_v33, %v4014_v10  ;;  %v3777_v14 = vsel %vm1813_vm4, %v8547_v12, %v3199_v41  ;;  %v8554_v41 = vld [vmem:[#allocation139_spill] sm:$0xff] }
 0x695   : > { %v3809_v4 = vsel %vm1846_vm6, %v3777_v14, %v3327_v56 }
 0x696   : > { %4150 = vst.msk [vmem:[%s7596_s27 + $0xa0] sm:$0xff] %vm258_vm0, %v4118_v5  ;;  %v4102_v23 = vadd.f32 %v4015_v29, %v8545_v8  ;;  %v8557_v8 = vld [vmem:[#allocation132_spill] sm:$0xff] }
 0x698   : > { %4134 = vst.msk [vmem:[%s7596_s27 + $0x20] sm:$0xff] %vm258_vm0, %v4102_v23  ;;  %v3715_v23 = vsel %vm1747_vm3, %v3683_v61, %v8557_v8  ;;  %v8570_v61 = vld [vmem:[#allocation14_spill] sm:$0xff] }
 0x699   : > { %v3747_v51 = vsel %vm1780_vm5, %v3715_v23, %v8558_v53 }
 0x69a   : > { %v3455_v25 = vpop.permute.xlu1 %3454  ;;  %v3457_v37 = vpop.permute.xlu2 %3456 }
 0x69b   : > { %v3841_v11 = vsel %vm1879_vm8, %v3809_v4, %v3455_v25  ;;  %v3549_v9 = vpop.permute.xlu0 %3548  ;;  %v8559_v25 = vld [vmem:[#allocation27_spill] sm:$0xff] }
 0x69c   : > { %v3873_v48 = vsel %vm1912_vm7, %v3841_v11, %v3583_v27  ;;  %v3856_v2 = vsel %vm1912_vm7, %v3824_v16, %v3549_v9 }
 0x69d   : > { %4287 = vmatmul.msk.f32.gmra.mxu3 %vm1958_vm9, %v3873_v48  ;;  %4270 = vmatmul.msk.f32.gmra.mxu1 %vm1958_vm9, %v3856_v2  ;;  %v8560_v2 = vld [vmem:[#allocation10_spill] sm:$0xff] }
 0x6a1   : > { %v4065_v20 = vpop.f32.mrf.mxu3 }
 0x6a2   : > { %v4066_v60 = vadd.f32 %v7576_v33, %v4065_v20  ;;  %v3201_v46 = vpop.permute.xlu1 %3200 }
 0x6a3   : > { %v3295_v3 = vpop.permute.xlu0 %3294  ;;  %v4017_v1 = vpop.f32.mrf.mxu1  ;;  %v3778_v55 = vsel %vm1813_vm4, %v8551_v13, %v3201_v46  ;;  %v8563_v13 = vld [vmem:[#allocation28_spill] sm:$0xff] }
 0x6a4   : > { %v4119_v34 = vadd.f32 %v4066_v60, %v8549_v24  ;;  %v4018_v63 = vadd.f32 %v7576_v33, %v4017_v1  ;;  %v3793_v35 = vsel %vm1846_vm6, %v7192_v49, %v3295_v3  ;;  %v3203_v49 = vpop.permute.xlu2 %3202 }
 0x6a5   : > { %v3825_v22 = vsel %vm1879_vm8, %v3793_v35, %v3423_v52  ;;  %v3779_v14 = vsel %vm1813_vm4, %v3747_v51, %v3203_v49  ;;  %v8571_v51 = vld [vmem:[#allocation32_spill] sm:$0xff] }
 0x6a6   : > { %4151 = vst.msk [vmem:[%s7596_s27 + $0xa8] sm:$0xff] %vm258_vm0, %v4119_v34  ;;  %v4103_v42 = vadd.f32 %v4018_v63, %v8550_v43 }
 0x6a8   : > { %4135 = vst.msk [vmem:[%s7596_s27 + $0x28] sm:$0xff] %vm258_vm0, %v4103_v42  ;;  %v8561_v42 = vld [vmem:[#allocation26_spill] sm:$0xff] }
 0x6aa   : > { %v3551_v32 = vpop.permute.xlu1 %3550 }
 0x6ab   : > { %v3329_v30 = vpop.permute.xlu0 %3328  ;;  %v3857_v40 = vsel %vm1912_vm7, %v3825_v22, %v3551_v32 }
 0x6ac   : > { %4271 = vmatmul.msk.f32.gmra.mxu1 %vm1958_vm9, %v3857_v40  ;;  %v3810_v38 = vsel %vm1846_vm6, %v3778_v55, %v3329_v30  ;;  %v3553_v17 = vpop.permute.xlu2 %3552 }
 0x6ad   : > { %v3842_v57 = vsel %vm1879_vm8, %v3810_v38, %v3457_v37 }
 0x6b1   : > { %v4068_v59 = vpop.f32.mrf.mxu3 }
 0x6b2   : > { %v4069_v50 = vadd.f32 %v7576_v33, %v4068_v59  ;;  %v3297_v45 = vpop.permute.xlu1 %3296  ;;  %v8564_v59 = vld [vmem:[#allocation11_spill] sm:$0xff] }
 0x6b3   : > { %v3585_v26 = vpop.permute.xlu0 %3584  ;;  %v4020_v56 = vpop.f32.mrf.mxu1  ;;  %v3794_v10 = vsel %vm1846_vm6, %v8554_v41, %v3297_v45 }
 0x6b4   : > { %v4120_v18 = vadd.f32 %v4069_v50, %v8552_v28  ;;  %v4021_v36 = vadd.f32 %v7576_v33, %v4020_v56  ;;  %v3874_v19 = vsel %vm1912_vm7, %v3842_v57, %v3585_v26  ;;  %v3299_v20 = vpop.permute.xlu2 %3298  ;;  %v8565_v56 = vld [vmem:[#allocation30_spill] sm:$0xff] }
 0x6b5   : > { %4288 = vmatmul.msk.f32.gmra.mxu3 %vm1958_vm9, %v3874_v19  ;;  %v3795_v60 = vsel %vm1846_vm6, %v7227_v0, %v3299_v20  ;;  %v8562_v0 = vld [vmem:[#allocation12_spill] sm:$0xff] }
 0x6b6   : > { %4152 = vst.msk [vmem:[%s7596_s27 + $0xb0] sm:$0xff] %vm258_vm0, %v4120_v18  ;;  %v4104_v7 = vadd.f32 %v4021_v36, %v8553_v44  ;;  %v8566_v18 = vld [vmem:[#allocation13_spill] sm:$0xff] }
 0x6b8   : > { %4136 = vst.msk [vmem:[%s7596_s27 + $0x30] sm:$0xff] %vm258_vm0, %v4104_v7 }
 0x6ba   : > { %v3331_v15 = vpop.permute.xlu1 %3330 }
 0x6bb   : > { %v3425_v27 = vpop.permute.xlu0 %3424  ;;  %v3811_v62 = vsel %vm1846_vm6, %v3779_v14, %v3331_v15  ;;  %v8567_v15 = vld [vmem:[#allocation29_spill] sm:$0xff] }
 0x6bc   : > { %v3826_v5 = vsel %vm1879_vm8, %v3794_v10, %v3425_v27  ;;  %v8568_v27 = vld [vmem:[#allocation15_spill] sm:$0xff] }
 0x6bd   : > { %v3858_v29 = vsel %vm1912_vm7, %v3826_v5, %v3553_v17 }
 0x6be   : > { %4272 = vmatmul.msk.f32.gmra.mxu1 %vm1958_vm9, %v3858_v29 }
 0x6c1   : > { %v4071_v12 = vpop.f32.mrf.mxu3 }
 0x6c2   : > { %v4072_v6 = vadd.f32 %v7576_v33, %v4071_v12  ;;  %v3587_v21 = vpop.permute.xlu1 %3586 }
 0x6c3   : > { %v3459_v47 = vpop.permute.xlu0 %3458  ;;  %v4023_v4 = vpop.f32.mrf.mxu1 }
 0x6c4   : > { %v4121_v16 = vadd.f32 %v4072_v6, %v8559_v25  ;;  %v3843_v11 = vsel %vm1879_vm8, %v3811_v62, %v3459_v47  ;;  %v4024_v9 = vadd.f32 %v7576_v33, %v4023_v4  ;;  %v8573_v25 = vld [vmem:[#allocation78_spill] sm:$0xff] }
 0x6c5   : > { %v3875_v48 = vsel %vm1912_vm7, %v3843_v11, %v3587_v21  ;;  %v8572_v21 = vld [vmem:[#allocation16_spill] sm:$0xff] }
 0x6c6   : > { %4153 = vst.msk [vmem:[%s7596_s27 + $0xb8] sm:$0xff] %vm258_vm0, %v4121_v16  ;;  %v4105_v52 = vadd.f32 %v4024_v9, %v8560_v2  ;;  %4289 = vmatmul.msk.f32.gmra.mxu3 %vm1958_vm9, %v3875_v48  ;;  %v8574_v48 = vld [vmem:[#allocation18_spill] sm:$0xff] }
 0x6c8   : > { %4137 = vst.msk [vmem:[%s7596_s27 + $0x38] sm:$0xff] %vm258_vm0, %v4105_v52 }
 0x6ca   : > { %v3555_v3 = vpop.permute.xlu1 %3554 }
 0x6cb   : > { %v3427_v46 = vpop.permute.xlu0 %3426 }
 0x6cc   : > { %v3827_v1 = vsel %vm1879_vm8, %v3795_v60, %v3427_v46  ;;  %v8575_v46 = vld [vmem:[#allocation84_spill] sm:$0xff] }
 0x6cd   : > { %v3859_v24 = vsel %vm1912_vm7, %v3827_v1, %v3555_v3 }
 0x6ce   : > { %4273 = vmatmul.msk.f32.gmra.mxu1 %vm1958_vm9, %v3859_v24  ;;  %v8576_v24 = vld [vmem:[#allocation17_spill] sm:$0xff] }
 0x6d1   : > { %v4074_v34 = vpop.f32.mrf.mxu3 }
 0x6d2   : > { %v4075_v63 = vadd.f32 %v7576_v33, %v4074_v34 }
 0x6d3   : > { %v4026_v43 = vpop.f32.mrf.mxu1 }
 0x6d4   : > { %v4122_v35 = vadd.f32 %v4075_v63, %v8561_v42  ;;  %v4027_v37 = vadd.f32 %v7576_v33, %v4026_v43 }
 0x6d6   : > { %4154 = vst.msk [vmem:[%s7596_s27 + $0xc0] sm:$0xff] %vm258_vm0, %v4122_v35  ;;  %v4106_v32 = vadd.f32 %v4027_v37, %v8562_v0 }
 0x6d8   : > { %4138 = vst.msk [vmem:[%s7596_s27 + $0x40] sm:$0xff] %vm258_vm0, %v4106_v32 }
 0x6e1   : > { %v4077_v22 = vpop.f32.mrf.mxu3 }
 0x6e2   : > { %v4078_v30 = vadd.f32 %v7576_v33, %v4077_v22 }
 0x6e3   : > { %v4029_v40 = vpop.f32.mrf.mxu1 }
 0x6e4   : > { %v4123_v55 = vadd.f32 %v4078_v30, %v8563_v13  ;;  %v4030_v38 = vadd.f32 %v7576_v33, %v4029_v40 }
 0x6e6   : > { %4155 = vst.msk [vmem:[%s7596_s27 + $0xc8] sm:$0xff] %vm258_vm0, %v4123_v55  ;;  %v4107_v49 = vadd.f32 %v4030_v38, %v8564_v59 }
 0x6e8   : > { %4139 = vst.msk [vmem:[%s7596_s27 + $0x48] sm:$0xff] %vm258_vm0, %v4107_v49 }
 0x6f1   : > { %v4080_v50 = vpop.f32.mrf.mxu3 }
 0x6f2   : > { %v4081_v45 = vadd.f32 %v7576_v33, %v4080_v50 }
 0x6f3   : > { %v4032_v26 = vpop.f32.mrf.mxu1 }
 0x6f4   : > { %v4124_v57 = vadd.f32 %v4081_v45, %v8565_v56  ;;  %v4033_v28 = vadd.f32 %v7576_v33, %v4032_v26 }
 0x6f6   : > { %4156 = vst.msk [vmem:[%s7596_s27 + $0xd0] sm:$0xff] %vm258_vm0, %v4124_v57  ;;  %v4108_v36 = vadd.f32 %v4033_v28, %v8566_v18 }
 0x6f8   : > { %4140 = vst.msk [vmem:[%s7596_s27 + $0x50] sm:$0xff] %vm258_vm0, %v4108_v36 }
 0x701   : > { %v4083_v19 = vpop.f32.mrf.mxu3 }
 0x702   : > { %v4084_v44 = vadd.f32 %v7576_v33, %v4083_v19 }
 0x703   : > { %v4035_v7 = vpop.f32.mrf.mxu1 }
 0x704   : > { %v4125_v41 = vadd.f32 %v4084_v44, %v8567_v15  ;;  %v4036_v10 = vadd.f32 %v7576_v33, %v4035_v7 }
 0x706   : > { %4157 = vst.msk [vmem:[%s7596_s27 + $0xd8] sm:$0xff] %vm258_vm0, %v4125_v41  ;;  %v4109_v17 = vadd.f32 %v4036_v10, %v8568_v27 }
 0x708   : > { %4141 = vst.msk [vmem:[%s7596_s27 + $0x58] sm:$0xff] %vm258_vm0, %v4109_v17 }
 0x711   : > { %v4086_v5 = vpop.f32.mrf.mxu3 }
 0x712   : > { %v4087_v29 = vadd.f32 %v7576_v33, %v4086_v5 }
 0x714   : > { %v4126_v58 = vadd.f32 %v4087_v29, %v8569_v39 }
 0x716   : > { %4158 = vst.msk [vmem:[%s7596_s27 + $0xe0] sm:$0xff] %vm258_vm0, %v4126_v58 }
 0x71a   : > { %v4038_v31 = vpop.f32.mrf.mxu1 }
 0x71b   : > { %v4039_v54 = vadd.f32 %v7576_v33, %v4038_v31 }
 0x71d   : > { %v4110_v8 = vadd.f32 %v4039_v54, %v8570_v61 }
 0x71f   : > { %4142 = vst.msk [vmem:[%s7596_s27 + $0x60] sm:$0xff] %vm258_vm0, %v4110_v8 }
 0x720   : > { %v4089_v23 = vpop.f32.mrf.mxu3 }
 0x721   : > { %v4090_v53 = vadd.f32 %v7576_v33, %v4089_v23 }
 0x723   : > { %v4127_v12 = vadd.f32 %v4090_v53, %v8571_v51 }
 0x725   : > { %4159 = vst.msk [vmem:[%s7596_s27 + $0xe8] sm:$0xff] %vm258_vm0, %v4127_v12 }
 0x729   : > { %v4041_v14 = vpop.f32.mrf.mxu1 }
 0x72a   : > { %v4042_v6 = vadd.f32 %v7576_v33, %v4041_v14 }
 0x72c   : > { %v4111_v62 = vadd.f32 %v4042_v6, %v8572_v21 }
 0x72e   : > { %4143 = vst.msk [vmem:[%s7596_s27 + $0x68] sm:$0xff] %vm258_vm0, %v4111_v62 }
 0x738   : > { %v4092_v47 = vpop.f32.mrf.mxu3 }
 0x739   : > { %v4093_v4 = vadd.f32 %v7576_v33, %v4092_v47 }
 0x73b   : > { %v4128_v16 = vadd.f32 %v4093_v4, %v8573_v25  ;;  %v4044_v11 = vpop.f32.mrf.mxu1 }
 0x73c   : > { %v4045_v9 = vadd.f32 %v7576_v33, %v4044_v11 }
 0x73d   : > { %4160 = vst.msk [vmem:[%s7596_s27 + $0xf0] sm:$0xff] %vm258_vm0, %v4128_v16 }
 0x73e   : > { %v4112_v2 = vadd.f32 %v4045_v9, %v8574_v48 }
 0x740   : > { %4144 = vst.msk [vmem:[%s7596_s27 + $0x70] sm:$0xff] %vm258_vm0, %v4112_v2 }
 0x749   : > { %v4095_v52 = vpop.f32.mrf.mxu3 }
 0x74a   : > { %v4096_v20 = vadd.f32 %v7576_v33, %v4095_v52 }
 0x74b   : > { %v4047_v60 = vpop.f32.mrf.mxu1 }
 0x74c   : > { %v4129_v3 = vadd.f32 %v4096_v20, %v8575_v46  ;;  %v4048_v1 = vadd.f32 %v7576_v33, %v4047_v60 }
 0x74e   : > { %4161 = vst.msk [vmem:[%s7596_s27 + $0xf8] sm:$0xff] %vm258_vm0, %v4129_v3  ;;  %v4113_v34 = vadd.f32 %v4048_v1, %v8576_v24 }
 0x750   : > { %4145 = vst.msk [vmem:[%s7596_s27 + $0x78] sm:$0xff] %vm258_vm0, %v4113_v34 }
 0x751 PF: > { %s15_s18 = sadd.s32 1, %s4378_s18  }
 0x752   : > { %p12_p4 = scmp.ge.s32.totalorder %s15_s18, 4  }
 0x754   :  { %14 = sbr.rel (!%p12_p4) target bundleno = 1 (0x1), region = 73 }

</bundles_post_ra>
